<compile_context>
chip_gen: v5e
topology: v5e:2x2
jax: 0.10.0
libtpu: 0.0.40
codegen_flags: <defaults>
</compile_context>

<pallas_src>
import functools

import jax
import jax.numpy as jnp
from jax import lax
from jax.experimental import pallas as pl
from jax.experimental.pallas import tpu as pltpu

EPS = 1e-5


def _pick_divisor(n, candidates):
    for c in candidates:
        if n % c == 0:
            return c
    return n


# ----------------------------------------------------------------------------
# Kernel 1: fused 1x1-conv (tiled matmul) + folded BatchNorm (+ optional ReLU)
# ----------------------------------------------------------------------------
def _pointwise_bn_kernel(x_ref, w_ref, s_ref, b_ref, o_ref, acc_ref, *, relu):
    k = pl.program_id(2)

    @pl.when(k == 0)
    def _():
        acc_ref[...] = jnp.zeros_like(acc_ref)

    acc_ref[...] += jnp.dot(x_ref[...], w_ref[...],
                            preferred_element_type=jnp.float32)

    @pl.when(k == pl.num_programs(2) - 1)
    def _():
        y = acc_ref[...] * s_ref[...] + b_ref[...]
        if relu:
            y = jnp.maximum(y, 0.0)
        o_ref[...] = y.astype(o_ref.dtype)


def pointwise_bn(x2d, w, scale, shift, *, relu, out_dtype):
    M, Cin = x2d.shape
    Cout = w.shape[1]
    tm = _pick_divisor(M, (512, 256, 128, 64, 32, 16, 8))
    tk = Cin if Cin <= 256 else _pick_divisor(Cin, (256, 128))
    tn = Cout if Cout <= 256 else _pick_divisor(Cout, (256, 128))
    scale2d = scale.reshape(1, Cout).astype(jnp.float32)
    shift2d = shift.reshape(1, Cout).astype(jnp.float32)
    bytes_accessed = (x2d.size * x2d.dtype.itemsize + w.size * w.dtype.itemsize
                      + M * Cout * jnp.dtype(out_dtype).itemsize + 2 * Cout * 4)
    return pl.pallas_call(
        functools.partial(_pointwise_bn_kernel, relu=relu),
        out_shape=jax.ShapeDtypeStruct((M, Cout), out_dtype),
        grid=(M // tm, Cout // tn, Cin // tk),
        in_specs=[
            pl.BlockSpec((tm, tk), lambda i, j, k: (i, k)),
            pl.BlockSpec((tk, tn), lambda i, j, k: (k, j)),
            pl.BlockSpec((1, tn), lambda i, j, k: (0, j)),
            pl.BlockSpec((1, tn), lambda i, j, k: (0, j)),
        ],
        out_specs=pl.BlockSpec((tm, tn), lambda i, j, k: (i, j)),
        scratch_shapes=[pltpu.VMEM((tm, tn), jnp.float32)],
        compiler_params=pltpu.CompilerParams(
            dimension_semantics=("parallel", "parallel", "arbitrary"),
            vmem_limit_bytes=32 * 1024 * 1024),
        cost_estimate=pl.CostEstimate(
            flops=2 * M * Cin * Cout, transcendentals=0,
            bytes_accessed=int(bytes_accessed)),
    )(x2d, w, scale2d, shift2d)


# ----------------------------------------------------------------------------
# Kernel 2: 3x3 conv (padding=1, stride=1) + folded BatchNorm + ReLU
# grid = (batch, row-blocks); the input image block is resident across row blocks.
# ----------------------------------------------------------------------------
# TODO(synk): stride > 1 for conv2 (and the optional downsample branch) are not
# implemented; the reference configuration uses stride=1 / downsample=None.
def _conv3x3_bn_relu_kernel(x_ref, w_ref, s_ref, b_ref, o_ref, xs_ref,
                            *, H, W, Cin, Cout, TH):
    r = pl.program_id(1)

    # Build the three column-shifted, row-padded slabs once per image.  Each slab is
    # constructed as a full value and stored in one shot into flattened f32 scratch
    # of shape (3, (H+2)*W, Cin): slab[dx][hp*W + w] = x[hp-1, w + dx - 1] (0 if OOB).
    @pl.when(r == 0)
    def _():
        xv = x_ref[...].astype(jnp.float32)                        # (H, W, Cin)
        zcol = jnp.zeros((H, 1, Cin), jnp.float32)
        zrow = jnp.zeros((W, Cin), jnp.float32)
        left = jnp.concatenate([zcol, xv[:, :W - 1, :]], axis=1)   # x[., w-1]
        right = jnp.concatenate([xv[:, 1:, :], zcol], axis=1)      # x[., w+1]
        xs_ref[0] = jnp.concatenate(
            [zrow, left.reshape(H * W, Cin), zrow], axis=0)
        xs_ref[1] = jnp.concatenate(
            [zrow, xv.reshape(H * W, Cin), zrow], axis=0)
        xs_ref[2] = jnp.concatenate(
            [zrow, right.reshape(H * W, Cin), zrow], axis=0)

    row0 = r * TH
    acc = jnp.zeros((TH * W, Cout), jnp.float32)
    for dy in range(3):
        for dx in range(3):
            start = pl.multiple_of((row0 + dy) * W, W)             # aligned slice
            patch = xs_ref[dx, pl.ds(start, TH * W), :]            # (TH*W, Cin)
            acc = acc + jnp.dot(patch.astype(jnp.bfloat16), w_ref[dy, dx],
                                preferred_element_type=jnp.float32)
    y = acc * s_ref[...] + b_ref[...]
    o_ref[...] = jnp.maximum(y, 0.0).reshape(TH, W, Cout).astype(o_ref.dtype)


def conv3x3_bn_relu(x_nhwc, w, scale, shift, *, out_dtype):
    N, H, W, Cin = x_nhwc.shape
    Cout = w.shape[3]
    TH = 8 if H % 8 == 0 else H                                    # output row tile
    scale2d = scale.reshape(1, Cout).astype(jnp.float32)
    shift2d = shift.reshape(1, Cout).astype(jnp.float32)
    bytes_accessed = (x_nhwc.size * x_nhwc.dtype.itemsize
                      + w.size * w.dtype.itemsize
                      + N * H * W * Cout * jnp.dtype(out_dtype).itemsize)
    return pl.pallas_call(
        functools.partial(_conv3x3_bn_relu_kernel,
                          H=H, W=W, Cin=Cin, Cout=Cout, TH=TH),
        out_shape=jax.ShapeDtypeStruct((N, H, W, Cout), out_dtype),
        grid=(N, H // TH),
        in_specs=[
            # Same block index for all r -> the image is DMA'd once per n.
            pl.BlockSpec((None, H, W, Cin), lambda n, r: (n, 0, 0, 0)),
            pl.BlockSpec((3, 3, Cin, Cout), lambda n, r: (0, 0, 0, 0)),
            pl.BlockSpec((1, Cout), lambda n, r: (0, 0)),
            pl.BlockSpec((1, Cout), lambda n, r: (0, 0)),
        ],
        out_specs=pl.BlockSpec((None, TH, W, Cout), lambda n, r: (n, r, 0, 0)),
        scratch_shapes=[pltpu.VMEM((3, (H + 2) * W, Cin), jnp.float32)],
        compiler_params=pltpu.CompilerParams(
            dimension_semantics=("parallel", "arbitrary"),
            vmem_limit_bytes=32 * 1024 * 1024),
        cost_estimate=pl.CostEstimate(
            flops=2 * 9 * N * H * W * Cin * Cout, transcendentals=0,
            bytes_accessed=int(bytes_accessed)),
    )(x_nhwc, w, scale2d, shift2d)


# ----------------------------------------------------------------------------
# Kernel 3: ECA channel gate + residual add + ReLU, per batch image.
# Pool + gate + apply are fused so y3 is read from HBM only once.
# ----------------------------------------------------------------------------
def _eca_add_relu_kernel(y_ref, id_ref, we_ref, o_ref, *, C):
    yv = y_ref[...]                                                # (H, W, C) f32
    # Global average pool over spatial dims (kept >= 2-D throughout).
    pooled = jnp.mean(jnp.mean(yv, axis=0), axis=0, keepdims=True)  # (1, C)
    # 3-tap 1-D conv along channels (pad=1): concat-pad + static lane slices.
    zero = jnp.zeros((1, 1), jnp.float32)
    padded = jnp.concatenate([zero, pooled, zero], axis=1)         # (1, C + 2)
    left = padded[:, 0:C]                                          # p[c-1], 0 at c=0
    right = padded[:, 2:C + 2]                                     # p[c+1], 0 at c=C-1
    z = we_ref[0] * left + we_ref[1] * pooled + we_ref[2] * right
    gate = 1.0 / (1.0 + jnp.exp(-z))                               # sigmoid
    out = yv * gate.reshape(1, 1, C) + id_ref[...]
    o_ref[...] = jnp.maximum(out, 0.0)


def eca_add_relu(y_nhwc, identity_nhwc, we):
    N, H, W, C = y_nhwc.shape
    return pl.pallas_call(
        functools.partial(_eca_add_relu_kernel, C=C),
        out_shape=jax.ShapeDtypeStruct((N, H, W, C), jnp.float32),
        grid=(N,),
        in_specs=[
            pl.BlockSpec((None, H, W, C), lambda n: (n, 0, 0, 0)),
            pl.BlockSpec((None, H, W, C), lambda n: (n, 0, 0, 0)),
            pl.BlockSpec(memory_space=pltpu.MemorySpace.SMEM),     # 3 conv1d weights
        ],
        out_specs=pl.BlockSpec((None, H, W, C), lambda n: (n, 0, 0, 0)),
        compiler_params=pltpu.CompilerParams(
            dimension_semantics=("parallel",),
            vmem_limit_bytes=32 * 1024 * 1024),
        cost_estimate=pl.CostEstimate(
            flops=5 * N * H * W * C, transcendentals=N * C,
            bytes_accessed=3 * N * H * W * C * 4),
    )(y_nhwc, identity_nhwc, we.astype(jnp.float32))


# ----------------------------------------------------------------------------
# Parameter setup + full forward (glue in plain JAX)
# ----------------------------------------------------------------------------
def fold_bn(gamma, beta, mean, var):
    scale = gamma / jnp.sqrt(var + EPS)
    shift = beta - mean * scale
    return scale, shift


def init_params(key, inplanes, planes):
    expansion = 4
    c4 = planes * expansion
    ks = jax.random.split(key, 8)

    def bn_params(k, c):
        k1, k2, k3, k4 = jax.random.split(k, 4)
        gamma = 1.0 + 0.1 * jax.random.normal(k1, (c,), jnp.float32)
        beta = 0.1 * jax.random.normal(k2, (c,), jnp.float32)
        mean = 0.1 * jax.random.normal(k3, (c,), jnp.float32)
        var = 0.5 + jax.random.uniform(k4, (c,), jnp.float32)
        return gamma, beta, mean, var

    p = {}
    # conv1: 1x1, inplanes -> planes  (stored as (Cin, Cout))
    p['w1'] = 0.1 * jax.random.normal(ks[0], (inplanes, planes), jnp.float32)
    p['bn1'] = bn_params(ks[1], planes)
    # conv2: 3x3, planes -> planes    (stored HWIO: (3, 3, Cin, Cout))
    p['w2'] = 0.1 * jax.random.normal(ks[2], (3, 3, planes, planes), jnp.float32)
    p['bn2'] = bn_params(ks[3], planes)
    # conv3: 1x1, planes -> planes*4
    p['w3'] = 0.1 * jax.random.normal(ks[4], (planes, c4), jnp.float32)
    p['bn3'] = bn_params(ks[5], c4)
    # eca: Conv1d(1, 1, kernel_size=3, padding=1, bias=False) -> 3 weights
    p['we'] = 0.5 * jax.random.normal(ks[6], (3,), jnp.float32)
    return p


def bottleneck_forward(x_nchw, params):
    x = jnp.transpose(x_nchw, (0, 2, 3, 1)).astype(jnp.float32)   # NCHW -> NHWC
    N, H, W, Cin = x.shape
    planes = params['w1'].shape[1]
    c4 = params['w3'].shape[1]

    s1, b1 = fold_bn(*params['bn1'])
    s2, b2 = fold_bn(*params['bn2'])
    s3, b3 = fold_bn(*params['bn3'])

    # bf16 inputs for the MXU (f32 accumulation + f32 BN epilogue in-kernel).
    xb = x.astype(jnp.bfloat16)
    w1 = params['w1'].astype(jnp.bfloat16)
    w2 = params['w2'].astype(jnp.bfloat16)
    w3 = params['w3'].astype(jnp.bfloat16)

    # conv1 (1x1) + bn1 + relu  -> bf16 activations (halves HBM traffic downstream)
    y1 = pointwise_bn(xb.reshape(N * H * W, Cin), w1, s1, b1,
                      relu=True, out_dtype=jnp.bfloat16).reshape(N, H, W, planes)
    # conv2 (3x3, pad=1, stride=1) + bn2 + relu
    y2 = conv3x3_bn_relu(y1, w2, s2, b2, out_dtype=jnp.bfloat16)
    # conv3 (1x1) + bn3 (no relu) -> f32 for the ECA / residual path
    y3 = pointwise_bn(y2.reshape(N * H * W, planes), w3, s3, b3,
                      relu=False, out_dtype=jnp.float32).reshape(N, H, W, c4)
    # ECA gate * y3 + identity, then ReLU (downsample is None: identity = x)
    out = eca_add_relu(y3, x, params['we'])
    return jnp.transpose(out, (0, 3, 1, 2))                       # NHWC -> NCHW


# ----------------------------------------------------------------------------
# Pure-JAX reference mirroring the kernels' numeric contract (bf16 matmul inputs,
# f32 accumulation, eval-mode BN) for the correctness check.
# ----------------------------------------------------------------------------
def reference_forward(x_nchw, params):
    x = jnp.transpose(x_nchw, (0, 2, 3, 1)).astype(jnp.float32)
    xb = x.astype(jnp.bfloat16)
    w1 = params['w1'].astype(jnp.bfloat16)
    w2 = params['w2'].astype(jnp.bfloat16)
    w3 = params['w3'].astype(jnp.bfloat16)
    s1, b1 = fold_bn(*params['bn1'])
    s2, b2 = fold_bn(*params['bn2'])
    s3, b3 = fold_bn(*params['bn3'])

    y = jnp.einsum('nhwc,cd->nhwd', xb, w1, preferred_element_type=jnp.float32)
    y = jax.nn.relu(y * s1 + b1).astype(jnp.bfloat16)
    y = lax.conv_general_dilated(y, w2, window_strides=(1, 1), padding='SAME',
                                 dimension_numbers=('NHWC', 'HWIO', 'NHWC'),
                                 preferred_element_type=jnp.float32)
    y = jax.nn.relu(y * s2 + b2).astype(jnp.bfloat16)
    y = jnp.einsum('nhwc,cd->nhwd', y, w3, preferred_element_type=jnp.float32)
    y = y * s3 + b3
    pooled = y.mean(axis=(1, 2))                         # (N, C)
    pad = jnp.pad(pooled, ((0, 0), (1, 1)))
    we = params['we']
    z = we[0] * pad[:, :-2] + we[1] * pad[:, 1:-1] + we[2] * pad[:, 2:]
    gate = jax.nn.sigmoid(z)[:, None, None, :]
    y = jax.nn.relu(y * gate + x)
    return jnp.transpose(y, (0, 3, 1, 2))


if __name__ == "__main__":
    key = jax.random.PRNGKey(0)
    k_x, k_p = jax.random.split(key)

    # Small shapes consistent with the module: inplanes = planes * expansion so the
    # residual add works with downsample=None, stride=1.  Channel counts chosen to
    # keep the lane axis reasonably dense (c4 = 128).
    N, planes, H, W = 2, 32, 16, 16
    inplanes = planes * 4      # 128

    x = jax.random.normal(k_x, (N, inplanes, H, W), jnp.float32)
    params = init_params(k_p, inplanes, planes)

    forward = jax.jit(bottleneck_forward)
    out = jax.block_until_ready(forward(x, params))
    ref = reference_forward(x, params)

    assert out.shape == (N, inplanes, H, W), out.shape
    err = jnp.max(jnp.abs(out - ref))
    assert jnp.allclose(out, ref, atol=5e-3, rtol=5e-3), f"max abs err {err}"

    print("KERNEL_OK")
</pallas_src>

<mosaic_0001>
module attributes {stable_mosaic.version = 11 : i64} {
  func.func @_pointwise_bn_kernel(%arg0: i32, %arg1: i32, %arg2: i32, %arg3: memref<512x128xbf16, #tpu.memory_space<vmem>>, %arg4: memref<128x32xbf16, #tpu.memory_space<vmem>>, %arg5: memref<1x32xf32, #tpu.memory_space<vmem>>, %arg6: memref<1x32xf32, #tpu.memory_space<vmem>>, %arg7: memref<512x32xbf16, #tpu.memory_space<vmem>>, %arg8: memref<512x32xf32, #tpu.memory_space<vmem>>) attributes {dimension_semantics = [#tpu.dimension_semantics<parallel>, #tpu.dimension_semantics<parallel>, #tpu.dimension_semantics<arbitrary>], iteration_bounds = array<i64: 1, 1, 1>, scalar_prefetch = 0 : i64, scratch_operands = 1 : i64, tpu.core_type = #tpu.core_type<tc>, window_params = [{transform_indices = @transform_0, window_bounds = array<i64: 512, 128>}, {transform_indices = @transform_1, window_bounds = array<i64: 128, 32>}, {transform_indices = @transform_2, window_bounds = array<i64: 1, 32>}, {transform_indices = @transform_3, window_bounds = array<i64: 1, 32>}, {transform_indices = @transform_4, window_bounds = array<i64: 512, 32>}]} {
    %c0_i32 = arith.constant 0 : i32
    %0 = arith.cmpi eq, %arg2, %c0_i32 : i32
    %1 = arith.extui %0 : i1 to i32
    %c0_i32_0 = arith.constant 0 : i32
    %2 = arith.cmpi ne, %1, %c0_i32_0 : i32
    scf.if %2 {
      %cst_10 = arith.constant 0.000000e+00 : f32
      %12 = vector.broadcast %cst_10 : f32 to vector<512x32xf32>
      %c0_11 = arith.constant 0 : index
      %c0_12 = arith.constant 0 : index
      %13 = vector.load %arg8[%c0_11, %c0_12] : memref<512x32xf32, #tpu.memory_space<vmem>>, vector<512x32xf32>
      tpu.vector_store %arg8[%c0_11, %c0_12], %12 {strides = array<i32>} : memref<512x32xf32, #tpu.memory_space<vmem>>, vector<512x32xf32>,
    } else {
    }
    %c0 = arith.constant 0 : index
    %c0_1 = arith.constant 0 : index
    %3 = vector.load %arg8[%c0, %c0_1] : memref<512x32xf32, #tpu.memory_space<vmem>>, vector<512x32xf32>
    %c0_2 = arith.constant 0 : index
    %c0_3 = arith.constant 0 : index
    %4 = vector.load %arg3[%c0_2, %c0_3] : memref<512x128xbf16, #tpu.memory_space<vmem>>, vector<512x128xbf16>
    %c0_4 = arith.constant 0 : index
    %c0_5 = arith.constant 0 : index
    %5 = vector.load %arg4[%c0_4, %c0_5] : memref<128x32xbf16, #tpu.memory_space<vmem>>, vector<128x32xbf16>
    %cst = arith.constant dense<0.000000e+00> : vector<512x32xf32>
    %6 = tpu.matmul %4, %5, %cst {dimension_numbers = #tpu.dot_dimension_numbers<[1], [0], [0], [1], [0, 0, 1, 1], [], []>} : vector<512x128xbf16>, vector<128x32xbf16>, vector<512x32xf32> -> vector<512x32xf32>
    %7 = arith.addf %3, %6 : vector<512x32xf32>
    %c0_6 = arith.constant 0 : index
    %c0_7 = arith.constant 0 : index
    %8 = vector.load %arg8[%c0_6, %c0_7] : memref<512x32xf32, #tpu.memory_space<vmem>>, vector<512x32xf32>
    tpu.vector_store %arg8[%c0_6, %c0_7], %7 {strides = array<i32>} : memref<512x32xf32, #tpu.memory_space<vmem>>, vector<512x32xf32>,
    %c0_i32_8 = arith.constant 0 : i32
    %9 = arith.cmpi eq, %arg2, %c0_i32_8 : i32
    %10 = arith.extui %9 : i1 to i32
    %c0_i32_9 = arith.constant 0 : i32
    %11 = arith.cmpi ne, %10, %c0_i32_9 : i32
    scf.if %11 {
      %c0_10 = arith.constant 0 : index
      %c0_11 = arith.constant 0 : index
      %12 = vector.load %arg8[%c0_10, %c0_11] : memref<512x32xf32, #tpu.memory_space<vmem>>, vector<512x32xf32>
      %c0_12 = arith.constant 0 : index
      %c0_13 = arith.constant 0 : index
      %13 = vector.load %arg5[%c0_12, %c0_13] : memref<1x32xf32, #tpu.memory_space<vmem>>, vector<1x32xf32>
      %14 = vector.broadcast %13 : vector<1x32xf32> to vector<512x32xf32>
      %15 = arith.mulf %12, %14 : vector<512x32xf32>
      %c0_14 = arith.constant 0 : index
      %c0_15 = arith.constant 0 : index
      %16 = vector.load %arg6[%c0_14, %c0_15] : memref<1x32xf32, #tpu.memory_space<vmem>>, vector<1x32xf32>
      %17 = vector.broadcast %16 : vector<1x32xf32> to vector<512x32xf32>
      %18 = arith.addf %15, %17 : vector<512x32xf32>
      %cst_16 = arith.constant 0.000000e+00 : f32
      %19 = vector.broadcast %cst_16 : f32 to vector<512x32xf32>
      %20 = arith.maximumf %18, %19 : vector<512x32xf32>
      %21 = arith.truncf %20 : vector<512x32xf32> to vector<512x32xbf16>
      %c0_17 = arith.constant 0 : index
      %c0_18 = arith.constant 0 : index
      %22 = vector.load %arg7[%c0_17, %c0_18] : memref<512x32xbf16, #tpu.memory_space<vmem>>, vector<512x32xbf16>
      tpu.vector_store %arg7[%c0_17, %c0_18], %21 {strides = array<i32>} : memref<512x32xbf16, #tpu.memory_space<vmem>>, vector<512x32xbf16>,
    } else {
    }
    return
  }
  func.func @transform_0(%arg0: i32, %arg1: i32, %arg2: i32) -> (i32, i32) {
    %c0_i32 = arith.constant 0 : i32
    return %arg0, %arg2 : i32, i32
  }
  func.func @transform_1(%arg0: i32, %arg1: i32, %arg2: i32) -> (i32, i32) {
    %c0_i32 = arith.constant 0 : i32
    return %arg2, %arg1 : i32, i32
  }
  func.func @transform_2(%arg0: i32, %arg1: i32, %arg2: i32) -> (i32, i32) {
    %c0_i32 = arith.constant 0 : i32
    %c0_i32_0 = arith.constant 0 : i32
    return %c0_i32, %arg1 : i32, i32
  }
  func.func @transform_3(%arg0: i32, %arg1: i32, %arg2: i32) -> (i32, i32) {
    %c0_i32 = arith.constant 0 : i32
    %c0_i32_0 = arith.constant 0 : i32
    return %c0_i32, %arg1 : i32, i32
  }
  func.func @transform_4(%arg0: i32, %arg1: i32, %arg2: i32) -> (i32, i32) {
    %c0_i32 = arith.constant 0 : i32
    return %arg0, %arg1 : i32, i32
  }
}

module attributes {stable_mosaic.version = 11 : i64} {
  func.func @_pointwise_bn_kernel(%arg0: i32, %arg1: i32, %arg2: i32, %arg3: memref<512x32xbf16, #tpu.memory_space<vmem>>, %arg4: memref<32x128xbf16, #tpu.memory_space<vmem>>, %arg5: memref<1x128xf32, #tpu.memory_space<vmem>>, %arg6: memref<1x128xf32, #tpu.memory_space<vmem>>, %arg7: memref<512x128xf32, #tpu.memory_space<vmem>>, %arg8: memref<512x128xf32, #tpu.memory_space<vmem>>) attributes {dimension_semantics = [#tpu.dimension_semantics<parallel>, #tpu.dimension_semantics<parallel>, #tpu.dimension_semantics<arbitrary>], iteration_bounds = array<i64: 1, 1, 1>, scalar_prefetch = 0 : i64, scratch_operands = 1 : i64, tpu.core_type = #tpu.core_type<tc>, window_params = [{transform_indices = @transform_0, window_bounds = array<i64: 512, 32>}, {transform_indices = @transform_1, window_bounds = array<i64: 32, 128>}, {transform_indices = @transform_2, window_bounds = array<i64: 1, 128>}, {transform_indices = @transform_3, window_bounds = array<i64: 1, 128>}, {transform_indices = @transform_4, window_bounds = array<i64: 512, 128>}]} {
    %c0_i32 = arith.constant 0 : i32
    %0 = arith.cmpi eq, %arg2, %c0_i32 : i32
    %1 = arith.extui %0 : i1 to i32
    %c0_i32_0 = arith.constant 0 : i32
    %2 = arith.cmpi ne, %1, %c0_i32_0 : i32
    scf.if %2 {
      %cst_10 = arith.constant 0.000000e+00 : f32
      %12 = vector.broadcast %cst_10 : f32 to vector<512x128xf32>
      %c0_11 = arith.constant 0 : index
      %c0_12 = arith.constant 0 : index
      %13 = vector.load %arg8[%c0_11, %c0_12] : memref<512x128xf32, #tpu.memory_space<vmem>>, vector<512x128xf32>
      tpu.vector_store %arg8[%c0_11, %c0_12], %12 {strides = array<i32>} : memref<512x128xf32, #tpu.memory_space<vmem>>, vector<512x128xf32>,
    } else {
    }
    %c0 = arith.constant 0 : index
    %c0_1 = arith.constant 0 : index
    %3 = vector.load %arg8[%c0, %c0_1] : memref<512x128xf32, #tpu.memory_space<vmem>>, vector<512x128xf32>
    %c0_2 = arith.constant 0 : index
    %c0_3 = arith.constant 0 : index
    %4 = vector.load %arg3[%c0_2, %c0_3] : memref<512x32xbf16, #tpu.memory_space<vmem>>, vector<512x32xbf16>
    %c0_4 = arith.constant 0 : index
    %c0_5 = arith.constant 0 : index
    %5 = vector.load %arg4[%c0_4, %c0_5] : memref<32x128xbf16, #tpu.memory_space<vmem>>, vector<32x128xbf16>
    %cst = arith.constant dense<0.000000e+00> : vector<512x128xf32>
    %6 = tpu.matmul %4, %5, %cst {dimension_numbers = #tpu.dot_dimension_numbers<[1], [0], [0], [1], [0, 0, 1, 1], [], []>} : vector<512x32xbf16>, vector<32x128xbf16>, vector<512x128xf32> -> vector<512x128xf32>
    %7 = arith.addf %3, %6 : vector<512x128xf32>
    %c0_6 = arith.constant 0 : index
    %c0_7 = arith.constant 0 : index
    %8 = vector.load %arg8[%c0_6, %c0_7] : memref<512x128xf32, #tpu.memory_space<vmem>>, vector<512x128xf32>
    tpu.vector_store %arg8[%c0_6, %c0_7], %7 {strides = array<i32>} : memref<512x128xf32, #tpu.memory_space<vmem>>, vector<512x128xf32>,
    %c0_i32_8 = arith.constant 0 : i32
    %9 = arith.cmpi eq, %arg2, %c0_i32_8 : i32
    %10 = arith.extui %9 : i1 to i32
    %c0_i32_9 = arith.constant 0 : i32
    %11 = arith.cmpi ne, %10, %c0_i32_9 : i32
    scf.if %11 {
      %c0_10 = arith.constant 0 : index
      %c0_11 = arith.constant 0 : index
      %12 = vector.load %arg8[%c0_10, %c0_11] : memref<512x128xf32, #tpu.memory_space<vmem>>, vector<512x128xf32>
      %c0_12 = arith.constant 0 : index
      %c0_13 = arith.constant 0 : index
      %13 = vector.load %arg5[%c0_12, %c0_13] : memref<1x128xf32, #tpu.memory_space<vmem>>, vector<1x128xf32>
      %14 = vector.broadcast %13 : vector<1x128xf32> to vector<512x128xf32>
      %15 = arith.mulf %12, %14 : vector<512x128xf32>
      %c0_14 = arith.constant 0 : index
      %c0_15 = arith.constant 0 : index
      %16 = vector.load %arg6[%c0_14, %c0_15] : memref<1x128xf32, #tpu.memory_space<vmem>>, vector<1x128xf32>
      %17 = vector.broadcast %16 : vector<1x128xf32> to vector<512x128xf32>
      %18 = arith.addf %15, %17 : vector<512x128xf32>
      %c0_16 = arith.constant 0 : index
      %c0_17 = arith.constant 0 : index
      %19 = vector.load %arg7[%c0_16, %c0_17] : memref<512x128xf32, #tpu.memory_space<vmem>>, vector<512x128xf32>
      tpu.vector_store %arg7[%c0_16, %c0_17], %18 {strides = array<i32>} : memref<512x128xf32, #tpu.memory_space<vmem>>, vector<512x128xf32>,
    } else {
    }
    return
  }
  func.func @transform_0(%arg0: i32, %arg1: i32, %arg2: i32) -> (i32, i32) {
    %c0_i32 = arith.constant 0 : i32
    return %arg0, %arg2 : i32, i32
  }
  func.func @transform_1(%arg0: i32, %arg1: i32, %arg2: i32) -> (i32, i32) {
    %c0_i32 = arith.constant 0 : i32
    return %arg2, %arg1 : i32, i32
  }
  func.func @transform_2(%arg0: i32, %arg1: i32, %arg2: i32) -> (i32, i32) {
    %c0_i32 = arith.constant 0 : i32
    %c0_i32_0 = arith.constant 0 : i32
    return %c0_i32, %arg1 : i32, i32
  }
  func.func @transform_3(%arg0: i32, %arg1: i32, %arg2: i32) -> (i32, i32) {
    %c0_i32 = arith.constant 0 : i32
    %c0_i32_0 = arith.constant 0 : i32
    return %c0_i32, %arg1 : i32, i32
  }
  func.func @transform_4(%arg0: i32, %arg1: i32, %arg2: i32) -> (i32, i32) {
    %c0_i32 = arith.constant 0 : i32
    return %arg0, %arg1 : i32, i32
  }
}

module attributes {stable_mosaic.version = 11 : i64} {
  func.func @_conv3x3_bn_relu_kernel(%arg0: i32, %arg1: i32, %arg2: memref<1x16x16x32xbf16, #tpu.memory_space<vmem>>, %arg3: memref<3x3x32x32xbf16, #tpu.memory_space<vmem>>, %arg4: memref<1x32xf32, #tpu.memory_space<vmem>>, %arg5: memref<1x32xf32, #tpu.memory_space<vmem>>, %arg6: memref<1x8x16x32xbf16, #tpu.memory_space<vmem>>, %arg7: memref<3x288x32xf32, #tpu.memory_space<vmem>>) attributes {dimension_semantics = [#tpu.dimension_semantics<parallel>, #tpu.dimension_semantics<arbitrary>], iteration_bounds = array<i64: 2, 2>, scalar_prefetch = 0 : i64, scratch_operands = 1 : i64, tpu.core_type = #tpu.core_type<tc>, window_params = [{transform_indices = @transform_0, window_bounds = array<i64: 1, 16, 16, 32>}, {pipeline_mode = #tpu.pipeline_mode<synchronous>, transform_indices = @transform_1, window_bounds = array<i64: 3, 3, 32, 32>}, {pipeline_mode = #tpu.pipeline_mode<synchronous>, transform_indices = @transform_2, window_bounds = array<i64: 1, 32>}, {pipeline_mode = #tpu.pipeline_mode<synchronous>, transform_indices = @transform_3, window_bounds = array<i64: 1, 32>}, {transform_indices = @transform_4, window_bounds = array<i64: 1, 8, 16, 32>}]} {
    %c0_i32 = arith.constant 0 : i32
    %0 = arith.cmpi eq, %arg1, %c0_i32 : i32
    %1 = arith.extui %0 : i1 to i32
    %c0_i32_0 = arith.constant 0 : i32
    %2 = arith.cmpi ne, %1, %c0_i32_0 : i32
    scf.if %2 {
      %c0_85 = arith.constant 0 : index
      %c0_86 = arith.constant 0 : index
      %c0_87 = arith.constant 0 : index
      %c0_88 = arith.constant 0 : index
      %117 = vector.load %arg2[%c0_85, %c0_86, %c0_87, %c0_88] : memref<1x16x16x32xbf16, #tpu.memory_space<vmem>>, vector<1x16x16x32xbf16>
      %118 = vector.shape_cast %117 : vector<1x16x16x32xbf16> to vector<16x16x32xbf16>
      %119 = arith.extf %118 : vector<16x16x32xbf16> to vector<16x16x32xf32>
      %cst_89 = arith.constant 0.000000e+00 : f32
      %120 = vector.broadcast %cst_89 : f32 to vector<16x1x32xf32>
      %cst_90 = arith.constant 0.000000e+00 : f32
      %121 = vector.broadcast %cst_90 : f32 to vector<16x32xf32>
      %122 = vector.extract_strided_slice %119 {offsets = [0, 0, 0], sizes = [16, 15, 32], strides = [1, 1, 1]} : vector<16x16x32xf32> to vector<16x15x32xf32>
      %123 = tpu.concatenate %120, %122 in 1 : vector<16x1x32xf32>, vector<16x15x32xf32> -> vector<16x16x32xf32>
      %124 = vector.extract_strided_slice %119 {offsets = [0, 1, 0], sizes = [16, 15, 32], strides = [1, 1, 1]} : vector<16x16x32xf32> to vector<16x15x32xf32>
      %125 = tpu.concatenate %124, %120 in 1 : vector<16x15x32xf32>, vector<16x1x32xf32> -> vector<16x16x32xf32>
      %126 = vector.shape_cast %123 : vector<16x16x32xf32> to vector<256x32xf32>
      %127 = tpu.concatenate %121, %126, %121 in 0 : vector<16x32xf32>, vector<256x32xf32>, vector<16x32xf32> -> vector<288x32xf32>
      %c0_91 = arith.constant 0 : index
      %c0_92 = arith.constant 0 : index
      %c0_93 = arith.constant 0 : index
      %128 = vector.load %arg7[%c0_91, %c0_92, %c0_93] : memref<3x288x32xf32, #tpu.memory_space<vmem>>, vector<1x288x32xf32>
      %129 = vector.shape_cast %128 : vector<1x288x32xf32> to vector<288x32xf32>
      %130 = vector.shape_cast %127 : vector<288x32xf32> to vector<1x288x32xf32>
      tpu.vector_store %arg7[%c0_91, %c0_92, %c0_93], %130 {strides = array<i32>} : memref<3x288x32xf32, #tpu.memory_space<vmem>>, vector<1x288x32xf32>,
      %131 = vector.shape_cast %119 : vector<16x16x32xf32> to vector<256x32xf32>
      %132 = tpu.concatenate %121, %131, %121 in 0 : vector<16x32xf32>, vector<256x32xf32>, vector<16x32xf32> -> vector<288x32xf32>
      %c1_94 = arith.constant 1 : index
      %c0_95 = arith.constant 0 : index
      %c0_96 = arith.constant 0 : index
      %133 = vector.load %arg7[%c1_94, %c0_95, %c0_96] : memref<3x288x32xf32, #tpu.memory_space<vmem>>, vector<1x288x32xf32>
      %134 = vector.shape_cast %133 : vector<1x288x32xf32> to vector<288x32xf32>
      %135 = vector.shape_cast %132 : vector<288x32xf32> to vector<1x288x32xf32>
      tpu.vector_store %arg7[%c1_94, %c0_95, %c0_96], %135 {strides = array<i32>} : memref<3x288x32xf32, #tpu.memory_space<vmem>>, vector<1x288x32xf32>,
      %136 = vector.shape_cast %125 : vector<16x16x32xf32> to vector<256x32xf32>
      %137 = tpu.concatenate %121, %136, %121 in 0 : vector<16x32xf32>, vector<256x32xf32>, vector<16x32xf32> -> vector<288x32xf32>
      %c2_97 = arith.constant 2 : index
      %c0_98 = arith.constant 0 : index
      %c0_99 = arith.constant 0 : index
      %138 = vector.load %arg7[%c2_97, %c0_98, %c0_99] : memref<3x288x32xf32, #tpu.memory_space<vmem>>, vector<1x288x32xf32>
      %139 = vector.shape_cast %138 : vector<1x288x32xf32> to vector<288x32xf32>
      %140 = vector.shape_cast %137 : vector<288x32xf32> to vector<1x288x32xf32>
      tpu.vector_store %arg7[%c2_97, %c0_98, %c0_99], %140 {strides = array<i32>} : memref<3x288x32xf32, #tpu.memory_space<vmem>>, vector<1x288x32xf32>,
    } else {
    }
    %c8_i32 = arith.constant 8 : i32
    %3 = arith.muli %arg1, %c8_i32 : i32
    %cst = arith.constant 0.000000e+00 : f32
    %4 = vector.broadcast %cst : f32 to vector<128x32xf32>
    %c0_i32_1 = arith.constant 0 : i32
    %5 = arith.addi %3, %c0_i32_1 : i32
    %c16_i32 = arith.constant 16 : i32
    %6 = arith.muli %5, %c16_i32 : i32
    %7 = tpu.assume_multiple %6, 16 : i32
    %c0 = arith.constant 0 : index
    %8 = arith.index_cast %7 : i32 to index
    %c0_2 = arith.constant 0 : index
    %9 = vector.load %arg7[%c0, %8, %c0_2] : memref<3x288x32xf32, #tpu.memory_space<vmem>>, vector<1x128x32xf32>
    %10 = vector.shape_cast %9 : vector<1x128x32xf32> to vector<128x32xf32>
    %11 = arith.truncf %10 : vector<128x32xf32> to vector<128x32xbf16>
    %c0_3 = arith.constant 0 : index
    %c0_4 = arith.constant 0 : index
    %c0_5 = arith.constant 0 : index
    %c0_6 = arith.constant 0 : index
    %12 = vector.load %arg3[%c0_3, %c0_4, %c0_5, %c0_6] : memref<3x3x32x32xbf16, #tpu.memory_space<vmem>>, vector<1x1x32x32xbf16>
    %13 = vector.shape_cast %12 : vector<1x1x32x32xbf16> to vector<32x32xbf16>
    %cst_7 = arith.constant dense<0.000000e+00> : vector<128x32xf32>
    %14 = tpu.matmul %11, %13, %cst_7 {dimension_numbers = #tpu.dot_dimension_numbers<[1], [0], [0], [1], [0, 0, 1, 1], [], []>} : vector<128x32xbf16>, vector<32x32xbf16>, vector<128x32xf32> -> vector<128x32xf32>
    %15 = arith.addf %4, %14 : vector<128x32xf32>
    %c0_i32_8 = arith.constant 0 : i32
    %16 = arith.addi %3, %c0_i32_8 : i32
    %c16_i32_9 = arith.constant 16 : i32
    %17 = arith.muli %16, %c16_i32_9 : i32
    %18 = tpu.assume_multiple %17, 16 : i32
    %c1 = arith.constant 1 : index
    %19 = arith.index_cast %18 : i32 to index
    %c0_10 = arith.constant 0 : index
    %20 = vector.load %arg7[%c1, %19, %c0_10] : memref<3x288x32xf32, #tpu.memory_space<vmem>>, vector<1x128x32xf32>
    %21 = vector.shape_cast %20 : vector<1x128x32xf32> to vector<128x32xf32>
    %22 = arith.truncf %21 : vector<128x32xf32> to vector<128x32xbf16>
    %c0_11 = arith.constant 0 : index
    %c1_12 = arith.constant 1 : index
    %c0_13 = arith.constant 0 : index
    %c0_14 = arith.constant 0 : index
    %23 = vector.load %arg3[%c0_11, %c1_12, %c0_13, %c0_14] : memref<3x3x32x32xbf16, #tpu.memory_space<vmem>>, vector<1x1x32x32xbf16>
    %24 = vector.shape_cast %23 : vector<1x1x32x32xbf16> to vector<32x32xbf16>
    %cst_15 = arith.constant dense<0.000000e+00> : vector<128x32xf32>
    %25 = tpu.matmul %22, %24, %cst_15 {dimension_numbers = #tpu.dot_dimension_numbers<[1], [0], [0], [1], [0, 0, 1, 1], [], []>} : vector<128x32xbf16>, vector<32x32xbf16>, vector<128x32xf32> -> vector<128x32xf32>
    %26 = arith.addf %15, %25 : vector<128x32xf32>
    %c0_i32_16 = arith.constant 0 : i32
    %27 = arith.addi %3, %c0_i32_16 : i32
    %c16_i32_17 = arith.constant 16 : i32
    %28 = arith.muli %27, %c16_i32_17 : i32
    %29 = tpu.assume_multiple %28, 16 : i32
    %c2 = arith.constant 2 : index
    %30 = arith.index_cast %29 : i32 to index
    %c0_18 = arith.constant 0 : index
    %31 = vector.load %arg7[%c2, %30, %c0_18] : memref<3x288x32xf32, #tpu.memory_space<vmem>>, vector<1x128x32xf32>
    %32 = vector.shape_cast %31 : vector<1x128x32xf32> to vector<128x32xf32>
    %33 = arith.truncf %32 : vector<128x32xf32> to vector<128x32xbf16>
    %c0_19 = arith.constant 0 : index
    %c2_20 = arith.constant 2 : index
    %c0_21 = arith.constant 0 : index
    %c0_22 = arith.constant 0 : index
    %34 = vector.load %arg3[%c0_19, %c2_20, %c0_21, %c0_22] : memref<3x3x32x32xbf16, #tpu.memory_space<vmem>>, vector<1x1x32x32xbf16>
    %35 = vector.shape_cast %34 : vector<1x1x32x32xbf16> to vector<32x32xbf16>
    %cst_23 = arith.constant dense<0.000000e+00> : vector<128x32xf32>
    %36 = tpu.matmul %33, %35, %cst_23 {dimension_numbers = #tpu.dot_dimension_numbers<[1], [0], [0], [1], [0, 0, 1, 1], [], []>} : vector<128x32xbf16>, vector<32x32xbf16>, vector<128x32xf32> -> vector<128x32xf32>
    %37 = arith.addf %26, %36 : vector<128x32xf32>
    %c1_i32 = arith.constant 1 : i32
    %38 = arith.addi %3, %c1_i32 : i32
    %c16_i32_24 = arith.constant 16 : i32
    %39 = arith.muli %38, %c16_i32_24 : i32
    %40 = tpu.assume_multiple %39, 16 : i32
    %c0_25 = arith.constant 0 : index
    %41 = arith.index_cast %40 : i32 to index
    %c0_26 = arith.constant 0 : index
    %42 = vector.load %arg7[%c0_25, %41, %c0_26] : memref<3x288x32xf32, #tpu.memory_space<vmem>>, vector<1x128x32xf32>
    %43 = vector.shape_cast %42 : vector<1x128x32xf32> to vector<128x32xf32>
    %44 = arith.truncf %43 : vector<128x32xf32> to vector<128x32xbf16>
    %c1_27 = arith.constant 1 : index
    %c0_28 = arith.constant 0 : index
    %c0_29 = arith.constant 0 : index
    %c0_30 = arith.constant 0 : index
    %45 = vector.load %arg3[%c1_27, %c0_28, %c0_29, %c0_30] : memref<3x3x32x32xbf16, #tpu.memory_space<vmem>>, vector<1x1x32x32xbf16>
    %46 = vector.shape_cast %45 : vector<1x1x32x32xbf16> to vector<32x32xbf16>
    %cst_31 = arith.constant dense<0.000000e+00> : vector<128x32xf32>
    %47 = tpu.matmul %44, %46, %cst_31 {dimension_numbers = #tpu.dot_dimension_numbers<[1], [0], [0], [1], [0, 0, 1, 1], [], []>} : vector<128x32xbf16>, vector<32x32xbf16>, vector<128x32xf32> -> vector<128x32xf32>
    %48 = arith.addf %37, %47 : vector<128x32xf32>
    %c1_i32_32 = arith.constant 1 : i32
    %49 = arith.addi %3, %c1_i32_32 : i32
    %c16_i32_33 = arith.constant 16 : i32
    %50 = arith.muli %49, %c16_i32_33 : i32
    %51 = tpu.assume_multiple %50, 16 : i32
    %c1_34 = arith.constant 1 : index
    %52 = arith.index_cast %51 : i32 to index
    %c0_35 = arith.constant 0 : index
    %53 = vector.load %arg7[%c1_34, %52, %c0_35] : memref<3x288x32xf32, #tpu.memory_space<vmem>>, vector<1x128x32xf32>
    %54 = vector.shape_cast %53 : vector<1x128x32xf32> to vector<128x32xf32>
    %55 = arith.truncf %54 : vector<128x32xf32> to vector<128x32xbf16>
    %c1_36 = arith.constant 1 : index
    %c1_37 = arith.constant 1 : index
    %c0_38 = arith.constant 0 : index
    %c0_39 = arith.constant 0 : index
    %56 = vector.load %arg3[%c1_36, %c1_37, %c0_38, %c0_39] : memref<3x3x32x32xbf16, #tpu.memory_space<vmem>>, vector<1x1x32x32xbf16>
    %57 = vector.shape_cast %56 : vector<1x1x32x32xbf16> to vector<32x32xbf16>
    %cst_40 = arith.constant dense<0.000000e+00> : vector<128x32xf32>
    %58 = tpu.matmul %55, %57, %cst_40 {dimension_numbers = #tpu.dot_dimension_numbers<[1], [0], [0], [1], [0, 0, 1, 1], [], []>} : vector<128x32xbf16>, vector<32x32xbf16>, vector<128x32xf32> -> vector<128x32xf32>
    %59 = arith.addf %48, %58 : vector<128x32xf32>
    %c1_i32_41 = arith.constant 1 : i32
    %60 = arith.addi %3, %c1_i32_41 : i32
    %c16_i32_42 = arith.constant 16 : i32
    %61 = arith.muli %60, %c16_i32_42 : i32
    %62 = tpu.assume_multiple %61, 16 : i32
    %c2_43 = arith.constant 2 : index
    %63 = arith.index_cast %62 : i32 to index
    %c0_44 = arith.constant 0 : index
    %64 = vector.load %arg7[%c2_43, %63, %c0_44] : memref<3x288x32xf32, #tpu.memory_space<vmem>>, vector<1x128x32xf32>
    %65 = vector.shape_cast %64 : vector<1x128x32xf32> to vector<128x32xf32>
    %66 = arith.truncf %65 : vector<128x32xf32> to vector<128x32xbf16>
    %c1_45 = arith.constant 1 : index
    %c2_46 = arith.constant 2 : index
    %c0_47 = arith.constant 0 : index
    %c0_48 = arith.constant 0 : index
    %67 = vector.load %arg3[%c1_45, %c2_46, %c0_47, %c0_48] : memref<3x3x32x32xbf16, #tpu.memory_space<vmem>>, vector<1x1x32x32xbf16>
    %68 = vector.shape_cast %67 : vector<1x1x32x32xbf16> to vector<32x32xbf16>
    %cst_49 = arith.constant dense<0.000000e+00> : vector<128x32xf32>
    %69 = tpu.matmul %66, %68, %cst_49 {dimension_numbers = #tpu.dot_dimension_numbers<[1], [0], [0], [1], [0, 0, 1, 1], [], []>} : vector<128x32xbf16>, vector<32x32xbf16>, vector<128x32xf32> -> vector<128x32xf32>
    %70 = arith.addf %59, %69 : vector<128x32xf32>
    %c2_i32 = arith.constant 2 : i32
    %71 = arith.addi %3, %c2_i32 : i32
    %c16_i32_50 = arith.constant 16 : i32
    %72 = arith.muli %71, %c16_i32_50 : i32
    %73 = tpu.assume_multiple %72, 16 : i32
    %c0_51 = arith.constant 0 : index
    %74 = arith.index_cast %73 : i32 to index
    %c0_52 = arith.constant 0 : index
    %75 = vector.load %arg7[%c0_51, %74, %c0_52] : memref<3x288x32xf32, #tpu.memory_space<vmem>>, vector<1x128x32xf32>
    %76 = vector.shape_cast %75 : vector<1x128x32xf32> to vector<128x32xf32>
    %77 = arith.truncf %76 : vector<128x32xf32> to vector<128x32xbf16>
    %c2_53 = arith.constant 2 : index
    %c0_54 = arith.constant 0 : index
    %c0_55 = arith.constant 0 : index
    %c0_56 = arith.constant 0 : index
    %78 = vector.load %arg3[%c2_53, %c0_54, %c0_55, %c0_56] : memref<3x3x32x32xbf16, #tpu.memory_space<vmem>>, vector<1x1x32x32xbf16>
    %79 = vector.shape_cast %78 : vector<1x1x32x32xbf16> to vector<32x32xbf16>
    %cst_57 = arith.constant dense<0.000000e+00> : vector<128x32xf32>
    %80 = tpu.matmul %77, %79, %cst_57 {dimension_numbers = #tpu.dot_dimension_numbers<[1], [0], [0], [1], [0, 0, 1, 1], [], []>} : vector<128x32xbf16>, vector<32x32xbf16>, vector<128x32xf32> -> vector<128x32xf32>
    %81 = arith.addf %70, %80 : vector<128x32xf32>
    %c2_i32_58 = arith.constant 2 : i32
    %82 = arith.addi %3, %c2_i32_58 : i32
    %c16_i32_59 = arith.constant 16 : i32
    %83 = arith.muli %82, %c16_i32_59 : i32
    %84 = tpu.assume_multiple %83, 16 : i32
    %c1_60 = arith.constant 1 : index
    %85 = arith.index_cast %84 : i32 to index
    %c0_61 = arith.constant 0 : index
    %86 = vector.load %arg7[%c1_60, %85, %c0_61] : memref<3x288x32xf32, #tpu.memory_space<vmem>>, vector<1x128x32xf32>
    %87 = vector.shape_cast %86 : vector<1x128x32xf32> to vector<128x32xf32>
    %88 = arith.truncf %87 : vector<128x32xf32> to vector<128x32xbf16>
    %c2_62 = arith.constant 2 : index
    %c1_63 = arith.constant 1 : index
    %c0_64 = arith.constant 0 : index
    %c0_65 = arith.constant 0 : index
    %89 = vector.load %arg3[%c2_62, %c1_63, %c0_64, %c0_65] : memref<3x3x32x32xbf16, #tpu.memory_space<vmem>>, vector<1x1x32x32xbf16>
    %90 = vector.shape_cast %89 : vector<1x1x32x32xbf16> to vector<32x32xbf16>
    %cst_66 = arith.constant dense<0.000000e+00> : vector<128x32xf32>
    %91 = tpu.matmul %88, %90, %cst_66 {dimension_numbers = #tpu.dot_dimension_numbers<[1], [0], [0], [1], [0, 0, 1, 1], [], []>} : vector<128x32xbf16>, vector<32x32xbf16>, vector<128x32xf32> -> vector<128x32xf32>
    %92 = arith.addf %81, %91 : vector<128x32xf32>
    %c2_i32_67 = arith.constant 2 : i32
    %93 = arith.addi %3, %c2_i32_67 : i32
    %c16_i32_68 = arith.constant 16 : i32
    %94 = arith.muli %93, %c16_i32_68 : i32
    %95 = tpu.assume_multiple %94, 16 : i32
    %c2_69 = arith.constant 2 : index
    %96 = arith.index_cast %95 : i32 to index
    %c0_70 = arith.constant 0 : index
    %97 = vector.load %arg7[%c2_69, %96, %c0_70] : memref<3x288x32xf32, #tpu.memory_space<vmem>>, vector<1x128x32xf32>
    %98 = vector.shape_cast %97 : vector<1x128x32xf32> to vector<128x32xf32>
    %99 = arith.truncf %98 : vector<128x32xf32> to vector<128x32xbf16>
    %c2_71 = arith.constant 2 : index
    %c2_72 = arith.constant 2 : index
    %c0_73 = arith.constant 0 : index
    %c0_74 = arith.constant 0 : index
    %100 = vector.load %arg3[%c2_71, %c2_72, %c0_73, %c0_74] : memref<3x3x32x32xbf16, #tpu.memory_space<vmem>>, vector<1x1x32x32xbf16>
    %101 = vector.shape_cast %100 : vector<1x1x32x32xbf16> to vector<32x32xbf16>
    %cst_75 = arith.constant dense<0.000000e+00> : vector<128x32xf32>
    %102 = tpu.matmul %99, %101, %cst_75 {dimension_numbers = #tpu.dot_dimension_numbers<[1], [0], [0], [1], [0, 0, 1, 1], [], []>} : vector<128x32xbf16>, vector<32x32xbf16>, vector<128x32xf32> -> vector<128x32xf32>
    %103 = arith.addf %92, %102 : vector<128x32xf32>
    %c0_76 = arith.constant 0 : index
    %c0_77 = arith.constant 0 : index
    %104 = vector.load %arg4[%c0_76, %c0_77] : memref<1x32xf32, #tpu.memory_space<vmem>>, vector<1x32xf32>
    %105 = vector.broadcast %104 : vector<1x32xf32> to vector<128x32xf32>
    %106 = arith.mulf %103, %105 : vector<128x32xf32>
    %c0_78 = arith.constant 0 : index
    %c0_79 = arith.constant 0 : index
    %107 = vector.load %arg5[%c0_78, %c0_79] : memref<1x32xf32, #tpu.memory_space<vmem>>, vector<1x32xf32>
    %108 = vector.broadcast %107 : vector<1x32xf32> to vector<128x32xf32>
    %109 = arith.addf %106, %108 : vector<128x32xf32>
    %cst_80 = arith.constant 0.000000e+00 : f32
    %110 = vector.broadcast %cst_80 : f32 to vector<128x32xf32>
    %111 = arith.maximumf %109, %110 : vector<128x32xf32>
    %112 = vector.shape_cast %111 : vector<128x32xf32> to vector<8x16x32xf32>
    %113 = arith.truncf %112 : vector<8x16x32xf32> to vector<8x16x32xbf16>
    %c0_81 = arith.constant 0 : index
    %c0_82 = arith.constant 0 : index
    %c0_83 = arith.constant 0 : index
    %c0_84 = arith.constant 0 : index
    %114 = vector.load %arg6[%c0_81, %c0_82, %c0_83, %c0_84] : memref<1x8x16x32xbf16, #tpu.memory_space<vmem>>, vector<1x8x16x32xbf16>
    %115 = vector.shape_cast %114 : vector<1x8x16x32xbf16> to vector<8x16x32xbf16>
    %116 = vector.shape_cast %113 : vector<8x16x32xbf16> to vector<1x8x16x32xbf16>
    tpu.vector_store %arg6[%c0_81, %c0_82, %c0_83, %c0_84], %116 {strides = array<i32>} : memref<1x8x16x32xbf16, #tpu.memory_space<vmem>>, vector<1x8x16x32xbf16>,
    return
  }
  func.func @transform_0(%arg0: i32, %arg1: i32) -> (i32, i32, i32, i32) {
    %c0_i32 = arith.constant 0 : i32
    %c0_i32_0 = arith.constant 0 : i32
    %c0_i32_1 = arith.constant 0 : i32
    %c0_i32_2 = arith.constant 0 : i32
    return %arg0, %c0_i32, %c0_i32_0, %c0_i32_1 : i32, i32, i32, i32
  }
  func.func @transform_1(%arg0: i32, %arg1: i32) -> (i32, i32, i32, i32) {
    %c0_i32 = arith.constant 0 : i32
    %c0_i32_0 = arith.constant 0 : i32
    %c0_i32_1 = arith.constant 0 : i32
    %c0_i32_2 = arith.constant 0 : i32
    %c0_i32_3 = arith.constant 0 : i32
    return %c0_i32, %c0_i32_0, %c0_i32_1, %c0_i32_2 : i32, i32, i32, i32
  }
  func.func @transform_2(%arg0: i32, %arg1: i32) -> (i32, i32) {
    %c0_i32 = arith.constant 0 : i32
    %c0_i32_0 = arith.constant 0 : i32
    %c0_i32_1 = arith.constant 0 : i32
    return %c0_i32, %c0_i32_0 : i32, i32
  }
  func.func @transform_3(%arg0: i32, %arg1: i32) -> (i32, i32) {
    %c0_i32 = arith.constant 0 : i32
    %c0_i32_0 = arith.constant 0 : i32
    %c0_i32_1 = arith.constant 0 : i32
    return %c0_i32, %c0_i32_0 : i32, i32
  }
  func.func @transform_4(%arg0: i32, %arg1: i32) -> (i32, i32, i32, i32) {
    %c0_i32 = arith.constant 0 : i32
    %c0_i32_0 = arith.constant 0 : i32
    %c0_i32_1 = arith.constant 0 : i32
    return %arg0, %arg1, %c0_i32, %c0_i32_0 : i32, i32, i32, i32
  }
}

module attributes {stable_mosaic.version = 11 : i64} {
  func.func @_eca_add_relu_kernel(%arg0: i32, %arg1: memref<1x16x16x128xf32, #tpu.memory_space<vmem>>, %arg2: memref<1x16x16x128xf32, #tpu.memory_space<vmem>>, %arg3: memref<3xf32, #tpu.memory_space<smem>>, %arg4: memref<1x16x16x128xf32, #tpu.memory_space<vmem>>) attributes {dimension_semantics = [#tpu.dimension_semantics<parallel>], iteration_bounds = array<i64: 2>, scalar_prefetch = 0 : i64, scratch_operands = 0 : i64, tpu.core_type = #tpu.core_type<tc>, window_params = [{transform_indices = @transform_0, window_bounds = array<i64: 1, 16, 16, 128>}, {transform_indices = @transform_1, window_bounds = array<i64: 1, 16, 16, 128>}, {transform_indices = @transform_2, window_bounds = array<i64: 3>}, {transform_indices = @transform_3, window_bounds = array<i64: 1, 16, 16, 128>}]} {
    %c0 = arith.constant 0 : index
    %c0_0 = arith.constant 0 : index
    %c0_1 = arith.constant 0 : index
    %c0_2 = arith.constant 0 : index
    %0 = vector.load %arg1[%c0, %c0_0, %c0_1, %c0_2] : memref<1x16x16x128xf32, #tpu.memory_space<vmem>>, vector<1x16x16x128xf32>
    %1 = vector.shape_cast %0 : vector<1x16x16x128xf32> to vector<16x16x128xf32>
    %cst = arith.constant dense<0.000000e+00> : vector<16x128xf32>
    %2 = vector.multi_reduction <add>, %1, %cst [0] : vector<16x16x128xf32> to vector<16x128xf32>
    %cst_3 = arith.constant 1.600000e+01 : f32
    %3 = vector.broadcast %cst_3 : f32 to vector<16x128xf32>
    %4 = arith.divf %2, %3 : vector<16x128xf32>
    %cst_4 = arith.constant dense<0.000000e+00> : vector<128xf32>
    %5 = vector.multi_reduction <add>, %4, %cst_4 [0] : vector<16x128xf32> to vector<128xf32>
    %6 = vector.shape_cast %5 : vector<128xf32> to vector<1x128xf32>
    %cst_5 = arith.constant 1.600000e+01 : f32
    %7 = vector.broadcast %cst_5 : f32 to vector<1x128xf32>
    %8 = arith.divf %6, %7 : vector<1x128xf32>
    %cst_6 = arith.constant 0.000000e+00 : f32
    %9 = vector.broadcast %cst_6 : f32 to vector<1x1xf32>
    %10 = tpu.concatenate %9, %8, %9 in 1 : vector<1x1xf32>, vector<1x128xf32>, vector<1x1xf32> -> vector<1x130xf32>
    %11 = vector.extract_strided_slice %10 {offsets = [0, 0], sizes = [1, 128], strides = [1, 1]} : vector<1x130xf32> to vector<1x128xf32>
    %12 = vector.extract_strided_slice %10 {offsets = [0, 2], sizes = [1, 128], strides = [1, 1]} : vector<1x130xf32> to vector<1x128xf32>
    %c0_7 = arith.constant 0 : index
    %13 = memref.load %arg3[%c0_7] : memref<3xf32, #tpu.memory_space<smem>>
    %14 = vector.broadcast %13 : f32 to vector<1x128xf32>
    %15 = arith.mulf %14, %11 : vector<1x128xf32>
    %c1 = arith.constant 1 : index
    %16 = memref.load %arg3[%c1] : memref<3xf32, #tpu.memory_space<smem>>
    %17 = vector.broadcast %16 : f32 to vector<1x128xf32>
    %18 = arith.mulf %17, %8 : vector<1x128xf32>
    %19 = arith.addf %15, %18 : vector<1x128xf32>
    %c2 = arith.constant 2 : index
    %20 = memref.load %arg3[%c2] : memref<3xf32, #tpu.memory_space<smem>>
    %21 = vector.broadcast %20 : f32 to vector<1x128xf32>
    %22 = arith.mulf %21, %12 : vector<1x128xf32>
    %23 = arith.addf %19, %22 : vector<1x128xf32>
    %cst_8 = arith.constant 0.000000e+00 : f32
    %24 = vector.broadcast %cst_8 : f32 to vector<1x128xf32>
    %25 = arith.subf %24, %23 : vector<1x128xf32>
    %26 = math.exp %25 : vector<1x128xf32>
    %cst_9 = arith.constant 1.000000e+00 : f32
    %27 = vector.broadcast %cst_9 : f32 to vector<1x128xf32>
    %28 = arith.addf %27, %26 : vector<1x128xf32>
    %cst_10 = arith.constant 1.000000e+00 : f32
    %29 = vector.broadcast %cst_10 : f32 to vector<1x128xf32>
    %30 = arith.divf %29, %28 : vector<1x128xf32>
    %31 = vector.shape_cast %30 : vector<1x128xf32> to vector<1x1x128xf32>
    %32 = vector.broadcast %31 : vector<1x1x128xf32> to vector<16x16x128xf32>
    %33 = arith.mulf %1, %32 : vector<16x16x128xf32>
    %c0_11 = arith.constant 0 : index
    %c0_12 = arith.constant 0 : index
    %c0_13 = arith.constant 0 : index
    %c0_14 = arith.constant 0 : index
    %34 = vector.load %arg2[%c0_11, %c0_12, %c0_13, %c0_14] : memref<1x16x16x128xf32, #tpu.memory_space<vmem>>, vector<1x16x16x128xf32>
    %35 = vector.shape_cast %34 : vector<1x16x16x128xf32> to vector<16x16x128xf32>
    %36 = arith.addf %33, %35 : vector<16x16x128xf32>
    %cst_15 = arith.constant 0.000000e+00 : f32
    %37 = vector.broadcast %cst_15 : f32 to vector<16x16x128xf32>
    %38 = arith.maximumf %36, %37 : vector<16x16x128xf32>
    %c0_16 = arith.constant 0 : index
    %c0_17 = arith.constant 0 : index
    %c0_18 = arith.constant 0 : index
    %c0_19 = arith.constant 0 : index
    %39 = vector.load %arg4[%c0_16, %c0_17, %c0_18, %c0_19] : memref<1x16x16x128xf32, #tpu.memory_space<vmem>>, vector<1x16x16x128xf32>
    %40 = vector.shape_cast %39 : vector<1x16x16x128xf32> to vector<16x16x128xf32>
    %41 = vector.shape_cast %38 : vector<16x16x128xf32> to vector<1x16x16x128xf32>
    tpu.vector_store %arg4[%c0_16, %c0_17, %c0_18, %c0_19], %41 {strides = array<i32>} : memref<1x16x16x128xf32, #tpu.memory_space<vmem>>, vector<1x16x16x128xf32>,
    return
  }
  func.func @transform_0(%arg0: i32) -> (i32, i32, i32, i32) {
    %c0_i32 = arith.constant 0 : i32
    %c0_i32_0 = arith.constant 0 : i32
    %c0_i32_1 = arith.constant 0 : i32
    %c0_i32_2 = arith.constant 0 : i32
    return %arg0, %c0_i32, %c0_i32_0, %c0_i32_1 : i32, i32, i32, i32
  }
  func.func @transform_1(%arg0: i32) -> (i32, i32, i32, i32) {
    %c0_i32 = arith.constant 0 : i32
    %c0_i32_0 = arith.constant 0 : i32
    %c0_i32_1 = arith.constant 0 : i32
    %c0_i32_2 = arith.constant 0 : i32
    return %arg0, %c0_i32, %c0_i32_0, %c0_i32_1 : i32, i32, i32, i32
  }
  func.func @transform_2(%arg0: i32) -> i32 {
    %c0_i32 = arith.constant 0 : i32
    %c0_i32_0 = arith.constant 0 : i32
    return %c0_i32 : i32
  }
  func.func @transform_3(%arg0: i32) -> (i32, i32, i32, i32) {
    %c0_i32 = arith.constant 0 : i32
    %c0_i32_0 = arith.constant 0 : i32
    %c0_i32_1 = arith.constant 0 : i32
    %c0_i32_2 = arith.constant 0 : i32
    return %arg0, %c0_i32, %c0_i32_0, %c0_i32_1 : i32, i32, i32, i32
  }
}

</mosaic_0001>

<bundles_post_ra>
// kernel: bottleneck_forward.7
= control target key start
LH: loop header
LB: loop body
LE: loop exit
PB: predicated region body
PF: predicated region fallthrough
CT: control target
= control target key end

     0   :  { %8 = vsyncpa [#allocation4], 0  ;;  %s1144_s0 = inlined_call_operand.vmem [shape: f32[2,16,16,128], index: 0, kind: input, shape index: {}]   ;;  %s1145_s1 = inlined_call_operand.vmem [shape: f32[2,16,16,128], index: 1, kind: input, shape index: {}]   ;;  %s1146_s2 = inlined_call_operand.vmem [shape: f32[3], index: 2, kind: input, shape index: {}]   ;;  %s1147_s3 = inlined_call_operand.hbm [shape: f32[2,16,16,128], index: 3, kind: output, shape index: {}]  }
   0x1   :  { %9 = vsyncpa [#allocation3], 0 }
   0x2   :  { %11 = vsyncpa [#allocation3 + $0x1], 0  ;;  %s783_s12 = smov 0   ;;  %s785_s13 = smov 0  }
   0x3   :  { %s787_s14 = smov 0   ;;  %s789_s15 = smov 0  }
   0x4 LB: > { %s804_s16 = sadd.s32 4294967295, %s755_s15   ;;  %s592_s17 = sadd.s32 4294967294, %s755_s15   ;;  %s755_s15 = sphi %s789_s15, %s1153_s15   ;;  %s751_s14 = sphi %s787_s14, %s1152_s14   ;;  %s747_s13 = sphi %s785_s13, %s1151_s13   ;;  %s743_s12 = sphi %s783_s12, %s1150_s12  }
   0x5   : > { %s808_s18 = sadd.s32 1, %s755_s15   ;;  %s97_s19 = sadd.s32 1, %s751_s14 }
   0x6   : > { %s94_s20 = ssub.s32 %s755_s15, %s808_s18  ;;  %p107_p0 = scmp.ne.s32.totalorder %s751_s14, %s747_s13 }
   0x7   : > { %p95_p1 = scmp.eq.s32.totalorder %s94_s20, 0  ;;  %p108_p2 = scmp.eq.s32.totalorder %s804_s16, 1 }
   0x8   : > { %p113_p3 = scmp.ne.s32.totalorder %s747_s13, %s743_s12  ;;  %p114_p4 = scmp.eq.s32.totalorder %s592_s17, 1 }
   0x9   : > { %s819_s21 = scalar_select %p95_p1, %s751_s14, %s97_s19  }
   0xa   : > { %p821_p5 = por %p108_p2, %p107_p0  ;;  %p825_p6 = por %p114_p4, %p113_p3 }
   0xb   : > { %p593_p7 = scmp.ge.s32.totalorder %s755_s15, 1  ;;  %p121_p8 = scmp.lt.s32.totalorder %s755_s15, 3 }
   0xc   : > { %p627_p9 = scmp.eq.s32.totalorder %s804_s16, 0  ;;  %s133_s26 = sshll.u32 %s1146_s2, 4  ;;  %s134_s26 = int_to_ptr.vmem [resolvable:$true] %s133_s26 }
   0xd   : > { %p122_p10 = pnand %p593_p7, %p121_p8  ;;  %s757_s27 = smov [#allocation2]  }
   0xf   : > { %p619_p11 = pneg %p122_p10  ;;  %162 = sbr.rel (%p122_p10) target bundleno = 400 (0x190), region = 32 }
  0x11   : > { %p620_p12 = pnand %p627_p9, %p619_p11 }
  0x13   : > { %622 = dma.vmem_to_smem (!%p620_p12), %s134_s26, 16, %s757_s27, [#allocation4]  }
  0x14   : > { %734 = dma.done.wait (%p627_p9), [#allocation4], 16  }
  0x15   : > { %736 = vsyncadd (%p627_p9), [#allocation4], 4294967280 }
  0x16   : > { %169 = sfence }
  0x17   : > { %p193_p13 = scmp.lt.s32.totalorder %s804_s16, 1  ;;  %v758_v11 = vmov 16.0   ;;  %s759_s6 = smov 1   ;;  %vm286_vm1 = vcmask 7168   ;;  %vm306_vm2 = vcmask 1031168  }
  0x18   : > { %668 = vrcp.f32 %v758_v11  ;;  %s603_s7 = sld [smem:[#allocation2 + $0x1]]  ;;  %s760_s10 = smov 126  }
  0x19   : > { %s837_s28 = scalar_select %p193_p13, %s804_s16, 1 }
  0x1a   : > { %s289_s8 = sld [smem:[#allocation2]]  ;;  %s190_s20 = sand.u32 1, %s747_s13  }
  0x1b   : > { %s610_s29 = sshll.u32 %s837_s28, 8  ;;  %s604_s9 = sld [smem:[#allocation2 + $0x2]] }
  0x1c   : > { %s845_s5 = scalar_lea.vmem %s1144_s0, %s610_s29  ;;  %s980_s19 = scalar_lea.vmem %s1145_s1, %s610_s29 }
  0x1d   : > { %v848_v0 = vld [vmem:[%s845_s5] sm:$0xff]  ;;  %v851_v1 = vld [vmem:[%s845_s5 + $0x8] sm:$0xff]  ;;  %v854_v2 = vld [vmem:[%s845_s5 + $0x10] sm:$0xff]  ;;  %s598_s24 = sshll.u32 %s190_s20, 8  ;;  %s612_s26 = sshll.u32 %s804_s16, 8 }
  0x1e   : > { %v857_v3 = vld [vmem:[%s845_s5 + $0x18] sm:$0xff]  ;;  %v860_v4 = vld [vmem:[%s845_s5 + $0x20] sm:$0xff]  ;;  %v863_v5 = vld [vmem:[%s845_s5 + $0x28] sm:$0xff]  ;;  %v235_v6 = vadd.f32 %v854_v2, %v848_v0  ;;  %v669_v22 = vpop.eup %668  ;;  %s1067_s25 = scalar_lea.vmem [#allocation5], %s598_s24  ;;  %s502_s29 = scalar_lea.hbm %s1147_s3, %s612_s26 }
  0x1f   : > { %v868_v7 = vld [vmem:[%s845_s5 + $0x30] sm:$0xff]  ;;  %v250_v8 = vadd.f32 %v857_v3, %v851_v1  ;;  %v873_v9 = vld [vmem:[%s845_s5 + $0x38] sm:$0xff]  ;;  %v877_v12 = vld [vmem:[%s845_s5 + $0x40] sm:$0xff]  ;;  %v266_v31 = vmul.f32 16.0, %v669_v22  ;;  %vm270_vm0 = vweird.f32 %v669_v22  ;;  %s503_s16 = sshll.u32 %s1067_s25, 4  ;;  %s505_s30 = sshll.u32 %s502_s29, 4  ;;  %s504_s16 = int_to_ptr.vmem [resolvable:$true] %s503_s16  ;;  %s506_s30 = int_to_ptr.hbm [resolvable:$true] %s505_s30 }
  0x20   : > { %v236_v10 = vadd.f32 %v235_v6, %v860_v4  ;;  %v881_v14 = vld [vmem:[%s845_s5 + $0x48] sm:$0xff]  ;;  %v885_v16 = vld [vmem:[%s845_s5 + $0x50] sm:$0xff]  ;;  %v889_v18 = vld [vmem:[%s845_s5 + $0x58] sm:$0xff]  ;;  %s491_s4 = scalar_lea.sflag [#allocation3], %s190_s20 }
  0x21   : > { %v251_v13 = vadd.f32 %v250_v8, %v863_v5  ;;  %v893_v20 = vld [vmem:[%s845_s5 + $0x60] sm:$0xff]  ;;  %v897_v23 = vld [vmem:[%s845_s5 + $0x68] sm:$0xff]  ;;  %v901_v25 = vld [vmem:[%s845_s5 + $0x70] sm:$0xff]  ;;  %v267_v40 = vsub.f32 1.0, %v266_v31 }
  0x22   : > { %v237_v15 = vadd.f32 %v236_v10, %v868_v7  ;;  %v905_v27 = vld [vmem:[%s845_s5 + $0x78] sm:$0xff]  ;;  %v909_v29 = vld [vmem:[%s845_s5 + $0x80] sm:$0xff]  ;;  %v913_v32 = vld [vmem:[%s845_s5 + $0x88] sm:$0xff] }
  0x23   : > { %v252_v17 = vadd.f32 %v251_v13, %v873_v9  ;;  %v917_v34 = vld [vmem:[%s845_s5 + $0x90] sm:$0xff]  ;;  %v921_v36 = vld [vmem:[%s845_s5 + $0x98] sm:$0xff]  ;;  %v925_v38 = vld [vmem:[%s845_s5 + $0xa0] sm:$0xff]  ;;  %v268_v49 = vmul.f32 %v669_v22, %v267_v40 }
  0x24   : > { %v238_v19 = vadd.f32 %v237_v15, %v877_v12  ;;  %v929_v41 = vld [vmem:[%s845_s5 + $0xa8] sm:$0xff]  ;;  %v933_v43 = vld [vmem:[%s845_s5 + $0xb0] sm:$0xff]  ;;  %v937_v45 = vld [vmem:[%s845_s5 + $0xb8] sm:$0xff] }
  0x25   : > { %v253_v21 = vadd.f32 %v252_v17, %v881_v14  ;;  %v941_v47 = vld [vmem:[%s845_s5 + $0xc0] sm:$0xff]  ;;  %v945_v50 = vld [vmem:[%s845_s5 + $0xc8] sm:$0xff]  ;;  %v949_v52 = vld [vmem:[%s845_s5 + $0xd0] sm:$0xff]  ;;  %v269_v58 = vadd.f32 %v669_v22, %v268_v49 }
  0x26   : > { %v239_v24 = vadd.f32 %v238_v19, %v885_v16  ;;  %v953_v54 = vld [vmem:[%s845_s5 + $0xd8] sm:$0xff]  ;;  %v957_v56 = vld [vmem:[%s845_s5 + $0xe0] sm:$0xff]  ;;  %v961_v59 = vld [vmem:[%s845_s5 + $0xe8] sm:$0xff] }
  0x27   : > { %v254_v26 = vadd.f32 %v253_v21, %v889_v18  ;;  %v965_v61 = vld [vmem:[%s845_s5 + $0xf0] sm:$0xff]  ;;  %v969_v63 = vld [vmem:[%s845_s5 + $0xf8] sm:$0xff]  ;;  %v271_v10 = vsel %vm270_vm0, %v669_v22, %v269_v58  ;;  %v293_v22 = vstv %s603_s7  ;;  %s703_s5 = sshra.s32 %s506_s30, 4  ;;  %s704_s5 = int_to_ptr.hbm [resolvable:$true] %s703_s5 }
  0x28   : > { %v240_v28 = vadd.f32 %v239_v24, %v893_v20  ;;  %p710_p3 = scmp.lt.s32.totalorder %s704_s5, %s1147_s3 }
  0x29   : > { %v255_v30 = vadd.f32 %v254_v26, %v897_v23 }
  0x2a   : > { %v241_v33 = vadd.f32 %v240_v28, %v901_v25 }
  0x2b   : > { %v256_v35 = vadd.f32 %v255_v30, %v905_v27 }
  0x2c   : > { %v242_v37 = vadd.f32 %v241_v33, %v909_v29 }
  0x2d   : > { %v257_v39 = vadd.f32 %v256_v35, %v913_v32  ;;  %v290_v35 = vstv %s289_s8 }
  0x2e   : > { %v243_v42 = vadd.f32 %v242_v37, %v917_v34  ;;  %v297_v37 = vstv %s604_s9  ;;  %s709_s9 = scalar_lea.hbm %s1147_s3, 512 }
  0x2f   : > { %v258_v44 = vadd.f32 %v257_v39, %v921_v36 }
  0x30   : > { %v244_v46 = vadd.f32 %v243_v42, %v925_v38 }
  0x31   : > { %v259_v48 = vadd.f32 %v258_v44, %v929_v41 }
  0x32   : > { %v245_v51 = vadd.f32 %v244_v46, %v933_v43 }
  0x33   : > { %v260_v53 = vadd.f32 %v259_v48, %v937_v45 }
  0x34   : > { %v246_v55 = vadd.f32 %v245_v51, %v941_v47 }
  0x35   : > { %v261_v57 = vadd.f32 %v260_v53, %v945_v50 }
  0x36   : > { %v247_v60 = vadd.f32 %v246_v55, %v949_v52 }
  0x37   : > { %v262_v62 = vadd.f32 %v261_v57, %v953_v54 }
  0x38   : > { %v248_v6 = vadd.f32 %v247_v60, %v957_v56 }
  0x39   : > { %v263_v8 = vadd.f32 %v262_v62, %v961_v59 }
  0x3a   : > { %v249_v11 = vadd.f32 %v248_v6, %v965_v61 }
  0x3b   : > { %v264_v13 = vadd.f32 %v263_v8, %v969_v63 }
  0x3c   : > { %v272_v15 = vmul.f32 %v271_v10, %v249_v11 }
  0x3d   : > { %v273_v17 = vmul.f32 %v271_v10, %v264_v13 }
  0x3f   : > { %v274_v19 = vadd.f32 %v273_v17, %v272_v15 }
  0x41   : > { %v275_v21 = vrot.slane %v274_v19, 4 }
  0x43   : > { %v276_v24 = vadd.f32 %v275_v21, %v274_v19 }
  0x45   : > { %v277_v26 = vrot.slane %v276_v24, 2 }
  0x47   : > { %v278_v28 = vadd.f32 %v277_v26, %v276_v24 }
  0x49   : > { %v279_v30 = vrot.slane %v278_v28, 1 }
  0x4b   : > { %v280_v31 = vadd.f32 %v279_v30, %v278_v28 }
  0x4d   : > { %v281_v33 = vmul.f32 %v280_v31, %v271_v10 }
  0x4f   : > { %283 = vrot.lane.b32.xlu0 %v281_v33, %s759_s6  ;;  %v294_v39 = vmul.f32 %v293_v22, %v281_v33  ;;  %s705_s6 = scalar_lea.hbm %s704_s5, 256 }
  0x50   : > { %p706_p0 = scmp.ne.s32.totalorder %s704_s5, %s705_s6  ;;  %p711_p4 = scmp.lt.s32.totalorder %s709_s9, %s705_s6 }
  0x52   : > { %p707_p1 = pnand %p706_p0, %p821_p5  ;;  %p712_p7 = por %p711_p4, %p710_p3 }
  0x54   : > { %p708_p2 = pneg %p707_p1 }
  0x56   : > { %p713_p8 = pnand %p712_p7, %p708_p2 }
  0xc1   : > { %v284_v40 = vpop.permute.xlu0 %283 }
  0xc2   : > { %v287_v42 = vsel %vm286_vm1, 0.0, %v284_v40  ;;  %v288_v44 = vsel %vm286_vm1, %v284_v40, 0.0 }
  0xc3   : > { %v291_v46 = vmul.f32 %v290_v35, %v287_v42  ;;  %v299_v48 = vmul.f32 %v297_v37, %v288_v44  ;;  %v298_v49 = vmul.f32 %v297_v37, %v287_v42  ;;  %v362_v44 = vld [vmem:[%s980_s19] sm:$0xff] }
  0xc5   : > { %304 = vrot.lane.b32.xlu1 %v299_v48, %s760_s10  ;;  %302 = vrot.lane.b32.xlu0 %v298_v49, %s760_s10  ;;  %v295_v51 = vadd.f32 %v294_v39, %v291_v46  ;;  %v365_v46 = vld [vmem:[%s980_s19 + $0x18] sm:$0xff] }
  0xc6   : > { %v369_v49 = vld [vmem:[%s980_s19 + $0x38] sm:$0xff] }
 0x137   : > { %v305_v53 = vpop.permute.xlu1 %304  ;;  %v303_v55 = vpop.permute.xlu0 %302 }
 0x138   : > { %v307_v57 = vsel %vm306_vm2, %v303_v55, %v305_v53 }
 0x139   : > { %v309_v58 = vadd.f32 %v307_v57, %v295_v51 }
 0x13b   : > { %v310_v60 = vsub.f32 0.0, %v309_v58 }
 0x13d   : > { %v311_v62 = vmul.f32 1.442695, %v310_v60 }
 0x13f   : > { %670 = vpow2.f32 %v311_v62  ;;  %v375_v62 = vld [vmem:[%s980_s19 + $0x68] sm:$0xff] }
 0x145   : > { %v671_v6 = vpop.eup %670 }
 0x146   : > { %v313_v8 = vadd.f32 1.0, %v671_v6 }
 0x148   : > { %672 = vrcp.f32 %v313_v8  ;;  %v325_v15 = vand.u32 2147483648, %v313_v8  ;;  %v323_v19 = vand.u32 2147483647, %v313_v8  ;;  %vm319_vm4 = vweird.f32 %v313_v8 }
 0x14a   : > { %v326_v24 = vor.u32 1.1754944e-38, %v325_v15  ;;  %vm324_vm6 = vcmp.eq.f32.partialorder %v323_v19, 8.507059e+37 }
 0x14e   : > { %v673_v10 = vpop.eup %672 }
 0x14f   : > { %v315_v11 = vmul.f32 %v673_v10, %v313_v8  ;;  %vm320_vm3 = vweird.f32 %v673_v10 }
 0x150   : > { %vm321_vm5 = vmor %vm319_vm4, %vm320_vm3 }
 0x151   : > { %v316_v13 = vsub.f32 1.0, %v315_v11 }
 0x153   : > { %v317_v17 = vmul.f32 %v673_v10, %v316_v13 }
 0x155   : > { %v318_v21 = vadd.f32 %v673_v10, %v317_v17 }
 0x157   : > { %v322_v26 = vsel %vm321_vm5, %v673_v10, %v318_v21 }
 0x158   : > { %v327_v28 = vsel %vm324_vm6, %v326_v24, %v322_v26  ;;  %v382_v24 = vld [vmem:[%s980_s19 + $0xa0] sm:$0xff] }
 0x159   : > { %v329_v30 = vperm.slane %v327_v28, 0 }
 0x15b   : > { %v330_v31 = vmul.f32 %v329_v30, %v848_v0  ;;  %v331_v33 = vmul.f32 %v329_v30, %v851_v1  ;;  %v332_v22 = vmul.f32 %v329_v30, %v854_v2  ;;  %v333_v35 = vmul.f32 %v329_v30, %v857_v3 }
 0x15c   : > { %v334_v37 = vmul.f32 %v329_v30, %v860_v4  ;;  %v335_v39 = vmul.f32 %v329_v30, %v863_v5  ;;  %v336_v40 = vmul.f32 %v329_v30, %v868_v7  ;;  %v337_v42 = vmul.f32 %v329_v30, %v873_v9  ;;  %v363_v4 = vld [vmem:[%s980_s19 + $0x8] sm:$0xff]  ;;  %v364_v5 = vld [vmem:[%s980_s19 + $0x10] sm:$0xff] }
 0x15d   : > { %v338_v0 = vmul.f32 %v329_v30, %v877_v12  ;;  %v339_v1 = vmul.f32 %v329_v30, %v881_v14  ;;  %v340_v2 = vmul.f32 %v329_v30, %v885_v16  ;;  %v341_v3 = vmul.f32 %v329_v30, %v889_v18  ;;  %v366_v14 = vld [vmem:[%s980_s19 + $0x20] sm:$0xff]  ;;  %v367_v16 = vld [vmem:[%s980_s19 + $0x28] sm:$0xff]  ;;  %v368_v18 = vld [vmem:[%s980_s19 + $0x30] sm:$0xff] }
 0x15e   : > { %v342_v7 = vmul.f32 %v329_v30, %v893_v20  ;;  %v343_v9 = vmul.f32 %v329_v30, %v897_v23  ;;  %v344_v48 = vmul.f32 %v329_v30, %v901_v25  ;;  %v345_v12 = vmul.f32 %v329_v30, %v905_v27  ;;  %v370_v23 = vld [vmem:[%s980_s19 + $0x40] sm:$0xff]  ;;  %v371_v25 = vld [vmem:[%s980_s19 + $0x48] sm:$0xff]  ;;  %v372_v27 = vld [vmem:[%s980_s19 + $0x50] sm:$0xff] }
 0x15f   : > { %v346_v51 = vmul.f32 %v329_v30, %v909_v29  ;;  %v347_v53 = vmul.f32 %v329_v30, %v913_v32  ;;  %v348_v55 = vmul.f32 %v329_v30, %v917_v34  ;;  %v349_v20 = vmul.f32 %v329_v30, %v921_v36  ;;  %v373_v32 = vld [vmem:[%s980_s19 + $0x58] sm:$0xff]  ;;  %v374_v34 = vld [vmem:[%s980_s19 + $0x60] sm:$0xff] }
 0x160   : > { %v350_v57 = vmul.f32 %v329_v30, %v925_v38  ;;  %v351_v58 = vmul.f32 %v329_v30, %v929_v41  ;;  %v352_v60 = vmul.f32 %v329_v30, %v933_v43  ;;  %v353_v29 = vmul.f32 %v329_v30, %v937_v45  ;;  %v376_v41 = vld [vmem:[%s980_s19 + $0x70] sm:$0xff]  ;;  %v377_v43 = vld [vmem:[%s980_s19 + $0x78] sm:$0xff]  ;;  %v378_v45 = vld [vmem:[%s980_s19 + $0x80] sm:$0xff] }
 0x161   : > { %v354_v36 = vmul.f32 %v329_v30, %v941_v47  ;;  %v355_v6 = vmul.f32 %v329_v30, %v945_v50  ;;  %v356_v8 = vmul.f32 %v329_v30, %v949_v52  ;;  %v357_v38 = vmul.f32 %v329_v30, %v953_v54  ;;  %v379_v50 = vld [vmem:[%s980_s19 + $0x88] sm:$0xff]  ;;  %v380_v52 = vld [vmem:[%s980_s19 + $0x90] sm:$0xff]  ;;  %v381_v54 = vld [vmem:[%s980_s19 + $0x98] sm:$0xff] }
 0x162   : > { %v358_v10 = vmul.f32 %v329_v30, %v957_v56  ;;  %v359_v11 = vmul.f32 %v329_v30, %v961_v59  ;;  %v360_v13 = vmul.f32 %v329_v30, %v965_v61  ;;  %v361_v47 = vmul.f32 %v329_v30, %v969_v63  ;;  %v383_v56 = vld [vmem:[%s980_s19 + $0xa8] sm:$0xff]  ;;  %v384_v59 = vld [vmem:[%s980_s19 + $0xb0] sm:$0xff]  ;;  %v385_v30 = vld [vmem:[%s980_s19 + $0xb8] sm:$0xff] }
 0x163   : > { %v394_v15 = vadd.f32 %v362_v44, %v330_v31  ;;  %v395_v17 = vadd.f32 %v363_v4, %v331_v33  ;;  %v396_v19 = vadd.f32 %v364_v5, %v332_v22  ;;  %v397_v21 = vadd.f32 %v365_v46, %v333_v35  ;;  %v386_v31 = vld [vmem:[%s980_s19 + $0xc0] sm:$0xff]  ;;  %v387_v33 = vld [vmem:[%s980_s19 + $0xc8] sm:$0xff]  ;;  %v388_v5 = vld [vmem:[%s980_s19 + $0xd0] sm:$0xff] }
 0x164   : > { %v398_v61 = vadd.f32 %v366_v14, %v334_v37  ;;  %v399_v26 = vadd.f32 %v367_v16, %v335_v39  ;;  %v400_v63 = vadd.f32 %v368_v18, %v336_v40  ;;  %v401_v28 = vadd.f32 %v369_v49, %v337_v42  ;;  %v389_v46 = vld [vmem:[%s980_s19 + $0xd8] sm:$0xff]  ;;  %v390_v14 = vld [vmem:[%s980_s19 + $0xe0] sm:$0xff]  ;;  %v391_v40 = vld [vmem:[%s980_s19 + $0xe8] sm:$0xff] }
 0x165   : > { %v402_v22 = vadd.f32 %v370_v23, %v338_v0  ;;  %v403_v35 = vadd.f32 %v371_v25, %v339_v1  ;;  %v404_v44 = vadd.f32 %v372_v27, %v340_v2  ;;  %v405_v4 = vadd.f32 %v373_v32, %v341_v3  ;;  %v392_v42 = vld [vmem:[%s980_s19 + $0xf0] sm:$0xff]  ;;  %v393_v49 = vld [vmem:[%s980_s19 + $0xf8] sm:$0xff] }
 0x166   : > { %v406_v37 = vadd.f32 %v374_v34, %v342_v7  ;;  %v407_v16 = vadd.f32 %v375_v62, %v343_v9  ;;  %v408_v39 = vadd.f32 %v376_v41, %v344_v48  ;;  %v409_v18 = vadd.f32 %v377_v43, %v345_v12 }
 0x167   : > { %v410_v0 = vadd.f32 %v378_v45, %v346_v51  ;;  %v411_v23 = vadd.f32 %v379_v50, %v347_v53  ;;  %v412_v1 = vadd.f32 %v380_v52, %v348_v55  ;;  %v413_v25 = vadd.f32 %v381_v54, %v349_v20 }
 0x168   : > { %v414_v2 = vadd.f32 %v382_v24, %v350_v57  ;;  %v415_v27 = vadd.f32 %v383_v56, %v351_v58  ;;  %v416_v3 = vadd.f32 %v384_v59, %v352_v60  ;;  %v1049_v32 = vadd.f32 %v385_v30, %v353_v29 }
 0x169   : > { %v1051_v7 = vadd.f32 %v386_v31, %v354_v36  ;;  %v1053_v34 = vadd.f32 %v387_v33, %v355_v6  ;;  %v1055_v9 = vadd.f32 %v388_v5, %v356_v8  ;;  %v1057_v48 = vadd.f32 %v389_v46, %v357_v38 }
 0x16a   : > { %v1059_v12 = vadd.f32 %v390_v14, %v358_v10  ;;  %v1061_v62 = vadd.f32 %v391_v40, %v359_v11  ;;  %v1063_v51 = vadd.f32 %v392_v42, %v360_v13  ;;  %v1065_v53 = vadd.f32 %v393_v49, %v361_v47 }
 0x16b   : > { %v426_v55 = vmax.f32 %v394_v15, 0.0  ;;  %v427_v20 = vmax.f32 %v395_v17, 0.0  ;;  %v428_v57 = vmax.f32 %v396_v19, 0.0  ;;  %v429_v58 = vmax.f32 %v397_v21, 0.0 }
 0x16c   : > { %v430_v60 = vmax.f32 %v398_v61, 0.0  ;;  %v431_v29 = vmax.f32 %v399_v26, 0.0  ;;  %v432_v36 = vmax.f32 %v400_v63, 0.0  ;;  %v433_v6 = vmax.f32 %v401_v28, 0.0 }
 0x16d   : > { %458 = vst [vmem:[%s1067_s25] sm:$0xff] %v426_v55  ;;  %v434_v8 = vmax.f32 %v402_v22, 0.0  ;;  %v435_v38 = vmax.f32 %v403_v35, 0.0  ;;  %v436_v41 = vmax.f32 %v404_v44, 0.0  ;;  %v437_v43 = vmax.f32 %v405_v4, 0.0 }
 0x16e   : > { %459 = vst [vmem:[%s1067_s25 + $0x8] sm:$0xff] %v427_v20  ;;  %v438_v45 = vmax.f32 %v406_v37, 0.0  ;;  %v439_v10 = vmax.f32 %v407_v16, 0.0  ;;  %v440_v11 = vmax.f32 %v408_v39, 0.0  ;;  %v441_v13 = vmax.f32 %v409_v18, 0.0 }
 0x16f   : > { %460 = vst [vmem:[%s1067_s25 + $0x10] sm:$0xff] %v428_v57  ;;  %v442_v47 = vmax.f32 %v410_v0, 0.0  ;;  %v443_v50 = vmax.f32 %v411_v23, 0.0  ;;  %v444_v52 = vmax.f32 %v412_v1, 0.0  ;;  %v445_v54 = vmax.f32 %v413_v25, 0.0 }
 0x170   : > { %461 = vst [vmem:[%s1067_s25 + $0x18] sm:$0xff] %v429_v58  ;;  %v446_v15 = vmax.f32 %v414_v2, 0.0  ;;  %v447_v17 = vmax.f32 %v415_v27, 0.0  ;;  %v448_v19 = vmax.f32 %v416_v3, 0.0  ;;  %v449_v21 = vmax.f32 %v1049_v32, 0.0 }
 0x171   : > { %462 = vst [vmem:[%s1067_s25 + $0x20] sm:$0xff] %v430_v60  ;;  %v450_v24 = vmax.f32 %v1051_v7, 0.0  ;;  %v451_v56 = vmax.f32 %v1053_v34, 0.0  ;;  %v452_v59 = vmax.f32 %v1055_v9, 0.0  ;;  %v453_v61 = vmax.f32 %v1057_v48, 0.0 }
 0x172   : > { %463 = vst [vmem:[%s1067_s25 + $0x28] sm:$0xff] %v431_v29  ;;  %v454_v26 = vmax.f32 %v1059_v12, 0.0  ;;  %v455_v63 = vmax.f32 %v1061_v62, 0.0  ;;  %v456_v28 = vmax.f32 %v1063_v51, 0.0  ;;  %v457_v30 = vmax.f32 %v1065_v53, 0.0 }
 0x173   : > { %464 = vst [vmem:[%s1067_s25 + $0x30] sm:$0xff] %v432_v36 }
 0x174   : > { %465 = vst [vmem:[%s1067_s25 + $0x38] sm:$0xff] %v433_v6 }
 0x175   : > { %466 = vst [vmem:[%s1067_s25 + $0x40] sm:$0xff] %v434_v8 }
 0x176   : > { %467 = vst [vmem:[%s1067_s25 + $0x48] sm:$0xff] %v435_v38 }
 0x177   : > { %468 = vst [vmem:[%s1067_s25 + $0x50] sm:$0xff] %v436_v41 }
 0x178   : > { %469 = vst [vmem:[%s1067_s25 + $0x58] sm:$0xff] %v437_v43 }
 0x179   : > { %470 = vst [vmem:[%s1067_s25 + $0x60] sm:$0xff] %v438_v45 }
 0x17a   : > { %471 = vst [vmem:[%s1067_s25 + $0x68] sm:$0xff] %v439_v10 }
 0x17b   : > { %472 = vst [vmem:[%s1067_s25 + $0x70] sm:$0xff] %v440_v11 }
 0x17c   : > { %473 = vst [vmem:[%s1067_s25 + $0x78] sm:$0xff] %v441_v13 }
 0x17d   : > { %474 = vst [vmem:[%s1067_s25 + $0x80] sm:$0xff] %v442_v47 }
 0x17e   : > { %475 = vst [vmem:[%s1067_s25 + $0x88] sm:$0xff] %v443_v50 }
 0x17f   : > { %476 = vst [vmem:[%s1067_s25 + $0x90] sm:$0xff] %v444_v52 }
 0x180   : > { %477 = vst [vmem:[%s1067_s25 + $0x98] sm:$0xff] %v445_v54 }
 0x181   : > { %478 = vst [vmem:[%s1067_s25 + $0xa0] sm:$0xff] %v446_v15 }
 0x182   : > { %479 = vst [vmem:[%s1067_s25 + $0xa8] sm:$0xff] %v447_v17 }
 0x183   : > { %480 = vst [vmem:[%s1067_s25 + $0xb0] sm:$0xff] %v448_v19 }
 0x184   : > { %481 = vst [vmem:[%s1067_s25 + $0xb8] sm:$0xff] %v449_v21 }
 0x185   : > { %482 = vst [vmem:[%s1067_s25 + $0xc0] sm:$0xff] %v450_v24 }
 0x186   : > { %483 = vst [vmem:[%s1067_s25 + $0xc8] sm:$0xff] %v451_v56 }
 0x187   : > { %484 = vst [vmem:[%s1067_s25 + $0xd0] sm:$0xff] %v452_v59 }
 0x188   : > { %485 = vst [vmem:[%s1067_s25 + $0xd8] sm:$0xff] %v453_v61 }
 0x189   : > { %486 = vst [vmem:[%s1067_s25 + $0xe0] sm:$0xff] %v454_v26 }
 0x18a   : > { %487 = vst [vmem:[%s1067_s25 + $0xe8] sm:$0xff] %v455_v63 }
 0x18b   : > { %488 = vst [vmem:[%s1067_s25 + $0xf0] sm:$0xff] %v456_v28 }
 0x18c   : > { %489 = vst [vmem:[%s1067_s25 + $0xf8] sm:$0xff] %v457_v30 }
 0x18d   : > { %716 = shalt.err (!%p713_p8)
}
 0x18e   : > { %s761_s17 = smov 128   ;;  %s762_s19 = smov 8  }
 0x18f   : > { %617 = dma.vmem_to_hbm [thread:$0]  (%p821_p5), %s504_s16, 4096, %s506_s30, %s491_s4, %s761_s17, %s761_s17, %s762_s19  }
 0x190 PF: > { %p629_p9 = scmp.ge.s32.totalorder %s755_s15, 2  ;;  %s520_s20 = sand.u32 1, %s743_s12  }
 0x191   : > { %s521_s24 = scalar_lea.sflag [#allocation3], %s520_s20 }
 0x192   : > { %p624_p10 = pnand %p629_p9, %p825_p6 }
 0x194   : > { %p625_p11 = pneg %p624_p10 }
 0x196   : > { %738 = dma.done.wait (%p625_p11), %s521_s24, 4096  }
 0x197   : > { %740 = vsyncadd (%p625_p11), %s521_s24, 4294963200  ;;  %p14_p12 = scmp.ge.s32.totalorder %s808_s18, 4   ;;  %s1150_s12 = smov %s747_s13 }
 0x198   : > { %s1151_s13 = smov %s751_s14  ;;  %s1152_s14 = smov %s819_s21 }
 0x199   : > { %s1153_s15 = smov %s808_s18  ;;  %16 = sbr.rel (!%p14_p12) target bundleno = 4 (0x4), region = 75 }
 0x19e   :  { %527 = vsyncpa [#allocation3], 1 }
 0x19f   :  { %529 = vsyncpa [#allocation3 + $0x1], 1 }
 0x1a0   :  { %530 = vsyncpa [#allocation4], 1 }
 0x1a1   :  { %532 = vsyncpa [#allocation4 + $0x1], 1 }

// kernel: bottleneck_forward.6
= control target key start
LH: loop header
LB: loop body
LE: loop exit
PB: predicated region body
PF: predicated region fallthrough
CT: control target
= control target key end

     0   :  { %vm390_vm0 = vcmask 261120   ;;  %s1754_s1 = inlined_call_operand.vmem [shape: bf16[32,128], index: 1, kind: input, shape index: {}]   ;;  %s1755_s0 = inlined_call_operand.vmem [shape: bf16[512,32], index: 0, kind: input, shape index: {}]   ;;  %s1756_s2 = inlined_call_operand.vmem [shape: f32[1,128], index: 2, kind: input, shape index: {}]   ;;  %s1757_s3 = inlined_call_operand.vmem [shape: f32[1,128], index: 3, kind: input, shape index: {}]   ;;  %s1758_s4 = inlined_call_operand.vmem [shape: f32[512,128], index: 4, kind: output, shape index: {}]  }
   0x1   :  { %v1256_v0 = vld [vmem:[%s1754_s1 + $0x8] sm:$0xff]  ;;  %v1255_v1 = vld [vmem:[%s1754_s1] sm:$0xff]  ;;  %v1225_v10 = vld [vmem:[%s1755_s0 + $0x10] sm:$0xff] }
   0x2   :  { %493 = vmatpush.bf16.msra.mxu0 %v1256_v0  ;;  %1257 = vmatpush.bf16.msra.mxu1 %v1256_v0  ;;  %v1223_v2 = vld [vmem:[%s1755_s0] sm:$0xff]  ;;  %v1224_v6 = vld [vmem:[%s1755_s0 + $0x8] sm:$0xff]  ;;  %v1233_v11 = vld [vmem:[%s1755_s0 + $0x50] sm:$0xff] }
   0x3   :  { %1258 = vmatpush.bf16.msra.mxu2 %v1256_v0  ;;  %1259 = vmatpush.bf16.msra.mxu3 %v1256_v0  ;;  %v1231_v3 = vld [vmem:[%s1755_s0 + $0x40] sm:$0xff]  ;;  %v1232_v7 = vld [vmem:[%s1755_s0 + $0x48] sm:$0xff]  ;;  %v1241_v12 = vld [vmem:[%s1755_s0 + $0x90] sm:$0xff] }
   0x4   :  { %v1239_v4 = vld [vmem:[%s1755_s0 + $0x80] sm:$0xff]  ;;  %v1240_v8 = vld [vmem:[%s1755_s0 + $0x88] sm:$0xff]  ;;  %v1249_v13 = vld [vmem:[%s1755_s0 + $0xd0] sm:$0xff] }
   0x5   :  { %v1247_v5 = vld [vmem:[%s1755_s0 + $0xc0] sm:$0xff]  ;;  %v1248_v9 = vld [vmem:[%s1755_s0 + $0xc8] sm:$0xff]  ;;  %v1226_v14 = vld [vmem:[%s1755_s0 + $0x18] sm:$0xff] }
   0x6   :  { %494 = vmatpush.bf16.msra.mxu0 %v1255_v1  ;;  %1260 = vmatpush.bf16.msra.mxu1 %v1255_v1  ;;  %v1234_v15 = vld [vmem:[%s1755_s0 + $0x58] sm:$0xff]  ;;  %v1227_v18 = vld [vmem:[%s1755_s0 + $0x20] sm:$0xff]  ;;  %v1228_v22 = vld [vmem:[%s1755_s0 + $0x28] sm:$0xff] }
   0x7   :  { %1261 = vmatpush.bf16.msra.mxu2 %v1255_v1  ;;  %1262 = vmatpush.bf16.msra.mxu3 %v1255_v1  ;;  %v1242_v16 = vld [vmem:[%s1755_s0 + $0x98] sm:$0xff]  ;;  %v1235_v19 = vld [vmem:[%s1755_s0 + $0x60] sm:$0xff]  ;;  %v1236_v23 = vld [vmem:[%s1755_s0 + $0x68] sm:$0xff] }
   0x8   :  { %v1250_v17 = vld [vmem:[%s1755_s0 + $0xd8] sm:$0xff]  ;;  %v1243_v20 = vld [vmem:[%s1755_s0 + $0xa0] sm:$0xff]  ;;  %v1244_v24 = vld [vmem:[%s1755_s0 + $0xa8] sm:$0xff] }
   0x9   :  { %1191 = vmatmul.msk.bf16.vlgmr.msra.gmra.mxu0 %vm390_vm0, %v1223_v2  ;;  %1199 = vmatmul.msk.bf16.vlgmr.msra.gmra.mxu1 %vm390_vm0, %v1231_v3  ;;  %v1251_v21 = vld [vmem:[%s1755_s0 + $0xe0] sm:$0xff]  ;;  %v1252_v25 = vld [vmem:[%s1755_s0 + $0xe8] sm:$0xff]  ;;  %v1229_v26 = vld [vmem:[%s1755_s0 + $0x30] sm:$0xff] }
   0xa   :  { %1207 = vmatmul.msk.bf16.vlgmr.msra.gmra.mxu2 %vm390_vm0, %v1239_v4  ;;  %1215 = vmatmul.msk.bf16.vlgmr.msra.gmra.mxu3 %vm390_vm0, %v1247_v5  ;;  %v1237_v27 = vld [vmem:[%s1755_s0 + $0x70] sm:$0xff]  ;;  %v1230_v30 = vld [vmem:[%s1755_s0 + $0x38] sm:$0xff]  ;;  %v1427_v34 = vld [vmem:[%s1756_s2] ss:$0 sm:$0xff] }
   0xb   :  { %v1245_v28 = vld [vmem:[%s1755_s0 + $0xb0] sm:$0xff]  ;;  %v1238_v31 = vld [vmem:[%s1755_s0 + $0x78] sm:$0xff]  ;;  %v1432_v35 = vld [vmem:[%s1757_s3] ss:$0 sm:$0xff] }
   0xc   :  { %v1253_v29 = vld [vmem:[%s1755_s0 + $0xf0] sm:$0xff]  ;;  %v1246_v32 = vld [vmem:[%s1755_s0 + $0xb8] sm:$0xff] }
   0xd   :  { %v1254_v33 = vld [vmem:[%s1755_s0 + $0xf8] sm:$0xff] }
  0x19   :  { %1192 = vmatmul.msk.bf16.gmra.mxu0 %vm390_vm0, %v1224_v6  ;;  %1200 = vmatmul.msk.bf16.gmra.mxu1 %vm390_vm0, %v1232_v7 }
  0x1a   :  { %1208 = vmatmul.msk.bf16.gmra.mxu2 %vm390_vm0, %v1240_v8  ;;  %1216 = vmatmul.msk.bf16.gmra.mxu3 %vm390_vm0, %v1248_v9 }
  0x29   :  { %1193 = vmatmul.msk.bf16.gmra.mxu0 %vm390_vm0, %v1225_v10  ;;  %1201 = vmatmul.msk.bf16.gmra.mxu1 %vm390_vm0, %v1233_v11 }
  0x2a   :  { %1209 = vmatmul.msk.bf16.gmra.mxu2 %vm390_vm0, %v1241_v12  ;;  %1217 = vmatmul.msk.bf16.gmra.mxu3 %vm390_vm0, %v1249_v13 }
  0x39   :  { %1194 = vmatmul.msk.bf16.gmra.mxu0 %vm390_vm0, %v1226_v14  ;;  %1202 = vmatmul.msk.bf16.gmra.mxu1 %vm390_vm0, %v1234_v15 }
  0x3a   :  { %1210 = vmatmul.msk.bf16.gmra.mxu2 %vm390_vm0, %v1242_v16  ;;  %1218 = vmatmul.msk.bf16.gmra.mxu3 %vm390_vm0, %v1250_v17 }
  0x49   :  { %1195 = vmatmul.msk.bf16.gmra.mxu0 %vm390_vm0, %v1227_v18  ;;  %1203 = vmatmul.msk.bf16.gmra.mxu1 %vm390_vm0, %v1235_v19 }
  0x4a   :  { %1211 = vmatmul.msk.bf16.gmra.mxu2 %vm390_vm0, %v1243_v20  ;;  %1219 = vmatmul.msk.bf16.gmra.mxu3 %vm390_vm0, %v1251_v21 }
  0x59   :  { %1196 = vmatmul.msk.bf16.gmra.mxu0 %vm390_vm0, %v1228_v22  ;;  %1204 = vmatmul.msk.bf16.gmra.mxu1 %vm390_vm0, %v1236_v23 }
  0x5a   :  { %1212 = vmatmul.msk.bf16.gmra.mxu2 %vm390_vm0, %v1244_v24  ;;  %1220 = vmatmul.msk.bf16.gmra.mxu3 %vm390_vm0, %v1252_v25 }
  0x69   :  { %1197 = vmatmul.msk.bf16.gmra.mxu0 %vm390_vm0, %v1229_v26  ;;  %1205 = vmatmul.msk.bf16.gmra.mxu1 %vm390_vm0, %v1237_v27 }
  0x6a   :  { %1213 = vmatmul.msk.bf16.gmra.mxu2 %vm390_vm0, %v1245_v28  ;;  %1221 = vmatmul.msk.bf16.gmra.mxu3 %vm390_vm0, %v1253_v29 }
  0x79   :  { %1198 = vmatmul.msk.bf16.gmra.mxu0 %vm390_vm0, %v1230_v30  ;;  %1206 = vmatmul.msk.bf16.gmra.mxu1 %vm390_vm0, %v1238_v31 }
  0x7a   :  { %1214 = vmatmul.msk.bf16.gmra.mxu2 %vm390_vm0, %v1246_v32  ;;  %1222 = vmatmul.msk.bf16.gmra.mxu3 %vm390_vm0, %v1254_v33 }
  0x86   :  { %v496_v36 = vpop.f32.mrf.mxu0  ;;  %v536_v37 = vpop.f32.mrf.mxu1 }
  0x87   :  { %v855_v38 = vmul.f32 %v1427_v34, %v496_v36  ;;  %v871_v39 = vmul.f32 %v1427_v34, %v536_v37 }
  0x89   :  { %v923_v40 = vadd.f32 %v1432_v35, %v855_v38  ;;  %v939_v41 = vadd.f32 %v1432_v35, %v871_v39 }
  0x8b   :  { %987 = vst [vmem:[%s1758_s4] sm:$0xff] %v923_v40 }
  0x8c   :  { %1003 = vst [vmem:[%s1758_s4 + $0x80] sm:$0xff] %v939_v41 }
  0x8d   :  { %v576_v42 = vpop.f32.mrf.mxu2  ;;  %v616_v43 = vpop.f32.mrf.mxu3 }
  0x8e   :  { %v887_v44 = vmul.f32 %v1427_v34, %v576_v42  ;;  %v903_v45 = vmul.f32 %v1427_v34, %v616_v43  ;;  %v498_v46 = vpop.f32.mrf.mxu0  ;;  %v538_v47 = vpop.f32.mrf.mxu1 }
  0x8f   :  { %v856_v48 = vmul.f32 %v1427_v34, %v498_v46  ;;  %v872_v49 = vmul.f32 %v1427_v34, %v538_v47 }
  0x90   :  { %v955_v50 = vadd.f32 %v1432_v35, %v887_v44  ;;  %v971_v51 = vadd.f32 %v1432_v35, %v903_v45 }
  0x91   :  { %v924_v52 = vadd.f32 %v1432_v35, %v856_v48  ;;  %v940_v53 = vadd.f32 %v1432_v35, %v872_v49 }
  0x92   :  { %1019 = vst [vmem:[%s1758_s4 + $0x100] sm:$0xff] %v955_v50 }
  0x93   :  { %1035 = vst [vmem:[%s1758_s4 + $0x180] sm:$0xff] %v971_v51 }
  0x94   :  { %988 = vst [vmem:[%s1758_s4 + $0x8] sm:$0xff] %v924_v52 }
  0x95   :  { %1004 = vst [vmem:[%s1758_s4 + $0x88] sm:$0xff] %v940_v53  ;;  %v578_v54 = vpop.f32.mrf.mxu2  ;;  %v618_v55 = vpop.f32.mrf.mxu3 }
  0x96   :  { %v888_v56 = vmul.f32 %v1427_v34, %v578_v54  ;;  %v904_v57 = vmul.f32 %v1427_v34, %v618_v55  ;;  %v501_v58 = vpop.f32.mrf.mxu0  ;;  %v541_v59 = vpop.f32.mrf.mxu1 }
  0x97   :  { %v857_v60 = vmul.f32 %v1427_v34, %v501_v58  ;;  %v873_v61 = vmul.f32 %v1427_v34, %v541_v59 }
  0x98   :  { %v956_v62 = vadd.f32 %v1432_v35, %v888_v56  ;;  %v972_v63 = vadd.f32 %v1432_v35, %v904_v57 }
  0x99   :  { %v925_v0 = vadd.f32 %v1432_v35, %v857_v60  ;;  %v941_v1 = vadd.f32 %v1432_v35, %v873_v61 }
  0x9a   :  { %1020 = vst [vmem:[%s1758_s4 + $0x108] sm:$0xff] %v956_v62 }
  0x9b   :  { %1036 = vst [vmem:[%s1758_s4 + $0x188] sm:$0xff] %v972_v63 }
  0x9c   :  { %989 = vst [vmem:[%s1758_s4 + $0x10] sm:$0xff] %v925_v0 }
  0x9d   :  { %1005 = vst [vmem:[%s1758_s4 + $0x90] sm:$0xff] %v941_v1  ;;  %v581_v2 = vpop.f32.mrf.mxu2  ;;  %v621_v3 = vpop.f32.mrf.mxu3 }
  0x9e   :  { %v889_v4 = vmul.f32 %v1427_v34, %v581_v2  ;;  %v905_v5 = vmul.f32 %v1427_v34, %v621_v3  ;;  %v503_v6 = vpop.f32.mrf.mxu0  ;;  %v543_v7 = vpop.f32.mrf.mxu1 }
  0x9f   :  { %v858_v8 = vmul.f32 %v1427_v34, %v503_v6  ;;  %v874_v9 = vmul.f32 %v1427_v34, %v543_v7 }
  0xa0   :  { %v957_v10 = vadd.f32 %v1432_v35, %v889_v4  ;;  %v973_v11 = vadd.f32 %v1432_v35, %v905_v5 }
  0xa1   :  { %v926_v12 = vadd.f32 %v1432_v35, %v858_v8  ;;  %v942_v13 = vadd.f32 %v1432_v35, %v874_v9 }
  0xa2   :  { %1021 = vst [vmem:[%s1758_s4 + $0x110] sm:$0xff] %v957_v10 }
  0xa3   :  { %1037 = vst [vmem:[%s1758_s4 + $0x190] sm:$0xff] %v973_v11 }
  0xa4   :  { %990 = vst [vmem:[%s1758_s4 + $0x18] sm:$0xff] %v926_v12 }
  0xa5   :  { %1006 = vst [vmem:[%s1758_s4 + $0x98] sm:$0xff] %v942_v13  ;;  %v583_v14 = vpop.f32.mrf.mxu2  ;;  %v623_v15 = vpop.f32.mrf.mxu3 }
  0xa6   :  { %v890_v16 = vmul.f32 %v1427_v34, %v583_v14  ;;  %v906_v17 = vmul.f32 %v1427_v34, %v623_v15  ;;  %v506_v18 = vpop.f32.mrf.mxu0  ;;  %v546_v19 = vpop.f32.mrf.mxu1 }
  0xa7   :  { %v859_v20 = vmul.f32 %v1427_v34, %v506_v18  ;;  %v875_v21 = vmul.f32 %v1427_v34, %v546_v19 }
  0xa8   :  { %v958_v22 = vadd.f32 %v1432_v35, %v890_v16  ;;  %v974_v23 = vadd.f32 %v1432_v35, %v906_v17 }
  0xa9   :  { %v927_v24 = vadd.f32 %v1432_v35, %v859_v20  ;;  %v943_v25 = vadd.f32 %v1432_v35, %v875_v21 }
  0xaa   :  { %1022 = vst [vmem:[%s1758_s4 + $0x118] sm:$0xff] %v958_v22 }
  0xab   :  { %1038 = vst [vmem:[%s1758_s4 + $0x198] sm:$0xff] %v974_v23 }
  0xac   :  { %991 = vst [vmem:[%s1758_s4 + $0x20] sm:$0xff] %v927_v24 }
  0xad   :  { %1007 = vst [vmem:[%s1758_s4 + $0xa0] sm:$0xff] %v943_v25  ;;  %v586_v26 = vpop.f32.mrf.mxu2  ;;  %v626_v27 = vpop.f32.mrf.mxu3 }
  0xae   :  { %v891_v28 = vmul.f32 %v1427_v34, %v586_v26  ;;  %v907_v29 = vmul.f32 %v1427_v34, %v626_v27  ;;  %v508_v30 = vpop.f32.mrf.mxu0  ;;  %v548_v31 = vpop.f32.mrf.mxu1 }
  0xaf   :  { %v860_v32 = vmul.f32 %v1427_v34, %v508_v30  ;;  %v876_v33 = vmul.f32 %v1427_v34, %v548_v31 }
  0xb0   :  { %v959_v36 = vadd.f32 %v1432_v35, %v891_v28  ;;  %v975_v37 = vadd.f32 %v1432_v35, %v907_v29 }
  0xb1   :  { %v928_v38 = vadd.f32 %v1432_v35, %v860_v32  ;;  %v944_v39 = vadd.f32 %v1432_v35, %v876_v33 }
  0xb2   :  { %1023 = vst [vmem:[%s1758_s4 + $0x120] sm:$0xff] %v959_v36 }
  0xb3   :  { %1039 = vst [vmem:[%s1758_s4 + $0x1a0] sm:$0xff] %v975_v37 }
  0xb4   :  { %992 = vst [vmem:[%s1758_s4 + $0x28] sm:$0xff] %v928_v38 }
  0xb5   :  { %1008 = vst [vmem:[%s1758_s4 + $0xa8] sm:$0xff] %v944_v39  ;;  %v588_v40 = vpop.f32.mrf.mxu2  ;;  %v628_v41 = vpop.f32.mrf.mxu3 }
  0xb6   :  { %v892_v42 = vmul.f32 %v1427_v34, %v588_v40  ;;  %v908_v43 = vmul.f32 %v1427_v34, %v628_v41  ;;  %v511_v44 = vpop.f32.mrf.mxu0  ;;  %v551_v45 = vpop.f32.mrf.mxu1 }
  0xb7   :  { %v861_v46 = vmul.f32 %v1427_v34, %v511_v44  ;;  %v877_v47 = vmul.f32 %v1427_v34, %v551_v45 }
  0xb8   :  { %v960_v48 = vadd.f32 %v1432_v35, %v892_v42  ;;  %v976_v49 = vadd.f32 %v1432_v35, %v908_v43 }
  0xb9   :  { %v929_v50 = vadd.f32 %v1432_v35, %v861_v46  ;;  %v945_v51 = vadd.f32 %v1432_v35, %v877_v47 }
  0xba   :  { %1024 = vst [vmem:[%s1758_s4 + $0x128] sm:$0xff] %v960_v48 }
  0xbb   :  { %1040 = vst [vmem:[%s1758_s4 + $0x1a8] sm:$0xff] %v976_v49 }
  0xbc   :  { %993 = vst [vmem:[%s1758_s4 + $0x30] sm:$0xff] %v929_v50 }
  0xbd   :  { %1009 = vst [vmem:[%s1758_s4 + $0xb0] sm:$0xff] %v945_v51  ;;  %v591_v52 = vpop.f32.mrf.mxu2  ;;  %v631_v53 = vpop.f32.mrf.mxu3 }
  0xbe   :  { %v893_v54 = vmul.f32 %v1427_v34, %v591_v52  ;;  %v909_v55 = vmul.f32 %v1427_v34, %v631_v53  ;;  %v513_v56 = vpop.f32.mrf.mxu0  ;;  %v553_v57 = vpop.f32.mrf.mxu1 }
  0xbf   :  { %v862_v58 = vmul.f32 %v1427_v34, %v513_v56  ;;  %v878_v59 = vmul.f32 %v1427_v34, %v553_v57 }
  0xc0   :  { %v961_v60 = vadd.f32 %v1432_v35, %v893_v54  ;;  %v977_v61 = vadd.f32 %v1432_v35, %v909_v55 }
  0xc1   :  { %v930_v62 = vadd.f32 %v1432_v35, %v862_v58  ;;  %v946_v63 = vadd.f32 %v1432_v35, %v878_v59 }
  0xc2   :  { %1025 = vst [vmem:[%s1758_s4 + $0x130] sm:$0xff] %v961_v60 }
  0xc3   :  { %1041 = vst [vmem:[%s1758_s4 + $0x1b0] sm:$0xff] %v977_v61 }
  0xc4   :  { %994 = vst [vmem:[%s1758_s4 + $0x38] sm:$0xff] %v930_v62 }
  0xc5   :  { %1010 = vst [vmem:[%s1758_s4 + $0xb8] sm:$0xff] %v946_v63  ;;  %v593_v0 = vpop.f32.mrf.mxu2  ;;  %v633_v1 = vpop.f32.mrf.mxu3 }
  0xc6   :  { %v894_v2 = vmul.f32 %v1427_v34, %v593_v0  ;;  %v910_v3 = vmul.f32 %v1427_v34, %v633_v1  ;;  %v516_v4 = vpop.f32.mrf.mxu0  ;;  %v556_v5 = vpop.f32.mrf.mxu1 }
  0xc7   :  { %v863_v6 = vmul.f32 %v1427_v34, %v516_v4  ;;  %v879_v7 = vmul.f32 %v1427_v34, %v556_v5 }
  0xc8   :  { %v962_v8 = vadd.f32 %v1432_v35, %v894_v2  ;;  %v978_v9 = vadd.f32 %v1432_v35, %v910_v3 }
  0xc9   :  { %v931_v10 = vadd.f32 %v1432_v35, %v863_v6  ;;  %v947_v11 = vadd.f32 %v1432_v35, %v879_v7 }
  0xca   :  { %1026 = vst [vmem:[%s1758_s4 + $0x138] sm:$0xff] %v962_v8 }
  0xcb   :  { %1042 = vst [vmem:[%s1758_s4 + $0x1b8] sm:$0xff] %v978_v9 }
  0xcc   :  { %995 = vst [vmem:[%s1758_s4 + $0x40] sm:$0xff] %v931_v10 }
  0xcd   :  { %1011 = vst [vmem:[%s1758_s4 + $0xc0] sm:$0xff] %v947_v11  ;;  %v596_v12 = vpop.f32.mrf.mxu2  ;;  %v636_v13 = vpop.f32.mrf.mxu3 }
  0xce   :  { %v895_v14 = vmul.f32 %v1427_v34, %v596_v12  ;;  %v911_v15 = vmul.f32 %v1427_v34, %v636_v13  ;;  %v518_v16 = vpop.f32.mrf.mxu0  ;;  %v558_v17 = vpop.f32.mrf.mxu1 }
  0xcf   :  { %v864_v18 = vmul.f32 %v1427_v34, %v518_v16  ;;  %v880_v19 = vmul.f32 %v1427_v34, %v558_v17 }
  0xd0   :  { %v963_v20 = vadd.f32 %v1432_v35, %v895_v14  ;;  %v979_v21 = vadd.f32 %v1432_v35, %v911_v15 }
  0xd1   :  { %v932_v22 = vadd.f32 %v1432_v35, %v864_v18  ;;  %v948_v23 = vadd.f32 %v1432_v35, %v880_v19 }
  0xd2   :  { %1027 = vst [vmem:[%s1758_s4 + $0x140] sm:$0xff] %v963_v20 }
  0xd3   :  { %1043 = vst [vmem:[%s1758_s4 + $0x1c0] sm:$0xff] %v979_v21 }
  0xd4   :  { %996 = vst [vmem:[%s1758_s4 + $0x48] sm:$0xff] %v932_v22 }
  0xd5   :  { %1012 = vst [vmem:[%s1758_s4 + $0xc8] sm:$0xff] %v948_v23  ;;  %v598_v24 = vpop.f32.mrf.mxu2  ;;  %v638_v25 = vpop.f32.mrf.mxu3 }
  0xd6   :  { %v896_v26 = vmul.f32 %v1427_v34, %v598_v24  ;;  %v912_v27 = vmul.f32 %v1427_v34, %v638_v25  ;;  %v521_v28 = vpop.f32.mrf.mxu0  ;;  %v561_v29 = vpop.f32.mrf.mxu1 }
  0xd7   :  { %v865_v30 = vmul.f32 %v1427_v34, %v521_v28  ;;  %v881_v31 = vmul.f32 %v1427_v34, %v561_v29 }
  0xd8   :  { %v964_v32 = vadd.f32 %v1432_v35, %v896_v26  ;;  %v980_v33 = vadd.f32 %v1432_v35, %v912_v27 }
  0xd9   :  { %v933_v36 = vadd.f32 %v1432_v35, %v865_v30  ;;  %v949_v37 = vadd.f32 %v1432_v35, %v881_v31 }
  0xda   :  { %1028 = vst [vmem:[%s1758_s4 + $0x148] sm:$0xff] %v964_v32 }
  0xdb   :  { %1044 = vst [vmem:[%s1758_s4 + $0x1c8] sm:$0xff] %v980_v33 }
  0xdc   :  { %997 = vst [vmem:[%s1758_s4 + $0x50] sm:$0xff] %v933_v36 }
  0xdd   :  { %1013 = vst [vmem:[%s1758_s4 + $0xd0] sm:$0xff] %v949_v37  ;;  %v601_v38 = vpop.f32.mrf.mxu2  ;;  %v641_v39 = vpop.f32.mrf.mxu3 }
  0xde   :  { %v897_v40 = vmul.f32 %v1427_v34, %v601_v38  ;;  %v913_v41 = vmul.f32 %v1427_v34, %v641_v39  ;;  %v523_v42 = vpop.f32.mrf.mxu0  ;;  %v563_v43 = vpop.f32.mrf.mxu1 }
  0xdf   :  { %v866_v44 = vmul.f32 %v1427_v34, %v523_v42  ;;  %v882_v45 = vmul.f32 %v1427_v34, %v563_v43 }
  0xe0   :  { %v965_v46 = vadd.f32 %v1432_v35, %v897_v40  ;;  %v981_v47 = vadd.f32 %v1432_v35, %v913_v41 }
  0xe1   :  { %v934_v48 = vadd.f32 %v1432_v35, %v866_v44  ;;  %v950_v49 = vadd.f32 %v1432_v35, %v882_v45 }
  0xe2   :  { %1029 = vst [vmem:[%s1758_s4 + $0x150] sm:$0xff] %v965_v46 }
  0xe3   :  { %1045 = vst [vmem:[%s1758_s4 + $0x1d0] sm:$0xff] %v981_v47 }
  0xe4   :  { %998 = vst [vmem:[%s1758_s4 + $0x58] sm:$0xff] %v934_v48 }
  0xe5   :  { %1014 = vst [vmem:[%s1758_s4 + $0xd8] sm:$0xff] %v950_v49  ;;  %v603_v50 = vpop.f32.mrf.mxu2  ;;  %v643_v51 = vpop.f32.mrf.mxu3 }
  0xe6   :  { %v898_v52 = vmul.f32 %v1427_v34, %v603_v50  ;;  %v914_v53 = vmul.f32 %v1427_v34, %v643_v51  ;;  %v526_v54 = vpop.f32.mrf.mxu0  ;;  %v566_v55 = vpop.f32.mrf.mxu1 }
  0xe7   :  { %v867_v56 = vmul.f32 %v1427_v34, %v526_v54  ;;  %v883_v57 = vmul.f32 %v1427_v34, %v566_v55 }
  0xe8   :  { %v966_v58 = vadd.f32 %v1432_v35, %v898_v52  ;;  %v982_v59 = vadd.f32 %v1432_v35, %v914_v53 }
  0xe9   :  { %v935_v60 = vadd.f32 %v1432_v35, %v867_v56  ;;  %v951_v61 = vadd.f32 %v1432_v35, %v883_v57 }
  0xea   :  { %1030 = vst [vmem:[%s1758_s4 + $0x158] sm:$0xff] %v966_v58 }
  0xeb   :  { %1046 = vst [vmem:[%s1758_s4 + $0x1d8] sm:$0xff] %v982_v59 }
  0xec   :  { %999 = vst [vmem:[%s1758_s4 + $0x60] sm:$0xff] %v935_v60 }
  0xed   :  { %1015 = vst [vmem:[%s1758_s4 + $0xe0] sm:$0xff] %v951_v61  ;;  %v606_v62 = vpop.f32.mrf.mxu2  ;;  %v646_v63 = vpop.f32.mrf.mxu3 }
  0xee   :  { %v899_v0 = vmul.f32 %v1427_v34, %v606_v62  ;;  %v915_v1 = vmul.f32 %v1427_v34, %v646_v63  ;;  %v528_v2 = vpop.f32.mrf.mxu0  ;;  %v568_v3 = vpop.f32.mrf.mxu1 }
  0xef   :  { %v868_v4 = vmul.f32 %v1427_v34, %v528_v2  ;;  %v884_v5 = vmul.f32 %v1427_v34, %v568_v3 }
  0xf0   :  { %v967_v6 = vadd.f32 %v1432_v35, %v899_v0  ;;  %v983_v7 = vadd.f32 %v1432_v35, %v915_v1 }
  0xf1   :  { %v936_v8 = vadd.f32 %v1432_v35, %v868_v4  ;;  %v952_v9 = vadd.f32 %v1432_v35, %v884_v5 }
  0xf2   :  { %1031 = vst [vmem:[%s1758_s4 + $0x160] sm:$0xff] %v967_v6 }
  0xf3   :  { %1047 = vst [vmem:[%s1758_s4 + $0x1e0] sm:$0xff] %v983_v7 }
  0xf4   :  { %1000 = vst [vmem:[%s1758_s4 + $0x68] sm:$0xff] %v936_v8 }
  0xf5   :  { %1016 = vst [vmem:[%s1758_s4 + $0xe8] sm:$0xff] %v952_v9  ;;  %v608_v10 = vpop.f32.mrf.mxu2  ;;  %v648_v11 = vpop.f32.mrf.mxu3 }
  0xf6   :  { %v900_v12 = vmul.f32 %v1427_v34, %v608_v10  ;;  %v916_v13 = vmul.f32 %v1427_v34, %v648_v11  ;;  %v531_v14 = vpop.f32.mrf.mxu0  ;;  %v571_v15 = vpop.f32.mrf.mxu1 }
  0xf7   :  { %v869_v16 = vmul.f32 %v1427_v34, %v531_v14  ;;  %v885_v17 = vmul.f32 %v1427_v34, %v571_v15 }
  0xf8   :  { %v968_v18 = vadd.f32 %v1432_v35, %v900_v12  ;;  %v984_v19 = vadd.f32 %v1432_v35, %v916_v13 }
  0xf9   :  { %v937_v20 = vadd.f32 %v1432_v35, %v869_v16  ;;  %v953_v21 = vadd.f32 %v1432_v35, %v885_v17 }
  0xfa   :  { %1032 = vst [vmem:[%s1758_s4 + $0x168] sm:$0xff] %v968_v18 }
  0xfb   :  { %1048 = vst [vmem:[%s1758_s4 + $0x1e8] sm:$0xff] %v984_v19 }
  0xfc   :  { %1001 = vst [vmem:[%s1758_s4 + $0x70] sm:$0xff] %v937_v20 }
  0xfd   :  { %1017 = vst [vmem:[%s1758_s4 + $0xf0] sm:$0xff] %v953_v21  ;;  %v611_v22 = vpop.f32.mrf.mxu2  ;;  %v651_v23 = vpop.f32.mrf.mxu3 }
  0xfe   :  { %v901_v24 = vmul.f32 %v1427_v34, %v611_v22  ;;  %v917_v25 = vmul.f32 %v1427_v34, %v651_v23  ;;  %v533_v26 = vpop.f32.mrf.mxu0  ;;  %v573_v27 = vpop.f32.mrf.mxu1 }
  0xff   :  { %v870_v28 = vmul.f32 %v1427_v34, %v533_v26  ;;  %v886_v29 = vmul.f32 %v1427_v34, %v573_v27 }
 0x100   :  { %v969_v30 = vadd.f32 %v1432_v35, %v901_v24  ;;  %v985_v31 = vadd.f32 %v1432_v35, %v917_v25 }
 0x101   :  { %v938_v32 = vadd.f32 %v1432_v35, %v870_v28  ;;  %v954_v33 = vadd.f32 %v1432_v35, %v886_v29 }
 0x102   :  { %1033 = vst [vmem:[%s1758_s4 + $0x170] sm:$0xff] %v969_v30 }
 0x103   :  { %1049 = vst [vmem:[%s1758_s4 + $0x1f0] sm:$0xff] %v985_v31 }
 0x104   :  { %1002 = vst [vmem:[%s1758_s4 + $0x78] sm:$0xff] %v938_v32 }
 0x105   :  { %1018 = vst [vmem:[%s1758_s4 + $0xf8] sm:$0xff] %v954_v33  ;;  %v613_v36 = vpop.f32.mrf.mxu2  ;;  %v653_v37 = vpop.f32.mrf.mxu3 }
 0x106   :  { %v902_v38 = vmul.f32 %v1427_v34, %v613_v36  ;;  %v918_v39 = vmul.f32 %v1427_v34, %v653_v37 }
 0x108   :  { %v970_v40 = vadd.f32 %v1432_v35, %v902_v38  ;;  %v986_v41 = vadd.f32 %v1432_v35, %v918_v39 }
 0x10a   :  { %1034 = vst [vmem:[%s1758_s4 + $0x178] sm:$0xff] %v970_v40 }
 0x10b   :  { %1050 = vst [vmem:[%s1758_s4 + $0x1f8] sm:$0xff] %v986_v41 }

// kernel: bottleneck_forward.4
= control target key start
LH: loop header
LB: loop body
LE: loop exit
PB: predicated region body
PF: predicated region fallthrough
CT: control target
= control target key end

     0   :  { %vm21_vm0 = vcmask 261120   ;;  %v1397_v32 = vmov 0.0   ;;  %vm1099_vm1 = vcmask 257024   ;;  %s2184_s1 = inlined_call_operand.vmem [shape: bf16[128,32], index: 1, kind: input, shape index: {}]   ;;  %s2185_s2 = inlined_call_operand.vmem [shape: f32[1,32], index: 2, kind: input, shape index: {}]   ;;  %s2186_s3 = inlined_call_operand.vmem [shape: f32[1,32], index: 3, kind: input, shape index: {}]   ;;  %s2187_s0 = inlined_call_operand.vmem [shape: bf16[512,128], index: 0, kind: input, shape index: {}]   ;;  %s2188_s4 = inlined_call_operand.vmem [shape: bf16[512,32], index: 4, kind: output, shape index: {}]  }
   0x1   :  { %v1367_v0 = vld [vmem:[%s2184_s1 + $0x38] sm:$0xff]  ;;  %v1366_v1 = vld [vmem:[%s2184_s1 + $0x30] sm:$0xff]  ;;  %v1365_v2 = vld [vmem:[%s2184_s1 + $0x28] sm:$0xff]  ;;  %22 = vst.msk [vmem:[#allocation2] sm:$0xff] %vm21_vm0, %v1397_v32 }
   0x2   :  { %470 = vmatpush.bf16.msra.mxu0 %v1367_v0  ;;  %1368 = vmatpush.bf16.msra.mxu1 %v1367_v0  ;;  %v1364_v3 = vld [vmem:[%s2184_s1 + $0x20] sm:$0xff]  ;;  %v1363_v4 = vld [vmem:[%s2184_s1 + $0x18] sm:$0xff]  ;;  %v1362_v5 = vld [vmem:[%s2184_s1 + $0x10] sm:$0xff]  ;;  %23 = vst.msk [vmem:[#allocation2 + $0x8] sm:$0xff] %vm21_vm0, %v1397_v32 }
   0x3   :  { %1369 = vmatpush.bf16.msra.mxu2 %v1367_v0  ;;  %1370 = vmatpush.bf16.msra.mxu3 %v1367_v0  ;;  %v1361_v6 = vld [vmem:[%s2184_s1 + $0x8] sm:$0xff]  ;;  %v1360_v7 = vld [vmem:[%s2184_s1] sm:$0xff]  ;;  %v1330_v16 = vld [vmem:[%s2187_s0 + $0x10] sm:$0xff]  ;;  %24 = vst.msk [vmem:[#allocation2 + $0x10] sm:$0xff] %vm21_vm0, %v1397_v32 }
   0x4   :  { %v1328_v8 = vld [vmem:[%s2187_s0] sm:$0xff]  ;;  %v1329_v12 = vld [vmem:[%s2187_s0 + $0x8] sm:$0xff]  ;;  %v1338_v17 = vld [vmem:[%s2187_s0 + $0x50] sm:$0xff]  ;;  %25 = vst.msk [vmem:[#allocation2 + $0x18] sm:$0xff] %vm21_vm0, %v1397_v32 }
   0x5   :  { %v1336_v9 = vld [vmem:[%s2187_s0 + $0x40] sm:$0xff]  ;;  %v1337_v13 = vld [vmem:[%s2187_s0 + $0x48] sm:$0xff]  ;;  %v1346_v18 = vld [vmem:[%s2187_s0 + $0x90] sm:$0xff]  ;;  %26 = vst.msk [vmem:[#allocation2 + $0x20] sm:$0xff] %vm21_vm0, %v1397_v32 }
   0x6   :  { %471 = vmatpush.bf16.msra.mxu0 %v1366_v1  ;;  %1371 = vmatpush.bf16.msra.mxu1 %v1366_v1  ;;  %v1344_v10 = vld [vmem:[%s2187_s0 + $0x80] sm:$0xff]  ;;  %v1345_v14 = vld [vmem:[%s2187_s0 + $0x88] sm:$0xff]  ;;  %v1354_v19 = vld [vmem:[%s2187_s0 + $0xd0] sm:$0xff]  ;;  %27 = vst.msk [vmem:[#allocation2 + $0x28] sm:$0xff] %vm21_vm0, %v1397_v32 }
   0x7   :  { %1372 = vmatpush.bf16.msra.mxu2 %v1366_v1  ;;  %1373 = vmatpush.bf16.msra.mxu3 %v1366_v1  ;;  %v1352_v11 = vld [vmem:[%s2187_s0 + $0xc0] sm:$0xff]  ;;  %v1353_v15 = vld [vmem:[%s2187_s0 + $0xc8] sm:$0xff]  ;;  %v1331_v20 = vld [vmem:[%s2187_s0 + $0x18] sm:$0xff]  ;;  %28 = vst.msk [vmem:[#allocation2 + $0x30] sm:$0xff] %vm21_vm0, %v1397_v32 }
   0x8   :  { %v1339_v21 = vld [vmem:[%s2187_s0 + $0x58] sm:$0xff]  ;;  %v1332_v24 = vld [vmem:[%s2187_s0 + $0x20] sm:$0xff]  ;;  %v1333_v28 = vld [vmem:[%s2187_s0 + $0x28] sm:$0xff]  ;;  %29 = vst.msk [vmem:[#allocation2 + $0x38] sm:$0xff] %vm21_vm0, %v1397_v32 }
   0x9   :  { %v1347_v22 = vld [vmem:[%s2187_s0 + $0x98] sm:$0xff]  ;;  %v1340_v25 = vld [vmem:[%s2187_s0 + $0x60] sm:$0xff]  ;;  %v1341_v29 = vld [vmem:[%s2187_s0 + $0x68] sm:$0xff]  ;;  %30 = vst.msk [vmem:[#allocation2 + $0x40] sm:$0xff] %vm21_vm0, %v1397_v32 }
   0xa   :  { %472 = vmatpush.bf16.msra.mxu0 %v1365_v2  ;;  %1374 = vmatpush.bf16.msra.mxu1 %v1365_v2  ;;  %v1355_v23 = vld [vmem:[%s2187_s0 + $0xd8] sm:$0xff]  ;;  %v1348_v26 = vld [vmem:[%s2187_s0 + $0xa0] sm:$0xff]  ;;  %v1349_v30 = vld [vmem:[%s2187_s0 + $0xa8] sm:$0xff]  ;;  %31 = vst.msk [vmem:[#allocation2 + $0x48] sm:$0xff] %vm21_vm0, %v1397_v32 }
   0xb   :  { %1375 = vmatpush.bf16.msra.mxu2 %v1365_v2  ;;  %1376 = vmatpush.bf16.msra.mxu3 %v1365_v2  ;;  %v1356_v27 = vld [vmem:[%s2187_s0 + $0xe0] sm:$0xff]  ;;  %v1357_v31 = vld [vmem:[%s2187_s0 + $0xe8] sm:$0xff]  ;;  %v1334_v33 = vld [vmem:[%s2187_s0 + $0x30] sm:$0xff]  ;;  %32 = vst.msk [vmem:[#allocation2 + $0x50] sm:$0xff] %vm21_vm0, %v1397_v32 }
   0xc   :  { %v1342_v34 = vld [vmem:[%s2187_s0 + $0x70] sm:$0xff]  ;;  %33 = vst.msk [vmem:[#allocation2 + $0x58] sm:$0xff] %vm21_vm0, %v1397_v32  ;;  %v1335_v37 = vld [vmem:[%s2187_s0 + $0x38] sm:$0xff]  ;;  %v86_v41 = vld [vmem:[#allocation2] sm:$0xff] }
   0xd   :  { %v1350_v35 = vld [vmem:[%s2187_s0 + $0xb0] sm:$0xff]  ;;  %34 = vst.msk [vmem:[#allocation2 + $0x60] sm:$0xff] %vm21_vm0, %v1397_v32  ;;  %v1343_v38 = vld [vmem:[%s2187_s0 + $0x78] sm:$0xff]  ;;  %v1645_v45 = vld [vmem:[%s2185_s2] ss:$0 sm:$0xff] }
   0xe   :  { %473 = vmatpush.bf16.msra.mxu0 %v1364_v3  ;;  %1377 = vmatpush.bf16.msra.mxu1 %v1364_v3  ;;  %v1358_v36 = vld [vmem:[%s2187_s0 + $0xf0] sm:$0xff]  ;;  %35 = vst.msk [vmem:[#allocation2 + $0x68] sm:$0xff] %vm21_vm0, %v1397_v32  ;;  %v1351_v39 = vld [vmem:[%s2187_s0 + $0xb8] sm:$0xff]  ;;  %v1654_v50 = vld [vmem:[%s2186_s3] ss:$0 sm:$0xff] }
   0xf   :  { %1378 = vmatpush.bf16.msra.mxu2 %v1364_v3  ;;  %1379 = vmatpush.bf16.msra.mxu3 %v1364_v3  ;;  %36 = vst.msk [vmem:[#allocation2 + $0x70] sm:$0xff] %vm21_vm0, %v1397_v32  ;;  %v1359_v40 = vld [vmem:[%s2187_s0 + $0xf8] sm:$0xff]  ;;  %v87_v0 = vld [vmem:[#allocation2 + $0x8] sm:$0xff] }
  0x10   :  { %37 = vst.msk [vmem:[#allocation2 + $0x78] sm:$0xff] %vm21_vm0, %v1397_v32 }
  0x11   :  { %38 = vst.msk [vmem:[#allocation2 + $0x80] sm:$0xff] %vm21_vm0, %v1397_v32 }
  0x12   :  { %474 = vmatpush.bf16.msra.mxu0 %v1363_v4  ;;  %1380 = vmatpush.bf16.msra.mxu1 %v1363_v4  ;;  %39 = vst.msk [vmem:[#allocation2 + $0x88] sm:$0xff] %vm21_vm0, %v1397_v32 }
  0x13   :  { %1381 = vmatpush.bf16.msra.mxu2 %v1363_v4  ;;  %1382 = vmatpush.bf16.msra.mxu3 %v1363_v4  ;;  %40 = vst.msk [vmem:[#allocation2 + $0x90] sm:$0xff] %vm21_vm0, %v1397_v32 }
  0x14   :  { %41 = vst.msk [vmem:[#allocation2 + $0x98] sm:$0xff] %vm21_vm0, %v1397_v32 }
  0x15   :  { %42 = vst.msk [vmem:[#allocation2 + $0xa0] sm:$0xff] %vm21_vm0, %v1397_v32 }
  0x16   :  { %475 = vmatpush.bf16.msra.mxu0 %v1362_v5  ;;  %1383 = vmatpush.bf16.msra.mxu1 %v1362_v5  ;;  %43 = vst.msk [vmem:[#allocation2 + $0xa8] sm:$0xff] %vm21_vm0, %v1397_v32 }
  0x17   :  { %1384 = vmatpush.bf16.msra.mxu2 %v1362_v5  ;;  %1385 = vmatpush.bf16.msra.mxu3 %v1362_v5  ;;  %44 = vst.msk [vmem:[#allocation2 + $0xb0] sm:$0xff] %vm21_vm0, %v1397_v32 }
  0x18   :  { %45 = vst.msk [vmem:[#allocation2 + $0xb8] sm:$0xff] %vm21_vm0, %v1397_v32  ;;  %v102_v57 = vld [vmem:[#allocation2 + $0x80] sm:$0xff] }
  0x19   :  { %46 = vst.msk [vmem:[#allocation2 + $0xc0] sm:$0xff] %vm21_vm0, %v1397_v32  ;;  %v103_v2 = vld [vmem:[#allocation2 + $0x88] sm:$0xff] }
  0x1a   :  { %476 = vmatpush.bf16.msra.mxu0 %v1361_v6  ;;  %1386 = vmatpush.bf16.msra.mxu1 %v1361_v6  ;;  %47 = vst.msk [vmem:[#allocation2 + $0xc8] sm:$0xff] %vm21_vm0, %v1397_v32 }
  0x1b   :  { %1387 = vmatpush.bf16.msra.mxu2 %v1361_v6  ;;  %1388 = vmatpush.bf16.msra.mxu3 %v1361_v6  ;;  %48 = vst.msk [vmem:[#allocation2 + $0xd0] sm:$0xff] %vm21_vm0, %v1397_v32 }
  0x1c   :  { %49 = vst.msk [vmem:[#allocation2 + $0xd8] sm:$0xff] %vm21_vm0, %v1397_v32 }
  0x1d   :  { %50 = vst.msk [vmem:[#allocation2 + $0xe0] sm:$0xff] %vm21_vm0, %v1397_v32 }
  0x1e   :  { %477 = vmatpush.bf16.msra.mxu0 %v1360_v7  ;;  %1389 = vmatpush.bf16.msra.mxu1 %v1360_v7  ;;  %51 = vst.msk [vmem:[#allocation2 + $0xe8] sm:$0xff] %vm21_vm0, %v1397_v32 }
  0x1f   :  { %1390 = vmatpush.bf16.msra.mxu2 %v1360_v7  ;;  %1391 = vmatpush.bf16.msra.mxu3 %v1360_v7  ;;  %52 = vst.msk [vmem:[#allocation2 + $0xf0] sm:$0xff] %vm21_vm0, %v1397_v32 }
  0x20   :  { %53 = vst.msk [vmem:[#allocation2 + $0xf8] sm:$0xff] %vm21_vm0, %v1397_v32 }
  0x21   :  { %478 = vmatmul.bf16.vlgmr.msra.gmra.mxu0 %v1328_v8  ;;  %518 = vmatmul.bf16.vlgmr.msra.gmra.mxu1 %v1336_v9  ;;  %54 = vst.msk [vmem:[#allocation2 + $0x100] sm:$0xff] %vm21_vm0, %v1397_v32  ;;  %v88_v8 = vld [vmem:[#allocation2 + $0x10] sm:$0xff] }
  0x22   :  { %558 = vmatmul.bf16.vlgmr.msra.gmra.mxu2 %v1344_v10  ;;  %598 = vmatmul.bf16.vlgmr.msra.gmra.mxu3 %v1352_v11  ;;  %55 = vst.msk [vmem:[#allocation2 + $0x108] sm:$0xff] %vm21_vm0, %v1397_v32 }
  0x23   :  { %56 = vst.msk [vmem:[#allocation2 + $0x110] sm:$0xff] %vm21_vm0, %v1397_v32 }
  0x24   :  { %57 = vst.msk [vmem:[#allocation2 + $0x118] sm:$0xff] %vm21_vm0, %v1397_v32 }
  0x25   :  { %58 = vst.msk [vmem:[#allocation2 + $0x120] sm:$0xff] %vm21_vm0, %v1397_v32 }
  0x26   :  { %59 = vst.msk [vmem:[#allocation2 + $0x128] sm:$0xff] %vm21_vm0, %v1397_v32 }
  0x27   :  { %60 = vst.msk [vmem:[#allocation2 + $0x130] sm:$0xff] %vm21_vm0, %v1397_v32 }
  0x28   :  { %61 = vst.msk [vmem:[#allocation2 + $0x138] sm:$0xff] %vm21_vm0, %v1397_v32  ;;  %v118_v61 = vld [vmem:[#allocation2 + $0x100] sm:$0xff] }
  0x29   :  { %62 = vst.msk [vmem:[#allocation2 + $0x140] sm:$0xff] %vm21_vm0, %v1397_v32  ;;  %v119_v4 = vld [vmem:[#allocation2 + $0x108] sm:$0xff] }
  0x2a   :  { %63 = vst.msk [vmem:[#allocation2 + $0x148] sm:$0xff] %vm21_vm0, %v1397_v32 }
  0x2b   :  { %64 = vst.msk [vmem:[#allocation2 + $0x150] sm:$0xff] %vm21_vm0, %v1397_v32 }
  0x2c   :  { %65 = vst.msk [vmem:[#allocation2 + $0x158] sm:$0xff] %vm21_vm0, %v1397_v32 }
  0x2d   :  { %66 = vst.msk [vmem:[#allocation2 + $0x160] sm:$0xff] %vm21_vm0, %v1397_v32 }
  0x2e   :  { %67 = vst.msk [vmem:[#allocation2 + $0x168] sm:$0xff] %vm21_vm0, %v1397_v32 }
  0x2f   :  { %68 = vst.msk [vmem:[#allocation2 + $0x170] sm:$0xff] %vm21_vm0, %v1397_v32 }
  0x30   :  { %69 = vst.msk [vmem:[#allocation2 + $0x178] sm:$0xff] %vm21_vm0, %v1397_v32 }
  0x31   :  { %483 = vmatmul.bf16.gmra.mxu0 %v1329_v12  ;;  %523 = vmatmul.bf16.gmra.mxu1 %v1337_v13  ;;  %70 = vst.msk [vmem:[#allocation2 + $0x180] sm:$0xff] %vm21_vm0, %v1397_v32  ;;  %v104_v12 = vld [vmem:[#allocation2 + $0x90] sm:$0xff] }
  0x32   :  { %563 = vmatmul.bf16.gmra.mxu2 %v1345_v14  ;;  %603 = vmatmul.bf16.gmra.mxu3 %v1353_v15  ;;  %71 = vst.msk [vmem:[#allocation2 + $0x188] sm:$0xff] %vm21_vm0, %v1397_v32 }
  0x33   :  { %72 = vst.msk [vmem:[#allocation2 + $0x190] sm:$0xff] %vm21_vm0, %v1397_v32 }
  0x34   :  { %73 = vst.msk [vmem:[#allocation2 + $0x198] sm:$0xff] %vm21_vm0, %v1397_v32 }
  0x35   :  { %74 = vst.msk [vmem:[#allocation2 + $0x1a0] sm:$0xff] %vm21_vm0, %v1397_v32 }
  0x36   :  { %75 = vst.msk [vmem:[#allocation2 + $0x1a8] sm:$0xff] %vm21_vm0, %v1397_v32 }
  0x37   :  { %76 = vst.msk [vmem:[#allocation2 + $0x1b0] sm:$0xff] %vm21_vm0, %v1397_v32 }
  0x38   :  { %77 = vst.msk [vmem:[#allocation2 + $0x1b8] sm:$0xff] %vm21_vm0, %v1397_v32  ;;  %v134_v62 = vld [vmem:[#allocation2 + $0x180] sm:$0xff] }
  0x39   :  { %78 = vst.msk [vmem:[#allocation2 + $0x1c0] sm:$0xff] %vm21_vm0, %v1397_v32  ;;  %v135_v6 = vld [vmem:[#allocation2 + $0x188] sm:$0xff] }
  0x3a   :  { %79 = vst.msk [vmem:[#allocation2 + $0x1c8] sm:$0xff] %vm21_vm0, %v1397_v32 }
  0x3b   :  { %80 = vst.msk [vmem:[#allocation2 + $0x1d0] sm:$0xff] %vm21_vm0, %v1397_v32 }
  0x3c   :  { %81 = vst.msk [vmem:[#allocation2 + $0x1d8] sm:$0xff] %vm21_vm0, %v1397_v32 }
  0x3d   :  { %82 = vst.msk [vmem:[#allocation2 + $0x1e0] sm:$0xff] %vm21_vm0, %v1397_v32 }
  0x3e   :  { %83 = vst.msk [vmem:[#allocation2 + $0x1e8] sm:$0xff] %vm21_vm0, %v1397_v32 }
  0x3f   :  { %84 = vst.msk [vmem:[#allocation2 + $0x1f0] sm:$0xff] %vm21_vm0, %v1397_v32 }
  0x40   :  { %85 = vst.msk [vmem:[#allocation2 + $0x1f8] sm:$0xff] %vm21_vm0, %v1397_v32 }
  0x41   :  { %488 = vmatmul.bf16.gmra.mxu0 %v1330_v16  ;;  %528 = vmatmul.bf16.gmra.mxu1 %v1338_v17  ;;  %v120_v16 = vld [vmem:[#allocation2 + $0x110] sm:$0xff] }
  0x42   :  { %568 = vmatmul.bf16.gmra.mxu2 %v1346_v18  ;;  %608 = vmatmul.bf16.gmra.mxu3 %v1354_v19  ;;  %v136_v18 = vld [vmem:[#allocation2 + $0x190] sm:$0xff] }
  0x51   :  { %493 = vmatmul.bf16.gmra.mxu0 %v1331_v20  ;;  %533 = vmatmul.bf16.gmra.mxu1 %v1339_v21  ;;  %v89_v20 = vld [vmem:[#allocation2 + $0x18] sm:$0xff] }
  0x52   :  { %573 = vmatmul.bf16.gmra.mxu2 %v1347_v22  ;;  %613 = vmatmul.bf16.gmra.mxu3 %v1355_v23  ;;  %v105_v22 = vld [vmem:[#allocation2 + $0x98] sm:$0xff] }
  0x61   :  { %498 = vmatmul.bf16.gmra.mxu0 %v1332_v24  ;;  %538 = vmatmul.bf16.gmra.mxu1 %v1340_v25  ;;  %v121_v24 = vld [vmem:[#allocation2 + $0x118] sm:$0xff] }
  0x62   :  { %578 = vmatmul.bf16.gmra.mxu2 %v1348_v26  ;;  %618 = vmatmul.bf16.gmra.mxu3 %v1356_v27  ;;  %v137_v27 = vld [vmem:[#allocation2 + $0x198] sm:$0xff] }
  0x71   :  { %503 = vmatmul.bf16.gmra.mxu0 %v1333_v28  ;;  %543 = vmatmul.bf16.gmra.mxu1 %v1341_v29 }
  0x72   :  { %583 = vmatmul.bf16.gmra.mxu2 %v1349_v30  ;;  %623 = vmatmul.bf16.gmra.mxu3 %v1357_v31 }
  0x81   :  { %508 = vmatmul.bf16.gmra.mxu0 %v1334_v33  ;;  %548 = vmatmul.bf16.gmra.mxu1 %v1342_v34  ;;  %v90_v33 = vld [vmem:[#allocation2 + $0x20] sm:$0xff] }
  0x82   :  { %588 = vmatmul.bf16.gmra.mxu2 %v1350_v35  ;;  %628 = vmatmul.bf16.gmra.mxu3 %v1358_v36 }
  0x91   :  { %513 = vmatmul.bf16.gmra.mxu0 %v1335_v37  ;;  %553 = vmatmul.bf16.gmra.mxu1 %v1343_v38 }
  0x92   :  { %593 = vmatmul.bf16.gmra.mxu2 %v1351_v39  ;;  %633 = vmatmul.bf16.gmra.mxu3 %v1359_v40 }
  0x9e   :  { %v479_v42 = vpop.f32.mrf.mxu0  ;;  %v519_v43 = vpop.f32.mrf.mxu1 }
  0x9f   :  { %v639_v44 = vadd.f32 %v479_v42, %v86_v41  ;;  %v655_v63 = vadd.f32 %v519_v43, %v102_v57 }
  0xa1   :  { %704 = vst.msk [vmem:[#allocation2] sm:$0xff] %vm21_vm0, %v639_v44 }
  0xa2   :  { %720 = vst.msk [vmem:[#allocation2 + $0x80] sm:$0xff] %vm21_vm0, %v655_v63 }
  0xa5   :  { %v559_v46 = vpop.f32.mrf.mxu2  ;;  %v599_v47 = vpop.f32.mrf.mxu3 }
  0xa6   :  { %v481_v48 = vpop.f32.mrf.mxu0  ;;  %v521_v49 = vpop.f32.mrf.mxu1  ;;  %v671_v1 = vadd.f32 %v559_v46, %v118_v61  ;;  %v687_v3 = vadd.f32 %v599_v47, %v134_v62 }
  0xa7   :  { %v640_v5 = vadd.f32 %v481_v48, %v87_v0  ;;  %v656_v7 = vadd.f32 %v521_v49, %v103_v2 }
  0xa8   :  { %v771_v51 = vld [vmem:[#allocation2] sm:$0xff]  ;;  %736 = vst.msk [vmem:[#allocation2 + $0x100] sm:$0xff] %vm21_vm0, %v671_v1 }
  0xa9   :  { %v839_v52 = vmul.f32 %v1645_v45, %v771_v51  ;;  %752 = vst.msk [vmem:[#allocation2 + $0x180] sm:$0xff] %vm21_vm0, %v687_v3  ;;  %v787_v25 = vld [vmem:[#allocation2 + $0x80] sm:$0xff] }
  0xaa   :  { %705 = vst.msk [vmem:[#allocation2 + $0x8] sm:$0xff] %vm21_vm0, %v640_v5  ;;  %v855_v28 = vmul.f32 %v1645_v45, %v787_v25 }
  0xab   :  { %v907_v53 = vadd.f32 %v1654_v50, %v839_v52  ;;  %721 = vst.msk [vmem:[#allocation2 + $0x88] sm:$0xff] %vm21_vm0, %v656_v7 }
  0xac   :  { %v923_v39 = vadd.f32 %v1654_v50, %v855_v28 }
  0xad   :  { %v971_v54 = vmax.f32 %v907_v53, 0.0  ;;  %v561_v55 = vpop.f32.mrf.mxu2  ;;  %v601_v56 = vpop.f32.mrf.mxu3 }
  0xae   :  { %v484_v58 = vpop.f32.mrf.mxu0  ;;  %v524_v59 = vpop.f32.mrf.mxu1  ;;  %v672_v11 = vadd.f32 %v561_v55, %v119_v4  ;;  %v688_v15 = vadd.f32 %v601_v56, %v135_v6  ;;  %v987_v48 = vmax.f32 %v923_v39, 0.0 }
  0xaf   :  { %v1035_v60 = vpack.c.bf16 %v971_v54, %v971_v54  ;;  %v641_v17 = vadd.f32 %v484_v58, %v88_v8  ;;  %v657_v19 = vadd.f32 %v524_v59, %v104_v12  ;;  %v803_v29 = vld [vmem:[#allocation2 + $0x100] sm:$0xff] }
  0xb0   :  { %737 = vst.msk [vmem:[#allocation2 + $0x108] sm:$0xff] %vm21_vm0, %v672_v11  ;;  %v871_v34 = vmul.f32 %v1645_v45, %v803_v29  ;;  %v819_v35 = vld [vmem:[#allocation2 + $0x180] sm:$0xff]  ;;  %v1051_v57 = vpack.c.bf16 %v987_v48, %v987_v48 }
  0xb1   :  { %1100 = vst.msk [vmem:[%s2188_s4] sm:$0xf] %vm1099_vm1, %v1035_v60  ;;  %v887_v40 = vmul.f32 %v1645_v45, %v819_v35  ;;  %v772_v41 = vld [vmem:[#allocation2 + $0x8] sm:$0xff] }
  0xb2   :  { %753 = vst.msk [vmem:[#allocation2 + $0x188] sm:$0xff] %vm21_vm0, %v688_v15  ;;  %v939_v43 = vadd.f32 %v1654_v50, %v871_v34  ;;  %v840_v44 = vmul.f32 %v1645_v45, %v772_v41  ;;  %v788_v46 = vld [vmem:[#allocation2 + $0x88] sm:$0xff] }
  0xb3   :  { %706 = vst.msk [vmem:[#allocation2 + $0x10] sm:$0xff] %vm21_vm0, %v641_v17  ;;  %v955_v49 = vadd.f32 %v1654_v50, %v887_v40  ;;  %v856_v51 = vmul.f32 %v1645_v45, %v788_v46 }
  0xb4   :  { %722 = vst.msk [vmem:[#allocation2 + $0x90] sm:$0xff] %vm21_vm0, %v657_v19  ;;  %v1003_v53 = vmax.f32 %v939_v43, 0.0  ;;  %v908_v54 = vadd.f32 %v1654_v50, %v840_v44 }
  0xb5   :  { %v564_v9 = vpop.f32.mrf.mxu2  ;;  %v604_v10 = vpop.f32.mrf.mxu3  ;;  %v1019_v58 = vmax.f32 %v955_v49, 0.0  ;;  %v924_v59 = vadd.f32 %v1654_v50, %v856_v51  ;;  %1116 = vst.msk [vmem:[%s2188_s4 + $0x40] sm:$0xf] %vm1099_vm1, %v1051_v57  ;;  %v106_v57 = vld [vmem:[#allocation2 + $0xa0] sm:$0xff] }
  0xb6   :  { %v486_v13 = vpop.f32.mrf.mxu0  ;;  %v526_v14 = vpop.f32.mrf.mxu1  ;;  %v673_v21 = vadd.f32 %v564_v9, %v120_v16  ;;  %v689_v23 = vadd.f32 %v604_v10, %v136_v18  ;;  %v1067_v62 = vpack.c.bf16 %v1003_v53, %v1003_v53  ;;  %v972_v63 = vmax.f32 %v908_v54, 0.0 }
  0xb7   :  { %v642_v26 = vadd.f32 %v486_v13, %v89_v20  ;;  %v658_v30 = vadd.f32 %v526_v14, %v105_v22  ;;  %v804_v52 = vld [vmem:[#allocation2 + $0x108] sm:$0xff]  ;;  %v1083_v3 = vpack.c.bf16 %v1019_v58, %v1019_v58  ;;  %v988_v4 = vmax.f32 %v924_v59, 0.0 }
  0xb8   :  { %738 = vst.msk [vmem:[#allocation2 + $0x110] sm:$0xff] %vm21_vm0, %v673_v21  ;;  %v872_v55 = vmul.f32 %v1645_v45, %v804_v52  ;;  %v1036_v10 = vpack.c.bf16 %v972_v63, %v972_v63 }
  0xb9   :  { %754 = vst.msk [vmem:[#allocation2 + $0x190] sm:$0xff] %vm21_vm0, %v689_v23  ;;  %v820_v56 = vld [vmem:[#allocation2 + $0x188] sm:$0xff]  ;;  %v1052_v17 = vpack.c.bf16 %v988_v4, %v988_v4 }
  0xba   :  { %707 = vst.msk [vmem:[#allocation2 + $0x18] sm:$0xff] %vm21_vm0, %v642_v26  ;;  %v888_v60 = vmul.f32 %v1645_v45, %v820_v56  ;;  %v773_v61 = vld [vmem:[#allocation2 + $0x10] sm:$0xff]  ;;  %v940_v0 = vadd.f32 %v1654_v50, %v872_v55  ;;  %v91_v4 = vld [vmem:[#allocation2 + $0x28] sm:$0xff] }
  0xbb   :  { %723 = vst.msk [vmem:[#allocation2 + $0x98] sm:$0xff] %vm21_vm0, %v658_v30  ;;  %v841_v1 = vmul.f32 %v1645_v45, %v773_v61  ;;  %v789_v2 = vld [vmem:[#allocation2 + $0x90] sm:$0xff] }
  0xbc   :  { %v956_v5 = vadd.f32 %v1654_v50, %v888_v60  ;;  %v857_v6 = vmul.f32 %v1645_v45, %v789_v2  ;;  %1132 = vst.msk [vmem:[%s2188_s4 + $0x80] sm:$0xf] %vm1099_vm1, %v1067_v62  ;;  %v1004_v11 = vmax.f32 %v940_v0, 0.0  ;;  %v122_v62 = vld [vmem:[#allocation2 + $0x120] sm:$0xff] }
  0xbd   :  { %v566_v31 = vpop.f32.mrf.mxu2  ;;  %v606_v32 = vpop.f32.mrf.mxu3  ;;  %v909_v12 = vadd.f32 %v1654_v50, %v841_v1  ;;  %1148 = vst.msk [vmem:[%s2188_s4 + $0xc0] sm:$0xf] %vm1099_vm1, %v1083_v3  ;;  %v138_v1 = vld [vmem:[#allocation2 + $0x1a0] sm:$0xff] }
  0xbe   :  { %v674_v36 = vadd.f32 %v566_v31, %v121_v24  ;;  %v489_v37 = vpop.f32.mrf.mxu0  ;;  %v1700_v38 = vpop.f32.mrf.mxu1  ;;  %v690_v42 = vadd.f32 %v606_v32, %v137_v27  ;;  %v1020_v18 = vmax.f32 %v956_v5, 0.0  ;;  %v925_v19 = vadd.f32 %v1654_v50, %v857_v6  ;;  %1101 = vst.msk [vmem:[%s2188_s4 + $0x4] sm:$0xf] %vm1099_vm1, %v1036_v10 }
  0xbf   :  { %v643_v47 = vadd.f32 %v489_v37, %v90_v33  ;;  %v805_v7 = vld [vmem:[#allocation2 + $0x110] sm:$0xff]  ;;  %v1068_v22 = vpack.c.bf16 %v1004_v11, %v1004_v11  ;;  %v973_v23 = vmax.f32 %v909_v12, 0.0  ;;  %1117 = vst.msk [vmem:[%s2188_s4 + $0x44] sm:$0xf] %vm1099_vm1, %v1052_v17  ;;  %v659_v3 = vadd.f32 %v1700_v38, %v106_v57  ;;  %v123_v11 = vld [vmem:[#allocation2 + $0x128] sm:$0xff] }
  0xc0   :  { %739 = vst.msk [vmem:[#allocation2 + $0x118] sm:$0xff] %vm21_vm0, %v674_v36  ;;  %v873_v13 = vmul.f32 %v1645_v45, %v805_v7  ;;  %v821_v14 = vld [vmem:[#allocation2 + $0x190] sm:$0xff]  ;;  %v1084_v27 = vpack.c.bf16 %v1020_v18, %v1020_v18  ;;  %v989_v28 = vmax.f32 %v925_v19, 0.0  ;;  %v107_v7 = vld [vmem:[#allocation2 + $0xa8] sm:$0xff] }
  0xc1   :  { %755 = vst.msk [vmem:[#allocation2 + $0x198] sm:$0xff] %vm21_vm0, %v690_v42  ;;  %v889_v20 = vmul.f32 %v1645_v45, %v821_v14  ;;  %v774_v21 = vld [vmem:[#allocation2 + $0x18] sm:$0xff]  ;;  %v1037_v32 = vpack.c.bf16 %v973_v23, %v973_v23  ;;  %v139_v12 = vld [vmem:[#allocation2 + $0x1a8] sm:$0xff]  ;;  %v140_v23 = vld [vmem:[#allocation2 + $0x1b0] sm:$0xff] }
  0xc2   :  { %708 = vst.msk [vmem:[#allocation2 + $0x20] sm:$0xff] %vm21_vm0, %v643_v47  ;;  %v941_v24 = vadd.f32 %v1654_v50, %v873_v13  ;;  %v842_v25 = vmul.f32 %v1645_v45, %v774_v21  ;;  %v790_v26 = vld [vmem:[#allocation2 + $0x98] sm:$0xff]  ;;  %v1053_v37 = vpack.c.bf16 %v989_v28, %v989_v28  ;;  %v92_v13 = vld [vmem:[#allocation2 + $0x30] sm:$0xff] }
  0xc3   :  { %v957_v29 = vadd.f32 %v1654_v50, %v889_v20  ;;  %v858_v30 = vmul.f32 %v1645_v45, %v790_v26  ;;  %1133 = vst.msk [vmem:[%s2188_s4 + $0x84] sm:$0xf] %vm1099_vm1, %v1068_v22  ;;  %v124_v22 = vld [vmem:[#allocation2 + $0x130] sm:$0xff]  ;;  %v109_v26 = vld [vmem:[#allocation2 + $0xb8] sm:$0xff] }
  0xc4   :  { %v1005_v33 = vmax.f32 %v941_v24, 0.0  ;;  %v910_v34 = vadd.f32 %v1654_v50, %v842_v25  ;;  %1149 = vst.msk [vmem:[%s2188_s4 + $0xc4] sm:$0xf] %vm1099_vm1, %v1084_v27  ;;  %v93_v24 = vld [vmem:[#allocation2 + $0x38] sm:$0xff] }
  0xc5   :  { %v1726_v8 = vpop.f32.mrf.mxu2  ;;  %v1728_v9 = vpop.f32.mrf.mxu3  ;;  %v1021_v39 = vmax.f32 %v957_v29, 0.0  ;;  %v926_v40 = vadd.f32 %v1654_v50, %v858_v30  ;;  %1102 = vst.msk [vmem:[%s2188_s4 + $0x8] sm:$0xf] %vm1099_vm1, %v1037_v32  ;;  %v125_v28 = vld [vmem:[#allocation2 + $0x138] sm:$0xff] }
  0xc6   :  { %v1736_v15 = vpop.f32.mrf.mxu0  ;;  %v1738_v16 = vpop.f32.mrf.mxu1  ;;  %v1069_v43 = vpack.c.bf16 %v1005_v33, %v1005_v33  ;;  %v974_v44 = vmax.f32 %v910_v34, 0.0  ;;  %1118 = vst.msk [vmem:[%s2188_s4 + $0x48] sm:$0xf] %vm1099_vm1, %v1053_v37  ;;  %v675_v6 = vadd.f32 %v1726_v8, %v122_v62  ;;  %v691_v10 = vadd.f32 %v1728_v9, %v138_v1  ;;  %v108_v9 = vld [vmem:[#allocation2 + $0xb0] sm:$0xff]  ;;  %v94_v37 = vld [vmem:[#allocation2 + $0x40] sm:$0xff] }
  0xc7   :  { %v806_v31 = vld [vmem:[#allocation2 + $0x118] sm:$0xff]  ;;  %v1085_v48 = vpack.c.bf16 %v1021_v39, %v1021_v39  ;;  %v990_v49 = vmax.f32 %v926_v40, 0.0  ;;  %v644_v38 = vadd.f32 %v1736_v15, %v91_v4  ;;  %724 = vst.msk [vmem:[#allocation2 + $0xa0] sm:$0xff] %vm21_vm0, %v659_v3  ;;  %v660_v8 = vadd.f32 %v1738_v16, %v107_v7 }
  0xc8   :  { %v874_v35 = vmul.f32 %v1645_v45, %v806_v31  ;;  %v822_v36 = vld [vmem:[#allocation2 + $0x198] sm:$0xff]  ;;  %1134 = vst.msk [vmem:[%s2188_s4 + $0x88] sm:$0xf] %vm1099_vm1, %v1069_v43  ;;  %v1038_v54 = vpack.c.bf16 %v974_v44, %v974_v44 }
  0xc9   :  { %v890_v41 = vmul.f32 %v1645_v45, %v822_v36  ;;  %v775_v42 = vld [vmem:[#allocation2 + $0x20] sm:$0xff]  ;;  %1150 = vst.msk [vmem:[%s2188_s4 + $0xc8] sm:$0xf] %vm1099_vm1, %v1085_v48  ;;  %v1054_v60 = vpack.c.bf16 %v990_v49, %v990_v49  ;;  %v141_v31 = vld [vmem:[#allocation2 + $0x1b8] sm:$0xff] }
  0xca   :  { %v942_v46 = vadd.f32 %v1654_v50, %v874_v35  ;;  %v843_v47 = vmul.f32 %v1645_v45, %v775_v42  ;;  %1103 = vst.msk [vmem:[%s2188_s4 + $0xc] sm:$0xf] %vm1099_vm1, %v1038_v54 }
  0xcb   :  { %v958_v51 = vadd.f32 %v1654_v50, %v890_v41  ;;  %1119 = vst.msk [vmem:[%s2188_s4 + $0x4c] sm:$0xf] %vm1099_vm1, %v1054_v60 }
  0xcc   :  { %v1006_v55 = vmax.f32 %v942_v46, 0.0  ;;  %v911_v56 = vadd.f32 %v1654_v50, %v843_v47  ;;  %740 = vst.msk [vmem:[#allocation2 + $0x120] sm:$0xff] %vm21_vm0, %v675_v6 }
  0xcd   :  { %v571_v52 = vpop.f32.mrf.mxu2  ;;  %v611_v53 = vpop.f32.mrf.mxu3  ;;  %v1022_v61 = vmax.f32 %v958_v51, 0.0  ;;  %756 = vst.msk [vmem:[#allocation2 + $0x1a0] sm:$0xff] %vm21_vm0, %v691_v10 }
  0xce   :  { %v494_v58 = vpop.f32.mrf.mxu0  ;;  %v534_v59 = vpop.f32.mrf.mxu1  ;;  %v1070_v63 = vpack.c.bf16 %v1006_v55, %v1006_v55  ;;  %v975_v0 = vmax.f32 %v911_v56, 0.0  ;;  %v676_v18 = vadd.f32 %v571_v52, %v123_v11  ;;  %v692_v21 = vadd.f32 %v611_v53, %v139_v12  ;;  %709 = vst.msk [vmem:[#allocation2 + $0x28] sm:$0xff] %vm21_vm0, %v644_v38  ;;  %v791_v29 = vld [vmem:[#allocation2 + $0xa0] sm:$0xff] }
  0xcf   :  { %v1086_v2 = vpack.c.bf16 %v1022_v61, %v1022_v61  ;;  %v645_v15 = vadd.f32 %v494_v58, %v92_v13  ;;  %725 = vst.msk [vmem:[#allocation2 + $0xa8] sm:$0xff] %vm21_vm0, %v660_v8  ;;  %v661_v16 = vadd.f32 %v534_v59, %v108_v9  ;;  %v859_v32 = vmul.f32 %v1645_v45, %v791_v29 }
  0xd0   :  { %1135 = vst.msk [vmem:[%s2188_s4 + $0x8c] sm:$0xf] %vm1099_vm1, %v1070_v63  ;;  %v1039_v5 = vpack.c.bf16 %v975_v0, %v975_v0 }
  0xd1   :  { %1151 = vst.msk [vmem:[%s2188_s4 + $0xcc] sm:$0xf] %vm1099_vm1, %v1086_v2  ;;  %v927_v44 = vadd.f32 %v1654_v50, %v859_v32 }
  0xd2   :  { %1104 = vst.msk [vmem:[%s2188_s4 + $0x10] sm:$0xf] %vm1099_vm1, %v1039_v5 }
  0xd3   :  { %741 = vst.msk [vmem:[#allocation2 + $0x128] sm:$0xff] %vm21_vm0, %v676_v18  ;;  %v807_v33 = vld [vmem:[#allocation2 + $0x120] sm:$0xff]  ;;  %v991_v54 = vmax.f32 %v927_v44, 0.0 }
  0xd4   :  { %757 = vst.msk [vmem:[#allocation2 + $0x1a8] sm:$0xff] %vm21_vm0, %v692_v21  ;;  %v875_v39 = vmul.f32 %v1645_v45, %v807_v33  ;;  %v823_v40 = vld [vmem:[#allocation2 + $0x1a0] sm:$0xff] }
  0xd5   :  { %v574_v14 = vpop.f32.mrf.mxu2  ;;  %v614_v17 = vpop.f32.mrf.mxu3  ;;  %710 = vst.msk [vmem:[#allocation2 + $0x30] sm:$0xff] %vm21_vm0, %v645_v15  ;;  %v891_v46 = vmul.f32 %v1645_v45, %v823_v40  ;;  %v776_v47 = vld [vmem:[#allocation2 + $0x28] sm:$0xff]  ;;  %v1055_v62 = vpack.c.bf16 %v991_v54, %v991_v54 }
  0xd6   :  { %v496_v19 = vpop.f32.mrf.mxu0  ;;  %v536_v20 = vpop.f32.mrf.mxu1  ;;  %v677_v25 = vadd.f32 %v574_v14, %v124_v22  ;;  %v693_v27 = vadd.f32 %v614_v17, %v140_v23  ;;  %726 = vst.msk [vmem:[#allocation2 + $0xb0] sm:$0xff] %vm21_vm0, %v661_v16  ;;  %v943_v49 = vadd.f32 %v1654_v50, %v875_v39  ;;  %v844_v51 = vmul.f32 %v1645_v45, %v776_v47  ;;  %v792_v52 = vld [vmem:[#allocation2 + $0xa8] sm:$0xff] }
  0xd7   :  { %v646_v30 = vadd.f32 %v496_v19, %v93_v24  ;;  %v662_v34 = vadd.f32 %v536_v20, %v109_v26  ;;  %v959_v55 = vadd.f32 %v1654_v50, %v891_v46  ;;  %v860_v56 = vmul.f32 %v1645_v45, %v792_v52  ;;  %1120 = vst.msk [vmem:[%s2188_s4 + $0x50] sm:$0xf] %vm1099_vm1, %v1055_v62  ;;  %v110_v62 = vld [vmem:[#allocation2 + $0xc0] sm:$0xff] }
  0xd8   :  { %742 = vst.msk [vmem:[#allocation2 + $0x130] sm:$0xff] %vm21_vm0, %v677_v25  ;;  %v1007_v58 = vmax.f32 %v943_v49, 0.0  ;;  %v912_v59 = vadd.f32 %v1654_v50, %v844_v51 }
  0xd9   :  { %758 = vst.msk [vmem:[#allocation2 + $0x1b0] sm:$0xff] %vm21_vm0, %v693_v27  ;;  %v1023_v63 = vmax.f32 %v959_v55, 0.0  ;;  %v928_v0 = vadd.f32 %v1654_v50, %v860_v56 }
  0xda   :  { %711 = vst.msk [vmem:[#allocation2 + $0x38] sm:$0xff] %vm21_vm0, %v646_v30  ;;  %v808_v57 = vld [vmem:[#allocation2 + $0x128] sm:$0xff]  ;;  %v1071_v3 = vpack.c.bf16 %v1007_v58, %v1007_v58  ;;  %v976_v4 = vmax.f32 %v912_v59, 0.0 }
  0xdb   :  { %727 = vst.msk [vmem:[#allocation2 + $0xb8] sm:$0xff] %vm21_vm0, %v662_v34  ;;  %v876_v60 = vmul.f32 %v1645_v45, %v808_v57  ;;  %v824_v61 = vld [vmem:[#allocation2 + $0x1a8] sm:$0xff]  ;;  %v1087_v10 = vpack.c.bf16 %v1023_v63, %v1023_v63  ;;  %v992_v11 = vmax.f32 %v928_v0, 0.0 }
  0xdc   :  { %v892_v1 = vmul.f32 %v1645_v45, %v824_v61  ;;  %v777_v2 = vld [vmem:[#allocation2 + $0x30] sm:$0xff]  ;;  %1136 = vst.msk [vmem:[%s2188_s4 + $0x90] sm:$0xf] %vm1099_vm1, %v1071_v3  ;;  %v1040_v17 = vpack.c.bf16 %v976_v4, %v976_v4  ;;  %v126_v3 = vld [vmem:[#allocation2 + $0x140] sm:$0xff] }
  0xdd   :  { %v576_v35 = vpop.f32.mrf.mxu2  ;;  %v616_v36 = vpop.f32.mrf.mxu3  ;;  %v944_v5 = vadd.f32 %v1654_v50, %v876_v60  ;;  %v845_v6 = vmul.f32 %v1645_v45, %v777_v2  ;;  %v793_v7 = vld [vmem:[#allocation2 + $0xb0] sm:$0xff]  ;;  %1152 = vst.msk [vmem:[%s2188_s4 + $0xd0] sm:$0xf] %vm1099_vm1, %v1087_v10  ;;  %v1056_v15 = vpack.c.bf16 %v992_v11, %v992_v11  ;;  %v95_v11 = vld [vmem:[#allocation2 + $0x48] sm:$0xff] }
  0xde   :  { %v678_v41 = vadd.f32 %v576_v35, %v125_v28  ;;  %v499_v42 = vpop.f32.mrf.mxu0  ;;  %v1827_v43 = vpop.f32.mrf.mxu1  ;;  %v694_v48 = vadd.f32 %v616_v36, %v141_v31  ;;  %v960_v38 = vadd.f32 %v1654_v50, %v892_v1  ;;  %v861_v12 = vmul.f32 %v1645_v45, %v793_v7  ;;  %1105 = vst.msk [vmem:[%s2188_s4 + $0x14] sm:$0xf] %vm1099_vm1, %v1040_v17 }
  0xdf   :  { %v647_v53 = vadd.f32 %v499_v42, %v94_v37  ;;  %v809_v8 = vld [vmem:[#allocation2 + $0x130] sm:$0xff]  ;;  %v1008_v18 = vmax.f32 %v944_v5, 0.0  ;;  %v913_v9 = vadd.f32 %v1654_v50, %v845_v6  ;;  %1121 = vst.msk [vmem:[%s2188_s4 + $0x54] sm:$0xf] %vm1099_vm1, %v1056_v15  ;;  %v142_v6 = vld [vmem:[#allocation2 + $0x1c0] sm:$0xff]  ;;  %v663_v10 = vadd.f32 %v1827_v43, %v110_v62 }
  0xe0   :  { %743 = vst.msk [vmem:[#allocation2 + $0x138] sm:$0xff] %vm21_vm0, %v678_v41  ;;  %v877_v19 = vmul.f32 %v1645_v45, %v809_v8  ;;  %v825_v20 = vld [vmem:[#allocation2 + $0x1b0] sm:$0xff]  ;;  %v1024_v23 = vmax.f32 %v960_v38, 0.0  ;;  %v929_v16 = vadd.f32 %v1654_v50, %v861_v12  ;;  %v111_v8 = vld [vmem:[#allocation2 + $0xc8] sm:$0xff] }
  0xe1   :  { %759 = vst.msk [vmem:[#allocation2 + $0x1b8] sm:$0xff] %vm21_vm0, %v694_v48  ;;  %v893_v24 = vmul.f32 %v1645_v45, %v825_v20  ;;  %v778_v25 = vld [vmem:[#allocation2 + $0x38] sm:$0xff]  ;;  %v1072_v26 = vpack.c.bf16 %v1008_v18, %v1008_v18  ;;  %v977_v27 = vmax.f32 %v913_v9, 0.0  ;;  %v127_v18 = vld [vmem:[#allocation2 + $0x148] sm:$0xff] }
  0xe2   :  { %712 = vst.msk [vmem:[#allocation2 + $0x40] sm:$0xff] %vm21_vm0, %v647_v53  ;;  %v945_v28 = vadd.f32 %v1654_v50, %v877_v19  ;;  %v846_v29 = vmul.f32 %v1645_v45, %v778_v25  ;;  %v794_v30 = vld [vmem:[#allocation2 + $0xb8] sm:$0xff]  ;;  %v1088_v31 = vpack.c.bf16 %v1024_v23, %v1024_v23  ;;  %v993_v32 = vmax.f32 %v929_v16, 0.0  ;;  %v143_v9 = vld [vmem:[#allocation2 + $0x1c8] sm:$0xff]  ;;  %v96_v19 = vld [vmem:[#allocation2 + $0x50] sm:$0xff] }
  0xe3   :  { %v961_v33 = vadd.f32 %v1654_v50, %v893_v24  ;;  %v862_v34 = vmul.f32 %v1645_v45, %v794_v30  ;;  %1137 = vst.msk [vmem:[%s2188_s4 + $0x94] sm:$0xf] %vm1099_vm1, %v1072_v26  ;;  %v1041_v36 = vpack.c.bf16 %v977_v27, %v977_v27  ;;  %v128_v26 = vld [vmem:[#allocation2 + $0x150] sm:$0xff]  ;;  %v113_v30 = vld [vmem:[#allocation2 + $0xd8] sm:$0xff] }
  0xe4   :  { %v1009_v37 = vmax.f32 %v945_v28, 0.0  ;;  %v914_v39 = vadd.f32 %v1654_v50, %v846_v29  ;;  %1153 = vst.msk [vmem:[%s2188_s4 + $0xd4] sm:$0xf] %vm1099_vm1, %v1088_v31  ;;  %v1057_v42 = vpack.c.bf16 %v993_v32, %v993_v32  ;;  %v144_v27 = vld [vmem:[#allocation2 + $0x1d0] sm:$0xff]  ;;  %v97_v28 = vld [vmem:[#allocation2 + $0x58] sm:$0xff] }
  0xe5   :  { %v1853_v13 = vpop.f32.mrf.mxu2  ;;  %v1855_v14 = vpop.f32.mrf.mxu3  ;;  %v1025_v44 = vmax.f32 %v961_v33, 0.0  ;;  %v930_v46 = vadd.f32 %v1654_v50, %v862_v34  ;;  %1106 = vst.msk [vmem:[%s2188_s4 + $0x18] sm:$0xf] %vm1099_vm1, %v1041_v36  ;;  %v129_v32 = vld [vmem:[#allocation2 + $0x158] sm:$0xff] }
  0xe6   :  { %v1863_v21 = vpop.f32.mrf.mxu0  ;;  %v1865_v22 = vpop.f32.mrf.mxu1  ;;  %v1073_v49 = vpack.c.bf16 %v1009_v37, %v1009_v37  ;;  %v978_v51 = vmax.f32 %v914_v39, 0.0  ;;  %1122 = vst.msk [vmem:[%s2188_s4 + $0x58] sm:$0xf] %vm1099_vm1, %v1057_v42  ;;  %v679_v12 = vadd.f32 %v1853_v13, %v126_v3  ;;  %v695_v17 = vadd.f32 %v1855_v14, %v142_v6  ;;  %v112_v14 = vld [vmem:[#allocation2 + $0xd0] sm:$0xff]  ;;  %v98_v42 = vld [vmem:[#allocation2 + $0x60] sm:$0xff] }
  0xe7   :  { %v810_v35 = vld [vmem:[#allocation2 + $0x138] sm:$0xff]  ;;  %v1089_v54 = vpack.c.bf16 %v1025_v44, %v1025_v44  ;;  %v994_v55 = vmax.f32 %v930_v46, 0.0  ;;  %v648_v43 = vadd.f32 %v1863_v21, %v95_v11  ;;  %728 = vst.msk [vmem:[#allocation2 + $0xc0] sm:$0xff] %vm21_vm0, %v663_v10  ;;  %v664_v13 = vadd.f32 %v1865_v22, %v111_v8 }
  0xe8   :  { %v878_v40 = vmul.f32 %v1645_v45, %v810_v35  ;;  %v826_v41 = vld [vmem:[#allocation2 + $0x1b8] sm:$0xff]  ;;  %1138 = vst.msk [vmem:[%s2188_s4 + $0x98] sm:$0xf] %vm1099_vm1, %v1073_v49  ;;  %v1042_v59 = vpack.c.bf16 %v978_v51, %v978_v51 }
  0xe9   :  { %v894_v47 = vmul.f32 %v1645_v45, %v826_v41  ;;  %v779_v48 = vld [vmem:[#allocation2 + $0x40] sm:$0xff]  ;;  %1154 = vst.msk [vmem:[%s2188_s4 + $0xd8] sm:$0xf] %vm1099_vm1, %v1089_v54  ;;  %v1058_v1 = vpack.c.bf16 %v994_v55, %v994_v55  ;;  %v145_v35 = vld [vmem:[#allocation2 + $0x1d8] sm:$0xff] }
  0xea   :  { %v946_v52 = vadd.f32 %v1654_v50, %v878_v40  ;;  %v847_v53 = vmul.f32 %v1645_v45, %v779_v48  ;;  %1107 = vst.msk [vmem:[%s2188_s4 + $0x1c] sm:$0xf] %vm1099_vm1, %v1042_v59 }
  0xeb   :  { %v962_v56 = vadd.f32 %v1654_v50, %v894_v47  ;;  %1123 = vst.msk [vmem:[%s2188_s4 + $0x5c] sm:$0xf] %vm1099_vm1, %v1058_v1 }
  0xec   :  { %v1010_v60 = vmax.f32 %v946_v52, 0.0  ;;  %v915_v61 = vadd.f32 %v1654_v50, %v847_v53  ;;  %744 = vst.msk [vmem:[#allocation2 + $0x140] sm:$0xff] %vm21_vm0, %v679_v12 }
  0xed   :  { %v581_v57 = vpop.f32.mrf.mxu2  ;;  %v621_v58 = vpop.f32.mrf.mxu3  ;;  %v1026_v2 = vmax.f32 %v962_v56, 0.0  ;;  %760 = vst.msk [vmem:[#allocation2 + $0x1c0] sm:$0xff] %vm21_vm0, %v695_v17 }
  0xee   :  { %v504_v63 = vpop.f32.mrf.mxu0  ;;  %v544_v0 = vpop.f32.mrf.mxu1  ;;  %v1074_v4 = vpack.c.bf16 %v1010_v60, %v1010_v60  ;;  %v979_v5 = vmax.f32 %v915_v61, 0.0  ;;  %v680_v23 = vadd.f32 %v581_v57, %v127_v18  ;;  %v696_v25 = vadd.f32 %v621_v58, %v143_v9  ;;  %713 = vst.msk [vmem:[#allocation2 + $0x48] sm:$0xff] %vm21_vm0, %v648_v43  ;;  %v795_v33 = vld [vmem:[#allocation2 + $0xc0] sm:$0xff] }
  0xef   :  { %v1090_v7 = vpack.c.bf16 %v1026_v2, %v1026_v2  ;;  %v649_v21 = vadd.f32 %v504_v63, %v96_v19  ;;  %729 = vst.msk [vmem:[#allocation2 + $0xc8] sm:$0xff] %vm21_vm0, %v664_v13  ;;  %v665_v22 = vadd.f32 %v544_v0, %v112_v14  ;;  %v863_v36 = vmul.f32 %v1645_v45, %v795_v33 }
  0xf0   :  { %1139 = vst.msk [vmem:[%s2188_s4 + $0x9c] sm:$0xf] %vm1099_vm1, %v1074_v4  ;;  %v1043_v38 = vpack.c.bf16 %v979_v5, %v979_v5 }
  0xf1   :  { %1155 = vst.msk [vmem:[%s2188_s4 + $0xdc] sm:$0xf] %vm1099_vm1, %v1090_v7  ;;  %v931_v51 = vadd.f32 %v1654_v50, %v863_v36 }
  0xf2   :  { %1108 = vst.msk [vmem:[%s2188_s4 + $0x20] sm:$0xf] %vm1099_vm1, %v1043_v38 }
  0xf3   :  { %745 = vst.msk [vmem:[#allocation2 + $0x148] sm:$0xff] %vm21_vm0, %v680_v23  ;;  %v811_v37 = vld [vmem:[#allocation2 + $0x140] sm:$0xff]  ;;  %v995_v59 = vmax.f32 %v931_v51, 0.0 }
  0xf4   :  { %761 = vst.msk [vmem:[#allocation2 + $0x1c8] sm:$0xff] %vm21_vm0, %v696_v25  ;;  %v879_v44 = vmul.f32 %v1645_v45, %v811_v37  ;;  %v827_v46 = vld [vmem:[#allocation2 + $0x1c0] sm:$0xff] }
  0xf5   :  { %v584_v20 = vpop.f32.mrf.mxu2  ;;  %v624_v15 = vpop.f32.mrf.mxu3  ;;  %714 = vst.msk [vmem:[#allocation2 + $0x50] sm:$0xff] %vm21_vm0, %v649_v21  ;;  %v895_v52 = vmul.f32 %v1645_v45, %v827_v46  ;;  %v780_v53 = vld [vmem:[#allocation2 + $0x48] sm:$0xff]  ;;  %v1059_v3 = vpack.c.bf16 %v995_v59, %v995_v59 }
  0xf6   :  { %v506_v16 = vpop.f32.mrf.mxu0  ;;  %v546_v24 = vpop.f32.mrf.mxu1  ;;  %v681_v29 = vadd.f32 %v584_v20, %v128_v26  ;;  %v697_v31 = vadd.f32 %v624_v15, %v144_v27  ;;  %730 = vst.msk [vmem:[#allocation2 + $0xd0] sm:$0xff] %vm21_vm0, %v665_v22  ;;  %v947_v55 = vadd.f32 %v1654_v50, %v879_v44  ;;  %v848_v56 = vmul.f32 %v1645_v45, %v780_v53  ;;  %v796_v57 = vld [vmem:[#allocation2 + $0xc8] sm:$0xff] }
  0xf7   :  { %v650_v34 = vadd.f32 %v506_v16, %v97_v28  ;;  %v666_v39 = vadd.f32 %v546_v24, %v113_v30  ;;  %v963_v60 = vadd.f32 %v1654_v50, %v895_v52  ;;  %v864_v61 = vmul.f32 %v1645_v45, %v796_v57  ;;  %1124 = vst.msk [vmem:[%s2188_s4 + $0x60] sm:$0xf] %vm1099_vm1, %v1059_v3 }
  0xf8   :  { %746 = vst.msk [vmem:[#allocation2 + $0x150] sm:$0xff] %vm21_vm0, %v681_v29  ;;  %v1011_v63 = vmax.f32 %v947_v55, 0.0  ;;  %v916_v0 = vadd.f32 %v1654_v50, %v848_v56 }
  0xf9   :  { %762 = vst.msk [vmem:[#allocation2 + $0x1d0] sm:$0xff] %vm21_vm0, %v697_v31  ;;  %v1027_v4 = vmax.f32 %v963_v60, 0.0  ;;  %v932_v5 = vadd.f32 %v1654_v50, %v864_v61 }
  0xfa   :  { %715 = vst.msk [vmem:[#allocation2 + $0x58] sm:$0xff] %vm21_vm0, %v650_v34  ;;  %v812_v62 = vld [vmem:[#allocation2 + $0x148] sm:$0xff]  ;;  %v1075_v10 = vpack.c.bf16 %v1011_v63, %v1011_v63  ;;  %v980_v11 = vmax.f32 %v916_v0, 0.0 }
  0xfb   :  { %731 = vst.msk [vmem:[#allocation2 + $0xd8] sm:$0xff] %vm21_vm0, %v666_v39  ;;  %v880_v1 = vmul.f32 %v1645_v45, %v812_v62  ;;  %v828_v2 = vld [vmem:[#allocation2 + $0x1c8] sm:$0xff]  ;;  %v1091_v17 = vpack.c.bf16 %v1027_v4, %v1027_v4  ;;  %v996_v18 = vmax.f32 %v932_v5, 0.0  ;;  %v130_v5 = vld [vmem:[#allocation2 + $0x160] sm:$0xff] }
  0xfc   :  { %v896_v6 = vmul.f32 %v1645_v45, %v828_v2  ;;  %v781_v7 = vld [vmem:[#allocation2 + $0x50] sm:$0xff]  ;;  %1140 = vst.msk [vmem:[%s2188_s4 + $0xa0] sm:$0xf] %vm1099_vm1, %v1075_v10  ;;  %v1044_v15 = vpack.c.bf16 %v980_v11, %v980_v11  ;;  %v114_v2 = vld [vmem:[#allocation2 + $0xe0] sm:$0xff] }
  0xfd   :  { %v586_v40 = vpop.f32.mrf.mxu2  ;;  %v626_v41 = vpop.f32.mrf.mxu3  ;;  %v948_v38 = vadd.f32 %v1654_v50, %v880_v1  ;;  %v849_v12 = vmul.f32 %v1645_v45, %v781_v7  ;;  %v797_v8 = vld [vmem:[#allocation2 + $0xd0] sm:$0xff]  ;;  %1156 = vst.msk [vmem:[%s2188_s4 + $0xe0] sm:$0xf] %vm1099_vm1, %v1091_v17  ;;  %v1060_v21 = vpack.c.bf16 %v996_v18, %v996_v18  ;;  %v146_v11 = vld [vmem:[#allocation2 + $0x1e0] sm:$0xff] }
  0xfe   :  { %v682_v47 = vadd.f32 %v586_v40, %v129_v32  ;;  %v509_v48 = vpop.f32.mrf.mxu0  ;;  %v1954_v49 = vpop.f32.mrf.mxu1  ;;  %v698_v54 = vadd.f32 %v626_v41, %v145_v35  ;;  %v964_v43 = vadd.f32 %v1654_v50, %v896_v6  ;;  %v865_v9 = vmul.f32 %v1645_v45, %v797_v8  ;;  %1109 = vst.msk [vmem:[%s2188_s4 + $0x24] sm:$0xf] %vm1099_vm1, %v1044_v15  ;;  %v99_v8 = vld [vmem:[#allocation2 + $0x68] sm:$0xff] }
  0xff   :  { %v651_v58 = vadd.f32 %v509_v48, %v98_v42  ;;  %v813_v13 = vld [vmem:[#allocation2 + $0x150] sm:$0xff]  ;;  %v1012_v23 = vmax.f32 %v948_v38, 0.0  ;;  %v917_v14 = vadd.f32 %v1654_v50, %v849_v12  ;;  %1125 = vst.msk [vmem:[%s2188_s4 + $0x64] sm:$0xf] %vm1099_vm1, %v1060_v21  ;;  %v667_v12 = vadd.f32 %v1954_v49, %v114_v2  ;;  %v147_v15 = vld [vmem:[#allocation2 + $0x1e8] sm:$0xff] }
 0x100   :  { %747 = vst.msk [vmem:[#allocation2 + $0x158] sm:$0xff] %vm21_vm0, %v682_v47  ;;  %v881_v16 = vmul.f32 %v1645_v45, %v813_v13  ;;  %v829_v24 = vld [vmem:[#allocation2 + $0x1d0] sm:$0xff]  ;;  %v1028_v27 = vmax.f32 %v964_v43, 0.0  ;;  %v933_v22 = vadd.f32 %v1654_v50, %v865_v9  ;;  %v115_v43 = vld [vmem:[#allocation2 + $0xe8] sm:$0xff] }
 0x101   :  { %763 = vst.msk [vmem:[#allocation2 + $0x1d8] sm:$0xff] %vm21_vm0, %v698_v54  ;;  %v897_v28 = vmul.f32 %v1645_v45, %v829_v24  ;;  %v782_v29 = vld [vmem:[#allocation2 + $0x58] sm:$0xff]  ;;  %v1076_v30 = vpack.c.bf16 %v1012_v23, %v1012_v23  ;;  %v981_v31 = vmax.f32 %v917_v14, 0.0  ;;  %v131_v13 = vld [vmem:[#allocation2 + $0x168] sm:$0xff]  ;;  %v100_v23 = vld [vmem:[#allocation2 + $0x70] sm:$0xff] }
 0x102   :  { %716 = vst.msk [vmem:[#allocation2 + $0x60] sm:$0xff] %vm21_vm0, %v651_v58  ;;  %v949_v32 = vadd.f32 %v1654_v50, %v881_v16  ;;  %v850_v33 = vmul.f32 %v1645_v45, %v782_v29  ;;  %v798_v34 = vld [vmem:[#allocation2 + $0xd8] sm:$0xff]  ;;  %v1092_v35 = vpack.c.bf16 %v1028_v27, %v1028_v27  ;;  %v997_v36 = vmax.f32 %v933_v22, 0.0  ;;  %v132_v27 = vld [vmem:[#allocation2 + $0x170] sm:$0xff] }
 0x103   :  { %v965_v37 = vadd.f32 %v1654_v50, %v897_v28  ;;  %v866_v39 = vmul.f32 %v1645_v45, %v798_v34  ;;  %1141 = vst.msk [vmem:[%s2188_s4 + $0xa4] sm:$0xf] %vm1099_vm1, %v1076_v30  ;;  %v1045_v41 = vpack.c.bf16 %v981_v31, %v981_v31  ;;  %v101_v29 = vld [vmem:[#allocation2 + $0x78] sm:$0xff] }
 0x104   :  { %v1013_v42 = vmax.f32 %v949_v32, 0.0  ;;  %v918_v44 = vadd.f32 %v1654_v50, %v850_v33  ;;  %1157 = vst.msk [vmem:[%s2188_s4 + $0xe4] sm:$0xf] %vm1099_vm1, %v1092_v35  ;;  %v1061_v48 = vpack.c.bf16 %v997_v36, %v997_v36  ;;  %v117_v31 = vld [vmem:[#allocation2 + $0xf8] sm:$0xff] }
 0x105   :  { %v1980_v19 = vpop.f32.mrf.mxu2  ;;  %v1982_v20 = vpop.f32.mrf.mxu3  ;;  %v1029_v51 = vmax.f32 %v965_v37, 0.0  ;;  %v934_v52 = vadd.f32 %v1654_v50, %v866_v39  ;;  %1110 = vst.msk [vmem:[%s2188_s4 + $0x28] sm:$0xf] %vm1099_vm1, %v1045_v41  ;;  %v133_v34 = vld [vmem:[#allocation2 + $0x178] sm:$0xff]  ;;  %v2080_v39 = vld [vmem:[%s2185_s2] ss:$0 sm:$0xff] }
 0x106   :  { %v1990_v25 = vpop.f32.mrf.mxu0  ;;  %v1992_v26 = vpop.f32.mrf.mxu1  ;;  %v1077_v55 = vpack.c.bf16 %v1013_v42, %v1013_v42  ;;  %v982_v56 = vmax.f32 %v918_v44, 0.0  ;;  %1126 = vst.msk [vmem:[%s2188_s4 + $0x68] sm:$0xf] %vm1099_vm1, %v1061_v48  ;;  %v683_v18 = vadd.f32 %v1980_v19, %v130_v5  ;;  %v699_v9 = vadd.f32 %v1982_v20, %v146_v11  ;;  %v116_v20 = vld [vmem:[#allocation2 + $0xf0] sm:$0xff]  ;;  %v149_v37 = vld [vmem:[#allocation2 + $0x1f8] sm:$0xff] }
 0x107   :  { %v814_v40 = vld [vmem:[#allocation2 + $0x158] sm:$0xff]  ;;  %v1093_v59 = vpack.c.bf16 %v1029_v51, %v1029_v51  ;;  %v998_v60 = vmax.f32 %v934_v52, 0.0  ;;  %v652_v49 = vadd.f32 %v1990_v25, %v99_v8  ;;  %732 = vst.msk [vmem:[#allocation2 + $0xe0] sm:$0xff] %vm21_vm0, %v667_v12  ;;  %v668_v19 = vadd.f32 %v1992_v26, %v115_v43  ;;  %v148_v25 = vld [vmem:[#allocation2 + $0x1f0] sm:$0xff]  ;;  %v2089_v52 = vld [vmem:[%s2186_s3] ss:$0 sm:$0xff] }
 0x108   :  { %v882_v46 = vmul.f32 %v1645_v45, %v814_v40  ;;  %v830_v47 = vld [vmem:[#allocation2 + $0x1d8] sm:$0xff]  ;;  %1142 = vst.msk [vmem:[%s2188_s4 + $0xa8] sm:$0xf] %vm1099_vm1, %v1077_v55  ;;  %v1046_v0 = vpack.c.bf16 %v982_v56, %v982_v56 }
 0x109   :  { %v898_v53 = vmul.f32 %v1645_v45, %v830_v47  ;;  %v783_v54 = vld [vmem:[#allocation2 + $0x60] sm:$0xff]  ;;  %1158 = vst.msk [vmem:[%s2188_s4 + $0xe8] sm:$0xf] %vm1099_vm1, %v1093_v59  ;;  %v1062_v3 = vpack.c.bf16 %v998_v60, %v998_v60 }
 0x10a   :  { %v950_v57 = vadd.f32 %v1654_v50, %v882_v46  ;;  %v851_v58 = vmul.f32 %v1645_v45, %v783_v54  ;;  %1111 = vst.msk [vmem:[%s2188_s4 + $0x2c] sm:$0xf] %vm1099_vm1, %v1046_v0 }
 0x10b   :  { %v966_v61 = vadd.f32 %v1654_v50, %v898_v53  ;;  %1127 = vst.msk [vmem:[%s2188_s4 + $0x6c] sm:$0xf] %vm1099_vm1, %v1062_v3 }
 0x10c   :  { %v1014_v1 = vmax.f32 %v950_v57, 0.0  ;;  %v919_v45 = vadd.f32 %v1654_v50, %v851_v58  ;;  %748 = vst.msk [vmem:[#allocation2 + $0x160] sm:$0xff] %vm21_vm0, %v683_v18 }
 0x10d   :  { %v591_v62 = vpop.f32.mrf.mxu2  ;;  %v631_v63 = vpop.f32.mrf.mxu3  ;;  %v1030_v4 = vmax.f32 %v966_v61, 0.0  ;;  %764 = vst.msk [vmem:[#allocation2 + $0x1e0] sm:$0xff] %vm21_vm0, %v699_v9 }
 0x10e   :  { %v514_v6 = vpop.f32.mrf.mxu0  ;;  %v1078_v7 = vpack.c.bf16 %v1014_v1, %v1014_v1  ;;  %v983_v10 = vmax.f32 %v919_v45, 0.0  ;;  %v554_v38 = vpop.f32.mrf.mxu1  ;;  %v684_v24 = vadd.f32 %v591_v62, %v131_v13  ;;  %v700_v21 = vadd.f32 %v631_v63, %v147_v15  ;;  %717 = vst.msk [vmem:[#allocation2 + $0x68] sm:$0xff] %vm21_vm0, %v652_v49  ;;  %v799_v35 = vld [vmem:[#allocation2 + $0xe0] sm:$0xff] }
 0x10f   :  { %v1094_v50 = vpack.c.bf16 %v1030_v4, %v1030_v4  ;;  %v653_v22 = vadd.f32 %v514_v6, %v100_v23  ;;  %733 = vst.msk [vmem:[#allocation2 + $0xe8] sm:$0xff] %vm21_vm0, %v668_v19  ;;  %v669_v28 = vadd.f32 %v554_v38, %v116_v20  ;;  %v867_v40 = vmul.f32 %v2080_v39, %v799_v35 }
 0x110   :  { %1143 = vst.msk [vmem:[%s2188_s4 + $0xac] sm:$0xf] %vm1099_vm1, %v1078_v7  ;;  %v1047_v17 = vpack.c.bf16 %v983_v10, %v983_v10 }
 0x111   :  { %1159 = vst.msk [vmem:[%s2188_s4 + $0xec] sm:$0xf] %vm1099_vm1, %v1094_v50  ;;  %v935_v53 = vadd.f32 %v2089_v52, %v867_v40 }
 0x112   :  { %1112 = vst.msk [vmem:[%s2188_s4 + $0x30] sm:$0xf] %vm1099_vm1, %v1047_v17 }
 0x113   :  { %749 = vst.msk [vmem:[#allocation2 + $0x168] sm:$0xff] %vm21_vm0, %v684_v24  ;;  %v815_v41 = vld [vmem:[#allocation2 + $0x160] sm:$0xff]  ;;  %v999_v60 = vmax.f32 %v935_v53, 0.0 }
 0x114   :  { %765 = vst.msk [vmem:[#allocation2 + $0x1e8] sm:$0xff] %vm21_vm0, %v700_v21  ;;  %v883_v47 = vmul.f32 %v2080_v39, %v815_v41  ;;  %v831_v48 = vld [vmem:[#allocation2 + $0x1e0] sm:$0xff] }
 0x115   :  { %v594_v14 = vpop.f32.mrf.mxu2  ;;  %v634_v16 = vpop.f32.mrf.mxu3  ;;  %718 = vst.msk [vmem:[#allocation2 + $0x70] sm:$0xff] %vm21_vm0, %v653_v22  ;;  %v899_v54 = vmul.f32 %v2080_v39, %v831_v48  ;;  %v784_v55 = vld [vmem:[#allocation2 + $0x68] sm:$0xff]  ;;  %v1063_v3 = vpack.c.bf16 %v999_v60, %v999_v60 }
 0x116   :  { %v516_v26 = vpop.f32.mrf.mxu0  ;;  %v685_v30 = vadd.f32 %v594_v14, %v132_v27  ;;  %v556_v32 = vpop.f32.mrf.mxu1  ;;  %v701_v33 = vadd.f32 %v634_v16, %v148_v25  ;;  %734 = vst.msk [vmem:[#allocation2 + $0xf0] sm:$0xff] %vm21_vm0, %v669_v28  ;;  %v951_v57 = vadd.f32 %v2089_v52, %v883_v47  ;;  %v852_v58 = vmul.f32 %v2080_v39, %v784_v55  ;;  %v800_v59 = vld [vmem:[#allocation2 + $0xe8] sm:$0xff] }
 0x117   :  { %v654_v36 = vadd.f32 %v516_v26, %v101_v29  ;;  %v670_v42 = vadd.f32 %v556_v32, %v117_v31  ;;  %v967_v61 = vadd.f32 %v2089_v52, %v899_v54  ;;  %v868_v62 = vmul.f32 %v2080_v39, %v800_v59  ;;  %1128 = vst.msk [vmem:[%s2188_s4 + $0x70] sm:$0xf] %vm1099_vm1, %v1063_v3 }
 0x118   :  { %750 = vst.msk [vmem:[#allocation2 + $0x170] sm:$0xff] %vm21_vm0, %v685_v30  ;;  %v1015_v0 = vmax.f32 %v951_v57, 0.0  ;;  %v920_v1 = vadd.f32 %v2089_v52, %v852_v58 }
 0x119   :  { %766 = vst.msk [vmem:[#allocation2 + $0x1f0] sm:$0xff] %vm21_vm0, %v701_v33  ;;  %v1031_v4 = vmax.f32 %v967_v61, 0.0  ;;  %v936_v5 = vadd.f32 %v2089_v52, %v868_v62 }
 0x11a   :  { %719 = vst.msk [vmem:[#allocation2 + $0x78] sm:$0xff] %vm21_vm0, %v654_v36  ;;  %v816_v63 = vld [vmem:[#allocation2 + $0x168] sm:$0xff]  ;;  %v1079_v10 = vpack.c.bf16 %v1015_v0, %v1015_v0  ;;  %v984_v11 = vmax.f32 %v920_v1, 0.0 }
 0x11b   :  { %735 = vst.msk [vmem:[#allocation2 + $0xf8] sm:$0xff] %vm21_vm0, %v670_v42  ;;  %v884_v45 = vmul.f32 %v2080_v39, %v816_v63  ;;  %v832_v2 = vld [vmem:[#allocation2 + $0x1e8] sm:$0xff]  ;;  %v1095_v8 = vpack.c.bf16 %v1031_v4, %v1031_v4  ;;  %v1000_v17 = vmax.f32 %v936_v5, 0.0 }
 0x11c   :  { %v900_v6 = vmul.f32 %v2080_v39, %v832_v2  ;;  %v785_v7 = vld [vmem:[#allocation2 + $0x70] sm:$0xff]  ;;  %1144 = vst.msk [vmem:[%s2188_s4 + $0xb0] sm:$0xf] %vm1099_vm1, %v1079_v10  ;;  %v1048_v13 = vpack.c.bf16 %v984_v11, %v984_v11 }
 0x11d   :  { %v596_v44 = vpop.f32.mrf.mxu2  ;;  %v636_v46 = vpop.f32.mrf.mxu3  ;;  %v952_v38 = vadd.f32 %v2089_v52, %v884_v45  ;;  %v853_v50 = vmul.f32 %v2080_v39, %v785_v7  ;;  %v801_v12 = vld [vmem:[#allocation2 + $0xf0] sm:$0xff]  ;;  %1160 = vst.msk [vmem:[%s2188_s4 + $0xf0] sm:$0xf] %vm1099_vm1, %v1095_v8  ;;  %v1064_v14 = vpack.c.bf16 %v1000_v17, %v1000_v17 }
 0x11e   :  { %v686_v51 = vadd.f32 %v596_v44, %v133_v34  ;;  %v702_v56 = vadd.f32 %v636_v46, %v149_v37  ;;  %v968_v18 = vadd.f32 %v2089_v52, %v900_v6  ;;  %v869_v43 = vmul.f32 %v2080_v39, %v801_v12  ;;  %1113 = vst.msk [vmem:[%s2188_s4 + $0x34] sm:$0xf] %vm1099_vm1, %v1048_v13 }
 0x11f   :  { %v817_v9 = vld [vmem:[#allocation2 + $0x170] sm:$0xff]  ;;  %v1016_v49 = vmax.f32 %v952_v38, 0.0  ;;  %v921_v15 = vadd.f32 %v2089_v52, %v853_v50  ;;  %1129 = vst.msk [vmem:[%s2188_s4 + $0x74] sm:$0xf] %vm1099_vm1, %v1064_v14 }
 0x120   :  { %751 = vst.msk [vmem:[#allocation2 + $0x178] sm:$0xff] %vm21_vm0, %v686_v51  ;;  %v885_v19 = vmul.f32 %v2080_v39, %v817_v9  ;;  %v833_v23 = vld [vmem:[#allocation2 + $0x1f0] sm:$0xff]  ;;  %v1032_v16 = vmax.f32 %v968_v18, 0.0  ;;  %v937_v24 = vadd.f32 %v2089_v52, %v869_v43 }
 0x121   :  { %767 = vst.msk [vmem:[#allocation2 + $0x1f8] sm:$0xff] %vm21_vm0, %v702_v56  ;;  %v901_v20 = vmul.f32 %v2080_v39, %v833_v23  ;;  %v786_v21 = vld [vmem:[#allocation2 + $0x78] sm:$0xff]  ;;  %v1080_v27 = vpack.c.bf16 %v1016_v49, %v1016_v49  ;;  %v985_v22 = vmax.f32 %v921_v15, 0.0 }
 0x122   :  { %v953_v25 = vadd.f32 %v2089_v52, %v885_v19  ;;  %v854_v28 = vmul.f32 %v2080_v39, %v786_v21  ;;  %v802_v29 = vld [vmem:[#allocation2 + $0xf8] sm:$0xff]  ;;  %v1096_v26 = vpack.c.bf16 %v1032_v16, %v1032_v16  ;;  %v1001_v30 = vmax.f32 %v937_v24, 0.0 }
 0x123   :  { %v969_v31 = vadd.f32 %v2089_v52, %v901_v20  ;;  %v870_v32 = vmul.f32 %v2080_v39, %v802_v29  ;;  %1145 = vst.msk [vmem:[%s2188_s4 + $0xb4] sm:$0xf] %vm1099_vm1, %v1080_v27  ;;  %v1049_v34 = vpack.c.bf16 %v985_v22, %v985_v22 }
 0x124   :  { %v1017_v35 = vmax.f32 %v953_v25, 0.0  ;;  %v922_v36 = vadd.f32 %v2089_v52, %v854_v28  ;;  %1161 = vst.msk [vmem:[%s2188_s4 + $0xf4] sm:$0xf] %vm1099_vm1, %v1096_v26  ;;  %v1065_v41 = vpack.c.bf16 %v1001_v30, %v1001_v30 }
 0x125   :  { %v1033_v42 = vmax.f32 %v969_v31, 0.0  ;;  %v938_v44 = vadd.f32 %v2089_v52, %v870_v32  ;;  %1114 = vst.msk [vmem:[%s2188_s4 + $0x38] sm:$0xf] %vm1099_vm1, %v1049_v34 }
 0x126   :  { %v1081_v47 = vpack.c.bf16 %v1017_v35, %v1017_v35  ;;  %v986_v48 = vmax.f32 %v922_v36, 0.0  ;;  %1130 = vst.msk [vmem:[%s2188_s4 + $0x78] sm:$0xf] %vm1099_vm1, %v1065_v41 }
 0x127   :  { %v818_v33 = vld [vmem:[#allocation2 + $0x178] sm:$0xff]  ;;  %v1097_v53 = vpack.c.bf16 %v1033_v42, %v1033_v42  ;;  %v1002_v54 = vmax.f32 %v938_v44, 0.0 }
 0x128   :  { %v886_v37 = vmul.f32 %v2080_v39, %v818_v33  ;;  %v834_v40 = vld [vmem:[#allocation2 + $0x1f8] sm:$0xff]  ;;  %1146 = vst.msk [vmem:[%s2188_s4 + $0xb8] sm:$0xf] %vm1099_vm1, %v1081_v47 }
 0x129   :  { %v902_v46 = vmul.f32 %v2080_v39, %v834_v40  ;;  %v1050_v39 = vpack.c.bf16 %v986_v48, %v986_v48  ;;  %1162 = vst.msk [vmem:[%s2188_s4 + $0xf8] sm:$0xf] %vm1099_vm1, %v1097_v53  ;;  %v1066_v57 = vpack.c.bf16 %v1002_v54, %v1002_v54 }
 0x12a   :  { %v954_v51 = vadd.f32 %v2089_v52, %v886_v37 }
 0x12b   :  { %v970_v55 = vadd.f32 %v2089_v52, %v902_v46  ;;  %1115 = vst.msk [vmem:[%s2188_s4 + $0x3c] sm:$0xf] %vm1099_vm1, %v1050_v39 }
 0x12c   :  { %v1018_v56 = vmax.f32 %v954_v51, 0.0  ;;  %1131 = vst.msk [vmem:[%s2188_s4 + $0x7c] sm:$0xf] %vm1099_vm1, %v1066_v57 }
 0x12d   :  { %v1034_v58 = vmax.f32 %v970_v55, 0.0 }
 0x12e   :  { %v1082_v52 = vpack.c.bf16 %v1018_v56, %v1018_v56 }
 0x12f   :  { %v1098_v59 = vpack.c.bf16 %v1034_v58, %v1034_v58 }
 0x130   :  { %1147 = vst.msk [vmem:[%s2188_s4 + $0xbc] sm:$0xf] %vm1099_vm1, %v1082_v52 }
 0x131   :  { %1163 = vst.msk [vmem:[%s2188_s4 + $0xfc] sm:$0xf] %vm1099_vm1, %v1098_v59 }

// kernel: bottleneck_forward.5
= control target key start
LH: loop header
LB: loop body
LE: loop exit
PB: predicated region body
PF: predicated region fallthrough
CT: control target
= control target key end

     0   :  { %s2551_s15 = smov 0   ;;  %s2553_s16 = smov 0   ;;  %s3407_s0 = inlined_call_operand.vmem [shape: bf16[2,16,16,32], index: 0, kind: input, shape index: {}]   ;;  %s3408_s1 = inlined_call_operand.vmem [shape: bf16[3,3,32,32], index: 1, kind: input, shape index: {}]   ;;  %s3409_s2 = inlined_call_operand.vmem [shape: f32[1,32], index: 2, kind: input, shape index: {}]   ;;  %s3410_s3 = inlined_call_operand.vmem [shape: f32[1,32], index: 3, kind: input, shape index: {}]   ;;  %s3411_s4 = inlined_call_operand.vmem [shape: bf16[2,16,16,32], index: 4, kind: output, shape index: {}]  }
   0x1   :  { %s2555_s17 = smov 0   ;;  %s2557_s18 = smov 0  }
   0x2   :  { %s2559_s19 = smov 0  }
   0x3 LB: > { %s23_s20 = sadd.s32 1, %s2515_s17  ;;  %s26_s21 = sadd.s32 1, %s2519_s18  ;;  %s2523_s19 = sphi %s2559_s19, %s14_s19   ;;  %s2519_s18 = sphi %s2557_s18, %s3415_s18   ;;  %s2515_s17 = sphi %s2555_s17, %s3414_s17   ;;  %s2511_s16 = sphi %s2553_s16, %s3413_s16   ;;  %s2507_s15 = sphi %s2551_s15, %s3412_s15  }
   0x4   : > { %p24_p0 = scmp.ge.s32.totalorder %s23_s20, 2  ;;  %p2003_p1 = scmp.ge.s32.totalorder %s2523_s19, 1 }
   0x5   : > { %p176_p2 = scmp.lt.s32.totalorder %s2523_s19, 5 }
   0x6   : > { %s3417_s20 = smov (%p24_p0, %s23_s20), 0  ;;  %s3419_s21 = smov (!%p24_p0, %s26_s21), %s2519_s18 }
   0x7   : > { %p177_p3 = pnand %p2003_p1, %p176_p2  ;;  %p28_p4 = scmp.ge.s32.totalorder %s3419_s21, 2 }
   0x8   : > { %p207_p5 = scmp.lt.s32.totalorder (!%p177_p3), %s2511_s16, 1  ;;  %s2006_s22 = sshll.u32 (!%p177_p3), %s2507_s15, 3 }
   0x9   : > { %s3421_s21 = smov (%p28_p4, %s3419_s21), 0  ;;  %180 = sbr.rel (%p177_p3) target bundleno = 568 (0x238), region = 36 }
   0xa   : > { %p215_p6 = scmp.lt.s32.totalorder (!%p177_p3), %s2006_s22, 15  ;;  %p2010_p7 = scmp.ne.s32.totalorder (!%p177_p3), %s2507_s15, 0 }
   0xe   : > { %s3423_s16 = smov (!%p207_p5, %s2511_s16), 1  ;;  %s3425_s22 = smov (!%p215_p6, %s2006_s22), 15 }
   0xf   : > { %s2332_s23 = sshll.u32 %s3423_s16, 7  ;;  %s2008_s24 = sshll.u32 %s3423_s16, 5 }
  0x10   : > { %s2587_s27 = scalar_lea.vmem %s3407_s0, %s2332_s23  ;;  %s2007_s28 = sshll.u32 %s3425_s22, 1 }
  0x11   : > { %s219_s29 = sadd.s32 %s2008_s24, %s2007_s28  ;;  %227 = sbr.rel (%p2010_p7) target bundleno = 131 (0x83), region = 40 }
  0x12   : > { %s2009_s30 = sshll.u32 %s219_s29, 2 }
  0x13   : > { %s2592_s7 = scalar_lea.vmem %s3411_s4, %s2009_s30 }
  0x16   : > { %vm518_vm0 = vcmask 261120   ;;  %v2358_v0 = vld [vmem:[%s2587_s27] sm:$0xff]   ;;  %v2525_v1 = vmov 0.0   ;;  %v2421_v3 = vld [vmem:[%s2587_s27 + $0x8] sm:$0xff]   ;;  %vm324_vm1 = vcmask 1040384   ;;  %v2422_v7 = vld [vmem:[%s2587_s27 + $0x10] sm:$0xff]  }
  0x17   : > { %519 = vst.msk [vmem:[#allocation2] sm:$0xff] %vm518_vm0, %v2525_v1  ;;  %v2598_v2 = vunpack.c.l.bf16 %v2358_v0  ;;  %v2604_v4 = vunpack.c.h.bf16 %v2358_v0  ;;  %v2608_v6 = vunpack.c.l.bf16 %v2421_v3  ;;  %v2615_v9 = vunpack.c.h.bf16 %v2421_v3  ;;  %v2423_v13 = vld [vmem:[%s2587_s27 + $0x18] sm:$0xff]   ;;  %v2424_v20 = vld [vmem:[%s2587_s27 + $0x20] sm:$0xff]   ;;  %v2425_v27 = vld [vmem:[%s2587_s27 + $0x28] sm:$0xff]  }
  0x18   : > { %520 = vst.msk [vmem:[#allocation2 + $0x8] sm:$0xff] %vm518_vm0, %v2525_v1  ;;  %v2620_v12 = vunpack.c.l.bf16 %v2422_v7  ;;  %v2628_v16 = vunpack.c.h.bf16 %v2422_v7  ;;  %v2634_v19 = vunpack.c.l.bf16 %v2423_v13  ;;  %v2643_v23 = vunpack.c.h.bf16 %v2423_v13  ;;  %v2426_v34 = vld [vmem:[%s2587_s27 + $0x30] sm:$0xff]   ;;  %v2427_v41 = vld [vmem:[%s2587_s27 + $0x38] sm:$0xff]   ;;  %v2428_v48 = vld [vmem:[%s2587_s27 + $0x40] sm:$0xff]  }
  0x19   : > { %553 = vst.msk [vmem:[#allocation2 + $0x110] sm:$0xff] %vm518_vm0, %v2525_v1  ;;  %v325_v5 = vrot.slane %v2598_v2, 7  ;;  %v326_v8 = vrot.slane %v2604_v4, 7  ;;  %v328_v11 = vrot.slane %v2608_v6, 7  ;;  %v329_v15 = vrot.slane %v2615_v9, 7  ;;  %v2429_v55 = vld [vmem:[%s2587_s27 + $0x48] sm:$0xff]  }
  0x1a   : > { %554 = vst.msk [vmem:[#allocation2 + $0x118] sm:$0xff] %vm518_vm0, %v2525_v1  ;;  %v331_v18 = vrot.slane %v2620_v12, 7  ;;  %v332_v22 = vrot.slane %v2628_v16, 7  ;;  %v334_v25 = vrot.slane %v2634_v19, 7  ;;  %v2649_v26 = vunpack.c.l.bf16 %v2424_v20  ;;  %v2430_v62 = vld [vmem:[%s2587_s27 + $0x50] sm:$0xff]  }
  0x1b   : > { %556 = vst.msk [vmem:[#allocation2 + $0x120] sm:$0xff] %vm518_vm0, %v2525_v1  ;;  %v405_v10 = vsel %vm324_vm1, 0.0, %v325_v5  ;;  %v327_v14 = vsel %vm324_vm1, %v325_v5, %v326_v8  ;;  %v406_v17 = vsel %vm324_vm1, 0.0, %v328_v11  ;;  %v330_v21 = vsel %vm324_vm1, %v328_v11, %v329_v15  ;;  %v2431_v8 = vld [vmem:[%s2587_s27 + $0x58] sm:$0xff]  }
  0x1c   : > { %557 = vst.msk [vmem:[#allocation2 + $0x128] sm:$0xff] %vm518_vm0, %v2525_v1  ;;  %v407_v24 = vsel %vm324_vm1, 0.0, %v331_v18  ;;  %v333_v28 = vsel %vm324_vm1, %v331_v18, %v332_v22  ;;  %v335_v29 = vrot.slane %v2643_v23, 7  ;;  %v2658_v30 = vunpack.c.h.bf16 %v2424_v20  ;;  %v2432_v18 = vld [vmem:[%s2587_s27 + $0x60] sm:$0xff]  }
  0x1d   : > { %590 = vst.msk [vmem:[#allocation2 + $0x230] sm:$0xff] %vm518_vm0, %v2525_v1  ;;  %v408_v31 = vsel %vm324_vm1, 0.0, %v334_v25  ;;  %v337_v32 = vrot.slane %v2649_v26, 7  ;;  %v2664_v33 = vunpack.c.l.bf16 %v2425_v27  ;;  %v2673_v37 = vunpack.c.h.bf16 %v2425_v27 }
  0x1e   : > { %591 = vst.msk [vmem:[#allocation2 + $0x238] sm:$0xff] %vm518_vm0, %v2525_v1  ;;  %v336_v35 = vsel %vm324_vm1, %v334_v25, %v335_v29  ;;  %v338_v36 = vrot.slane %v2658_v30, 7  ;;  %v2679_v40 = vunpack.c.l.bf16 %v2426_v34  ;;  %v2688_v44 = vunpack.c.h.bf16 %v2426_v34 }
  0x1f   : > { %593 = vst.msk [vmem:[#allocation2 + $0x240] sm:$0xff] %vm518_vm0, %v2525_v1  ;;  %v409_v38 = vsel %vm324_vm1, 0.0, %v337_v32  ;;  %v340_v39 = vrot.slane %v2664_v33, 7  ;;  %v341_v43 = vrot.slane %v2673_v37, 7  ;;  %v2694_v47 = vunpack.c.l.bf16 %v2427_v41 }
  0x20   : > { %594 = vst.msk [vmem:[#allocation2 + $0x248] sm:$0xff] %vm518_vm0, %v2525_v1  ;;  %v339_v42 = vsel %vm324_vm1, %v337_v32, %v338_v36  ;;  %v343_v46 = vrot.slane %v2679_v40, 7  ;;  %v344_v50 = vrot.slane %v2688_v44, 7  ;;  %v2703_v51 = vunpack.c.h.bf16 %v2427_v41 }
  0x21   : > { %627 = vst.msk [vmem:[#allocation2 + $0x350] sm:$0xff] %vm518_vm0, %v2525_v1  ;;  %v410_v45 = vsel %vm324_vm1, 0.0, %v340_v39  ;;  %v342_v49 = vsel %vm324_vm1, %v340_v39, %v341_v43  ;;  %v346_v53 = vrot.slane %v2694_v47, 7  ;;  %v2709_v54 = vunpack.c.l.bf16 %v2428_v48 }
  0x22   : > { %628 = vst.msk [vmem:[#allocation2 + $0x358] sm:$0xff] %vm518_vm0, %v2525_v1  ;;  %v411_v52 = vsel %vm324_vm1, 0.0, %v343_v46  ;;  %v345_v56 = vsel %vm324_vm1, %v343_v46, %v344_v50  ;;  %v347_v57 = vrot.slane %v2703_v51, 7  ;;  %v2718_v58 = vunpack.c.h.bf16 %v2428_v48  ;;  %v2435_v48 = vld [vmem:[%s2587_s27 + $0x78] sm:$0xff]  }
  0x23   : > { %521 = vst.msk [vmem:[#allocation2 + $0x10] sm:$0xff] %vm518_vm0, %v405_v10  ;;  %v412_v59 = vsel %vm324_vm1, 0.0, %v346_v53  ;;  %v349_v60 = vrot.slane %v2709_v54, 7  ;;  %v2724_v61 = vunpack.c.l.bf16 %v2429_v55  ;;  %v2733_v1 = vunpack.c.h.bf16 %v2429_v55 }
  0x24   : > { %558 = vst.msk [vmem:[#allocation2 + $0x130] sm:$0xff] %vm518_vm0, %v2598_v2  ;;  %v348_v63 = vsel %vm324_vm1, %v346_v53, %v347_v57  ;;  %v350_v0 = vrot.slane %v2718_v58, 7  ;;  %v2739_v7 = vunpack.c.l.bf16 %v2430_v62  ;;  %v2748_v13 = vunpack.c.h.bf16 %v2430_v62 }
  0x25   : > { %559 = vst.msk [vmem:[#allocation2 + $0x138] sm:$0xff] %vm518_vm0, %v2604_v4  ;;  %v413_v3 = vsel %vm324_vm1, 0.0, %v349_v60  ;;  %v352_v5 = vrot.slane %v2724_v61, 7  ;;  %v353_v11 = vrot.slane %v2733_v1, 7  ;;  %v2763_v22 = vunpack.c.h.bf16 %v2431_v8 }
  0x26   : > { %522 = vst.msk [vmem:[#allocation2 + $0x18] sm:$0xff] %vm518_vm0, %v327_v14  ;;  %v351_v10 = vsel %vm324_vm1, %v349_v60, %v350_v0  ;;  %v355_v15 = vrot.slane %v2739_v7, 7  ;;  %v2769_v27 = vunpack.c.l.bf16 %v2432_v18  ;;  %v2778_v32 = vunpack.c.h.bf16 %v2432_v18 }
  0x27   : > { %523 = vst.msk [vmem:[#allocation2 + $0x20] sm:$0xff] %vm518_vm0, %v406_v17  ;;  %v414_v14 = vsel %vm324_vm1, 0.0, %v352_v5  ;;  %v2754_v17 = vunpack.c.l.bf16 %v2431_v8  ;;  %v354_v20 = vsel %vm324_vm1, %v352_v5, %v353_v11  ;;  %v2822_v60 = vunpack.c.h.bf16 %v2435_v48 }
  0x28   : > { %560 = vst.msk [vmem:[#allocation2 + $0x140] sm:$0xff] %vm518_vm0, %v2608_v6  ;;  %v362_v41 = vrot.slane %v2778_v32, 7  ;;  %v422_v8 = vrot.slane %v2598_v2, 1  ;;  %vm421_vm2 = vcmask 1046528   ;;  %v425_v11 = vrot.slane %v2608_v6, 1 }
  0x29   : > { %561 = vst.msk [vmem:[#allocation2 + $0x148] sm:$0xff] %vm518_vm0, %v2615_v9  ;;  %v358_v25 = vrot.slane %v2754_v17, 7  ;;  %v429_v18 = vrot.slane %v2628_v16, 1 }
  0x2a   : > { %524 = vst.msk [vmem:[#allocation2 + $0x28] sm:$0xff] %vm518_vm0, %v330_v21  ;;  %v356_v21 = vrot.slane %v2748_v13, 7 }
  0x2b   : > { %525 = vst.msk [vmem:[#allocation2 + $0x30] sm:$0xff] %vm518_vm0, %v407_v24  ;;  %v415_v24 = vsel %vm324_vm1, 0.0, %v355_v15  ;;  %v416_v34 = vsel %vm324_vm1, 0.0, %v358_v25 }
  0x2c   : > { %562 = vst.msk [vmem:[#allocation2 + $0x150] sm:$0xff] %vm518_vm0, %v2620_v12  ;;  %v357_v29 = vsel %vm324_vm1, %v355_v15, %v356_v21  ;;  %v432_v21 = vrot.slane %v2643_v23, 1 }
  0x2d   : > { %563 = vst.msk [vmem:[#allocation2 + $0x158] sm:$0xff] %vm518_vm0, %v2628_v16  ;;  %v434_v16 = vrot.slane %v2649_v26, 1 }
  0x2e   : > { %526 = vst.msk [vmem:[#allocation2 + $0x38] sm:$0xff] %vm518_vm0, %v333_v28  ;;  %v2433_v28 = vld [vmem:[%s2587_s27 + $0x68] sm:$0xff]  }
  0x2f   : > { %527 = vst.msk [vmem:[#allocation2 + $0x40] sm:$0xff] %vm518_vm0, %v408_v31  ;;  %v359_v31 = vrot.slane %v2763_v22, 7  ;;  %v2784_v36 = vunpack.c.l.bf16 %v2433_v28 }
  0x30   : > { %564 = vst.msk [vmem:[#allocation2 + $0x160] sm:$0xff] %vm518_vm0, %v2634_v19 }
  0x31   : > { %565 = vst.msk [vmem:[#allocation2 + $0x168] sm:$0xff] %vm518_vm0, %v2643_v23  ;;  %v360_v39 = vsel %vm324_vm1, %v358_v25, %v359_v31  ;;  %v435_v25 = vrot.slane %v2658_v30, 1  ;;  %v437_v23 = vrot.slane %v2664_v33, 1  ;;  %v505_v31 = vsel %vm421_vm2, %v432_v21, 0.0 }
  0x32   : > { %528 = vst.msk [vmem:[#allocation2 + $0x48] sm:$0xff] %vm518_vm0, %v336_v35  ;;  %v361_v35 = vrot.slane %v2769_v27, 7 }
  0x33   : > { %529 = vst.msk [vmem:[#allocation2 + $0x50] sm:$0xff] %vm518_vm0, %v409_v38  ;;  %v2434_v38 = vld [vmem:[%s2587_s27 + $0x70] sm:$0xff]  }
  0x34   : > { %566 = vst.msk [vmem:[#allocation2 + $0x170] sm:$0xff] %vm518_vm0, %v2649_v26  ;;  %v417_v43 = vsel %vm324_vm1, 0.0, %v361_v35  ;;  %v2799_v46 = vunpack.c.l.bf16 %v2434_v38  ;;  %v436_v26 = vsel %vm421_vm2, %v434_v16, %v435_v25 }
  0x35   : > { %567 = vst.msk [vmem:[#allocation2 + $0x178] sm:$0xff] %vm518_vm0, %v2658_v30  ;;  %v440_v30 = vrot.slane %v2679_v40, 1 }
  0x36   : > { %530 = vst.msk [vmem:[#allocation2 + $0x58] sm:$0xff] %vm518_vm0, %v339_v42  ;;  %v2793_v42 = vunpack.c.h.bf16 %v2433_v28  ;;  %v367_v55 = vrot.slane %v2799_v46, 7  ;;  %v504_v28 = vsel %vm421_vm2, %v429_v18, 0.0 }
  0x37   : > { %531 = vst.msk [vmem:[#allocation2 + $0x60] sm:$0xff] %vm518_vm0, %v410_v45  ;;  %v364_v45 = vrot.slane %v2784_v36, 7 }
  0x38   : > { %568 = vst.msk [vmem:[#allocation2 + $0x180] sm:$0xff] %vm518_vm0, %v2664_v33  ;;  %v365_v50 = vrot.slane %v2793_v42, 7  ;;  %v419_v62 = vsel %vm324_vm1, 0.0, %v367_v55 }
  0x39   : > { %569 = vst.msk [vmem:[#allocation2 + $0x188] sm:$0xff] %vm518_vm0, %v2673_v37  ;;  %v418_v53 = vsel %vm324_vm1, 0.0, %v364_v45 }
  0x3a   : > { %532 = vst.msk [vmem:[#allocation2 + $0x68] sm:$0xff] %vm518_vm0, %v342_v49  ;;  %v363_v49 = vsel %vm324_vm1, %v361_v35, %v362_v41  ;;  %v366_v57 = vsel %vm324_vm1, %v364_v45, %v365_v50  ;;  %v506_v35 = vsel %vm421_vm2, %v435_v25, 0.0  ;;  %v447_v41 = vrot.slane %v2718_v58, 1 }
  0x3b   : > { %533 = vst.msk [vmem:[#allocation2 + $0x70] sm:$0xff] %vm518_vm0, %v411_v52  ;;  %v2808_v52 = vunpack.c.h.bf16 %v2434_v38  ;;  %v444_v38 = vrot.slane %v2703_v51, 1  ;;  %v450_v45 = vrot.slane %v2733_v1, 1 }
  0x3c   : > { %570 = vst.msk [vmem:[#allocation2 + $0x190] sm:$0xff] %vm518_vm0, %v2679_v40  ;;  %v510_v50 = vsel %vm421_vm2, %v447_v41, 0.0 }
  0x3d   : > { %571 = vst.msk [vmem:[#allocation2 + $0x198] sm:$0xff] %vm518_vm0, %v2688_v44 }
  0x3e   : > { %534 = vst.msk [vmem:[#allocation2 + $0x78] sm:$0xff] %vm518_vm0, %v345_v56  ;;  %v2814_v56 = vunpack.c.l.bf16 %v2435_v48  ;;  %v509_v48 = vsel %vm421_vm2, %v444_v38, 0.0 }
  0x3f   : > { %535 = vst.msk [vmem:[#allocation2 + $0x80] sm:$0xff] %vm518_vm0, %v412_v59  ;;  %v368_v59 = vrot.slane %v2808_v52, 7 }
  0x40   : > { %572 = vst.msk [vmem:[#allocation2 + $0x1a0] sm:$0xff] %vm518_vm0, %v2694_v47 }
  0x41   : > { %573 = vst.msk [vmem:[#allocation2 + $0x1a8] sm:$0xff] %vm518_vm0, %v2703_v51  ;;  %v369_v0 = vsel %vm324_vm1, %v367_v55, %v368_v59  ;;  %v449_v51 = vrot.slane %v2724_v61, 1  ;;  %v511_v55 = vsel %vm421_vm2, %v450_v45, 0.0 }
  0x42   : > { %536 = vst.msk [vmem:[#allocation2 + $0x88] sm:$0xff] %vm518_vm0, %v348_v63  ;;  %v370_v63 = vrot.slane %v2814_v56, 7 }
  0x43   : > { %537 = vst.msk [vmem:[#allocation2 + $0x90] sm:$0xff] %vm518_vm0, %v413_v3  ;;  %v371_v3 = vrot.slane %v2822_v60, 7 }
  0x44   : > { %574 = vst.msk [vmem:[#allocation2 + $0x1b0] sm:$0xff] %vm518_vm0, %v2709_v54  ;;  %v420_v5 = vsel %vm324_vm1, 0.0, %v370_v63 }
  0x45   : > { %575 = vst.msk [vmem:[#allocation2 + $0x1b8] sm:$0xff] %vm518_vm0, %v2718_v58  ;;  %v372_v15 = vsel %vm324_vm1, %v370_v63, %v371_v3  ;;  %v452_v58 = vrot.slane %v2739_v7, 1 }
  0x46   : > { %538 = vst.msk [vmem:[#allocation2 + $0x98] sm:$0xff] %vm518_vm0, %v351_v10  ;;  %v423_v10 = vrot.slane %v2604_v4, 1  ;;  %v428_v4 = vrot.slane %v2620_v12, 1 }
  0x47   : > { %539 = vst.msk [vmem:[#allocation2 + $0xa0] sm:$0xff] %vm518_vm0, %v414_v14  ;;  %v426_v14 = vrot.slane %v2615_v9, 1 }
  0x48   : > { %576 = vst.msk [vmem:[#allocation2 + $0x1c0] sm:$0xff] %vm518_vm0, %v2724_v61  ;;  %v424_v2 = vsel %vm421_vm2, %v422_v8, %v423_v10  ;;  %v502_v6 = vsel %vm421_vm2, %v423_v10, 0.0  ;;  %v430_v12 = vsel %vm421_vm2, %v428_v4, %v429_v18  ;;  %v451_v61 = vsel %vm421_vm2, %v449_v51, %v450_v45 }
  0x49   : > { %577 = vst.msk [vmem:[#allocation2 + $0x1c8] sm:$0xff] %vm518_vm0, %v2733_v1  ;;  %v427_v9 = vsel %vm421_vm2, %v425_v11, %v426_v14  ;;  %v455_v1 = vrot.slane %v2754_v17, 1 }
  0x4a   : > { %540 = vst.msk [vmem:[#allocation2 + $0xa8] sm:$0xff] %vm518_vm0, %v354_v20  ;;  %v431_v20 = vrot.slane %v2634_v19, 1 }
  0x4b   : > { %541 = vst.msk [vmem:[#allocation2 + $0xb0] sm:$0xff] %vm518_vm0, %v415_v24  ;;  %v503_v24 = vsel %vm421_vm2, %v426_v14, 0.0 }
  0x4c   : > { %578 = vst.msk [vmem:[#allocation2 + $0x1d0] sm:$0xff] %vm518_vm0, %v2739_v7  ;;  %v433_v19 = vsel %vm421_vm2, %v431_v20, %v432_v21 }
  0x4d   : > { %579 = vst.msk [vmem:[#allocation2 + $0x1d8] sm:$0xff] %vm518_vm0, %v2748_v13 }
  0x4e   : > { %542 = vst.msk [vmem:[#allocation2 + $0xb8] sm:$0xff] %vm518_vm0, %v357_v29  ;;  %v438_v29 = vrot.slane %v2673_v37, 1  ;;  %v443_v37 = vrot.slane %v2694_v47, 1 }
  0x4f   : > { %543 = vst.msk [vmem:[#allocation2 + $0xc0] sm:$0xff] %vm518_vm0, %v416_v34  ;;  %v441_v34 = vrot.slane %v2688_v44, 1  ;;  %v446_v44 = vrot.slane %v2709_v54, 1 }
  0x50   : > { %580 = vst.msk [vmem:[#allocation2 + $0x1e0] sm:$0xff] %vm518_vm0, %v2754_v17  ;;  %v439_v33 = vsel %vm421_vm2, %v437_v23, %v438_v29  ;;  %v445_v47 = vsel %vm421_vm2, %v443_v37, %v444_v38 }
  0x51   : > { %581 = vst.msk [vmem:[#allocation2 + $0x1e8] sm:$0xff] %vm518_vm0, %v2763_v22  ;;  %v442_v40 = vsel %vm421_vm2, %v440_v30, %v441_v34  ;;  %v448_v54 = vsel %vm421_vm2, %v446_v44, %v447_v41 }
  0x52   : > { %544 = vst.msk [vmem:[#allocation2 + $0xc8] sm:$0xff] %vm518_vm0, %v360_v39  ;;  %v507_v39 = vsel %vm421_vm2, %v438_v29, 0.0 }
  0x53   : > { %545 = vst.msk [vmem:[#allocation2 + $0xd0] sm:$0xff] %vm518_vm0, %v417_v43  ;;  %v508_v43 = vsel %vm421_vm2, %v441_v34, 0.0 }
  0x54   : > { %582 = vst.msk [vmem:[#allocation2 + $0x1f0] sm:$0xff] %vm518_vm0, %v2769_v27 }
  0x55   : > { %583 = vst.msk [vmem:[#allocation2 + $0x1f8] sm:$0xff] %vm518_vm0, %v2778_v32 }
  0x56   : > { %546 = vst.msk [vmem:[#allocation2 + $0xd8] sm:$0xff] %vm518_vm0, %v363_v49  ;;  %v453_v49 = vrot.slane %v2748_v13, 1  ;;  %v458_v13 = vrot.slane %v2769_v27, 1 }
  0x57   : > { %547 = vst.msk [vmem:[#allocation2 + $0xe0] sm:$0xff] %vm518_vm0, %v418_v53  ;;  %v456_v53 = vrot.slane %v2763_v22, 1  ;;  %v461_v22 = vrot.slane %v2784_v36, 1 }
  0x58   : > { %584 = vst.msk [vmem:[#allocation2 + $0x200] sm:$0xff] %vm518_vm0, %v2784_v36  ;;  %v454_v7 = vsel %vm421_vm2, %v452_v58, %v453_v49  ;;  %v512_v59 = vsel %vm421_vm2, %v453_v49, 0.0 }
  0x59   : > { %585 = vst.msk [vmem:[#allocation2 + $0x208] sm:$0xff] %vm518_vm0, %v2793_v42  ;;  %v457_v17 = vsel %vm421_vm2, %v455_v1, %v456_v53  ;;  %v513_v63 = vsel %vm421_vm2, %v456_v53, 0.0 }
  0x5a   : > { %548 = vst.msk [vmem:[#allocation2 + $0xe8] sm:$0xff] %vm518_vm0, %v366_v57  ;;  %v459_v57 = vrot.slane %v2778_v32, 1  ;;  %v464_v32 = vrot.slane %v2799_v46, 1 }
  0x5b   : > { %549 = vst.msk [vmem:[#allocation2 + $0xf0] sm:$0xff] %vm518_vm0, %v419_v62  ;;  %v462_v62 = vrot.slane %v2793_v42, 1  ;;  %v467_v42 = vrot.slane %v2814_v56, 1 }
  0x5c   : > { %586 = vst.msk [vmem:[#allocation2 + $0x210] sm:$0xff] %vm518_vm0, %v2799_v46  ;;  %v460_v27 = vsel %vm421_vm2, %v458_v13, %v459_v57  ;;  %v514_v3 = vsel %vm421_vm2, %v459_v57, 0.0 }
  0x5d   : > { %587 = vst.msk [vmem:[#allocation2 + $0x218] sm:$0xff] %vm518_vm0, %v2808_v52  ;;  %v463_v36 = vsel %vm421_vm2, %v461_v22, %v462_v62  ;;  %v515_v8 = vsel %vm421_vm2, %v462_v62, 0.0 }
  0x5e   : > { %550 = vst.msk [vmem:[#allocation2 + $0xf8] sm:$0xff] %vm518_vm0, %v369_v0  ;;  %v465_v0 = vrot.slane %v2808_v52, 1 }
  0x5f   : > { %551 = vst.msk [vmem:[#allocation2 + $0x100] sm:$0xff] %vm518_vm0, %v420_v5  ;;  %v468_v5 = vrot.slane %v2822_v60, 1 }
  0x60   : > { %588 = vst.msk [vmem:[#allocation2 + $0x220] sm:$0xff] %vm518_vm0, %v2814_v56  ;;  %v466_v46 = vsel %vm421_vm2, %v464_v32, %v465_v0  ;;  %v516_v52 = vsel %vm421_vm2, %v465_v0, 0.0 }
  0x61   : > { %589 = vst.msk [vmem:[#allocation2 + $0x228] sm:$0xff] %vm518_vm0, %v2822_v60  ;;  %v469_v10 = vsel %vm421_vm2, %v467_v42, %v468_v5  ;;  %v517_v56 = vsel %vm421_vm2, %v468_v5, 0.0 }
  0x62   : > { %552 = vst.msk [vmem:[#allocation2 + $0x108] sm:$0xff] %vm518_vm0, %v372_v15 }
  0x63   : > { %595 = vst.msk [vmem:[#allocation2 + $0x250] sm:$0xff] %vm518_vm0, %v424_v2 }
  0x64   : > { %596 = vst.msk [vmem:[#allocation2 + $0x258] sm:$0xff] %vm518_vm0, %v502_v6 }
  0x65   : > { %597 = vst.msk [vmem:[#allocation2 + $0x260] sm:$0xff] %vm518_vm0, %v427_v9 }
  0x66   : > { %598 = vst.msk [vmem:[#allocation2 + $0x268] sm:$0xff] %vm518_vm0, %v503_v24 }
  0x67   : > { %599 = vst.msk [vmem:[#allocation2 + $0x270] sm:$0xff] %vm518_vm0, %v430_v12 }
  0x68   : > { %600 = vst.msk [vmem:[#allocation2 + $0x278] sm:$0xff] %vm518_vm0, %v504_v28 }
  0x69   : > { %601 = vst.msk [vmem:[#allocation2 + $0x280] sm:$0xff] %vm518_vm0, %v433_v19 }
  0x6a   : > { %602 = vst.msk [vmem:[#allocation2 + $0x288] sm:$0xff] %vm518_vm0, %v505_v31 }
  0x6b   : > { %603 = vst.msk [vmem:[#allocation2 + $0x290] sm:$0xff] %vm518_vm0, %v436_v26 }
  0x6c   : > { %604 = vst.msk [vmem:[#allocation2 + $0x298] sm:$0xff] %vm518_vm0, %v506_v35 }
  0x6d   : > { %605 = vst.msk [vmem:[#allocation2 + $0x2a0] sm:$0xff] %vm518_vm0, %v439_v33 }
  0x6e   : > { %606 = vst.msk [vmem:[#allocation2 + $0x2a8] sm:$0xff] %vm518_vm0, %v507_v39 }
  0x6f   : > { %607 = vst.msk [vmem:[#allocation2 + $0x2b0] sm:$0xff] %vm518_vm0, %v442_v40 }
  0x70   : > { %608 = vst.msk [vmem:[#allocation2 + $0x2b8] sm:$0xff] %vm518_vm0, %v508_v43 }
  0x71   : > { %609 = vst.msk [vmem:[#allocation2 + $0x2c0] sm:$0xff] %vm518_vm0, %v445_v47 }
  0x72   : > { %610 = vst.msk [vmem:[#allocation2 + $0x2c8] sm:$0xff] %vm518_vm0, %v509_v48 }
  0x73   : > { %611 = vst.msk [vmem:[#allocation2 + $0x2d0] sm:$0xff] %vm518_vm0, %v448_v54 }
  0x74   : > { %612 = vst.msk [vmem:[#allocation2 + $0x2d8] sm:$0xff] %vm518_vm0, %v510_v50 }
  0x75   : > { %613 = vst.msk [vmem:[#allocation2 + $0x2e0] sm:$0xff] %vm518_vm0, %v451_v61 }
  0x76   : > { %614 = vst.msk [vmem:[#allocation2 + $0x2e8] sm:$0xff] %vm518_vm0, %v511_v55 }
  0x77   : > { %615 = vst.msk [vmem:[#allocation2 + $0x2f0] sm:$0xff] %vm518_vm0, %v454_v7 }
  0x78   : > { %616 = vst.msk [vmem:[#allocation2 + $0x2f8] sm:$0xff] %vm518_vm0, %v512_v59 }
  0x79   : > { %617 = vst.msk [vmem:[#allocation2 + $0x300] sm:$0xff] %vm518_vm0, %v457_v17 }
  0x7a   : > { %618 = vst.msk [vmem:[#allocation2 + $0x308] sm:$0xff] %vm518_vm0, %v513_v63 }
  0x7b   : > { %619 = vst.msk [vmem:[#allocation2 + $0x310] sm:$0xff] %vm518_vm0, %v460_v27 }
  0x7c   : > { %620 = vst.msk [vmem:[#allocation2 + $0x318] sm:$0xff] %vm518_vm0, %v514_v3 }
  0x7d   : > { %621 = vst.msk [vmem:[#allocation2 + $0x320] sm:$0xff] %vm518_vm0, %v463_v36 }
  0x7e   : > { %622 = vst.msk [vmem:[#allocation2 + $0x328] sm:$0xff] %vm518_vm0, %v515_v8 }
  0x7f   : > { %623 = vst.msk [vmem:[#allocation2 + $0x330] sm:$0xff] %vm518_vm0, %v466_v46 }
  0x80   : > { %624 = vst.msk [vmem:[#allocation2 + $0x338] sm:$0xff] %vm518_vm0, %v516_v52 }
  0x81   : > { %625 = vst.msk [vmem:[#allocation2 + $0x340] sm:$0xff] %vm518_vm0, %v469_v10 }
  0x82   : > { %626 = vst.msk [vmem:[#allocation2 + $0x348] sm:$0xff] %vm518_vm0, %v517_v56 }
  0x83 PF: > { %v2336_v60 = vld [vmem:[%s3408_s1 + $0x18] sm:$0xff]  ;;  %s2011_s10 = sshll.u32 %s2507_s15, 7  ;;  %v2335_v11 = vld [vmem:[%s3408_s1 + $0x10] sm:$0xff]  ;;  %v2338_v4 = vld [vmem:[%s3408_s1 + $0x28] sm:$0xff]  ;;  %vm703_vm3 = vcmask 261120   ;;  %vm1860_vm4 = vcmask 257024  }
  0x84   : > { %2436 = vmatpush.bf16.msra.mxu1 %v2336_v60  ;;  %2437 = vmatpush.bf16.msra.mxu2 %v2336_v60  ;;  %s2950_s13 = scalar_lea.vmem [#allocation2], %s2011_s10  ;;  %v2341_v24 = vld [vmem:[%s3408_s1 + $0x38] sm:$0xff]  ;;  %v2334_v19 = vld [vmem:[%s3408_s1 + $0x8] sm:$0xff]  ;;  %v2337_v29 = vld [vmem:[%s3408_s1 + $0x20] sm:$0xff] }
  0x85   : > { %2438 = vmatpush.bf16.msra.mxu3 %v2336_v60  ;;  %734 = vmatpush.bf16.msra.mxu0 %v2336_v60  ;;  %v2344_v23 = vld [vmem:[%s3408_s1 + $0x48] sm:$0xff]  ;;  %v2340_v31 = vld [vmem:[%s3408_s1 + $0x30] sm:$0xff]  ;;  %v2333_v26 = vld [vmem:[%s3408_s1] sm:$0xff] }
  0x86   : > { %v2350_v30 = vld [vmem:[%s3408_s1 + $0x68] sm:$0xff]  ;;  %v2343_v34 = vld [vmem:[%s3408_s1 + $0x40] sm:$0xff]  ;;  %v2353_v35 = vld [vmem:[%s3408_s1 + $0x78] sm:$0xff] }
  0x87   : > { %v2347_v33 = vld [vmem:[%s3408_s1 + $0x58] sm:$0xff]  ;;  %v2356_v37 = vld [vmem:[%s3408_s1 + $0x88] sm:$0xff]  ;;  %v2349_v8 = vld [vmem:[%s3408_s1 + $0x60] sm:$0xff] }
  0x88   : > { %2439 = vmatpush.bf16.msra.mxu1 %v2335_v11  ;;  %2440 = vmatpush.bf16.msra.mxu2 %v2335_v11  ;;  %v2352_v46 = vld [vmem:[%s3408_s1 + $0x70] sm:$0xff]  ;;  %v2355_v10 = vld [vmem:[%s3408_s1 + $0x80] sm:$0xff] }
  0x89   : > { %v2017_v14 = vld [vmem:[%s2950_s13 + $0x140] sm:$0xff]  ;;  %v2018_v15 = vld [vmem:[%s2950_s13 + $0x148] sm:$0xff]  ;;  %2441 = vmatpush.bf16.msra.mxu3 %v2335_v11  ;;  %735 = vmatpush.bf16.msra.mxu0 %v2335_v11  ;;  %v2019_v38 = vld [vmem:[%s2950_s13 + $0x150] sm:$0xff] }
  0x8a   : > { %v2021_v2 = vld [vmem:[%s2950_s13 + $0x160] sm:$0xff]  ;;  %v2022_v18 = vld [vmem:[%s2950_s13 + $0x168] sm:$0xff]  ;;  %v2966_v12 = vpack.c.bf16 %v2018_v15, %v2017_v14  ;;  %v2020_v39 = vld [vmem:[%s2950_s13 + $0x158] sm:$0xff] }
  0x8b   : > { %v2025_v6 = vld [vmem:[%s2950_s13 + $0x180] sm:$0xff]  ;;  %v2026_v9 = vld [vmem:[%s2950_s13 + $0x188] sm:$0xff]  ;;  %v2968_v16 = vpack.c.bf16 %v2022_v18, %v2021_v2  ;;  %v2023_v40 = vld [vmem:[%s2950_s13 + $0x170] sm:$0xff]  ;;  %v3017_v45 = vpack.c.bf16 %v2020_v39, %v2019_v38 }
  0x8c   : > { %v2013_v20 = vld [vmem:[%s2950_s13 + $0x120] sm:$0xff]  ;;  %v2014_v21 = vld [vmem:[%s2950_s13 + $0x128] sm:$0xff]  ;;  %v2970_v25 = vpack.c.bf16 %v2026_v9, %v2025_v6  ;;  %935 = vmatpush.bf16.msrb.mxu2 %v2338_v4  ;;  %2043 = vmatmul.msk.bf16.vlgmr.msra.gmra.mxu1 %vm703_vm3, %v2966_v12  ;;  %v2024_v44 = vld [vmem:[%s2950_s13 + $0x178] sm:$0xff] }
  0x8d   : > { %v678_v28 = vpack.c.bf16 %v2014_v21, %v2013_v20  ;;  %1068 = vmatpush.bf16.msrb.mxu3 %v2341_v24  ;;  %2045 = vmatmul.msk.bf16.vlgmr.msra.gmra.mxu2 %vm703_vm3, %v2968_v16  ;;  %v2027_v41 = vld [vmem:[%s2950_s13 + $0x190] sm:$0xff]  ;;  %v2028_v43 = vld [vmem:[%s2950_s13 + $0x198] sm:$0xff]  ;;  %v3019_v48 = vpack.c.bf16 %v2024_v44, %v2023_v40  ;;  %v632_v49 = vld [vmem:[%s2950_s13] sm:$0xff] }
  0x8e   : > { %2047 = vmatmul.msk.bf16.vlgmr.msra.gmra.mxu3 %vm703_vm3, %v2970_v25  ;;  %819 = vmatpush.bf16.msrb.mxu1 %v2334_v19  ;;  %v2015_v47 = vld [vmem:[%s2950_s13 + $0x130] sm:$0xff]  ;;  %v2016_v51 = vld [vmem:[%s2950_s13 + $0x138] sm:$0xff]  ;;  %v3021_v54 = vpack.c.bf16 %v2028_v43, %v2027_v41  ;;  %v633_v50 = vld [vmem:[%s2950_s13 + $0x8] sm:$0xff] }
  0x8f   : > { %2041 = vmatmul.msk.bf16.vlgmr.msra.gmra.mxu0 %vm703_vm3, %v678_v28  ;;  %v679_v58 = vpack.c.bf16 %v2016_v51, %v2015_v47  ;;  %v2066_v61 = vld [vmem:[%s2950_s13 + $0x240] sm:$0xff]  ;;  %v2067_v1 = vld [vmem:[%s2950_s13 + $0x248] sm:$0xff]  ;;  %v2104_v53 = vld [vmem:[%s2950_s13 + $0x10] sm:$0xff]  ;;  %v648_v7 = vpack.c.bf16 %v633_v50, %v632_v49 }
  0x90   : > { %1200 = vmatpush.bf16.msrb.mxu0 %v2344_v23  ;;  %936 = vmatpush.bf16.msrb.mxu2 %v2337_v29  ;;  %v2105_v55 = vld [vmem:[%s2950_s13 + $0x18] sm:$0xff]  ;;  %v880_v13 = vpack.c.bf16 %v2067_v1, %v2066_v61  ;;  %v2068_v59 = vld [vmem:[%s2950_s13 + $0x250] sm:$0xff]  ;;  %v2106_v22 = vld [vmem:[%s2950_s13 + $0x20] sm:$0xff] }
  0x91   : > { %1069 = vmatpush.bf16.msrb.mxu3 %v2340_v31  ;;  %v1013_v57 = vpack.c.bf16 %v2105_v55, %v2104_v53  ;;  %v2069_v17 = vld [vmem:[%s2950_s13 + $0x258] sm:$0xff]  ;;  %v2107_v62 = vld [vmem:[%s2950_s13 + $0x28] sm:$0xff]  ;;  %v2070_v32 = vld [vmem:[%s2950_s13 + $0x260] sm:$0xff] }
  0x92   : > { %820 = vmatpush.bf16.msrb.mxu1 %v2333_v26  ;;  %v3044_v63 = vpack.c.bf16 %v2069_v17, %v2068_v59  ;;  %v3046_v27 = vpack.c.bf16 %v2107_v62, %v2106_v22  ;;  %v2071_v0 = vld [vmem:[%s2950_s13 + $0x268] sm:$0xff]  ;;  %v2108_v3 = vld [vmem:[%s2950_s13 + $0x30] sm:$0xff]  ;;  %v2109_v36 = vld [vmem:[%s2950_s13 + $0x38] sm:$0xff] }
  0x93   : > { %v3059_v42 = vpack.c.bf16 %v2071_v0, %v2070_v32  ;;  %v3061_v5 = vpack.c.bf16 %v2109_v36, %v2108_v3  ;;  %v2346_v52 = vld [vmem:[%s3408_s1 + $0x50] sm:$0xff]  ;;  %v2073_v60 = vld [vmem:[%s2950_s13 + $0x278] sm:$0xff]  ;;  %v2110_v11 = vld [vmem:[%s2950_s13 + $0x40] sm:$0xff] }
  0x94   : > { %1465 = vmatpush.bf16.msra.mxu2 %v2350_v30  ;;  %1201 = vmatpush.bf16.msrb.mxu0 %v2343_v34  ;;  %v2072_v56 = vld [vmem:[%s2950_s13 + $0x270] sm:$0xff]  ;;  %v2111_v14 = vld [vmem:[%s2950_s13 + $0x48] sm:$0xff]  ;;  %v2074_v4 = vld [vmem:[%s2950_s13 + $0x280] sm:$0xff] }
  0x95   : > { %1597 = vmatpush.bf16.msra.mxu3 %v2353_v35  ;;  %v3087_v15 = vpack.c.bf16 %v2073_v60, %v2072_v56  ;;  %v3089_v2 = vpack.c.bf16 %v2111_v14, %v2110_v11  ;;  %v2075_v18 = vld [vmem:[%s2950_s13 + $0x288] sm:$0xff]  ;;  %v2112_v6 = vld [vmem:[%s2950_s13 + $0x50] sm:$0xff]  ;;  %v2113_v9 = vld [vmem:[%s2950_s13 + $0x58] sm:$0xff] }
  0x96   : > { %1332 = vmatpush.bf16.msra.mxu1 %v2347_v33  ;;  %v3103_v20 = vpack.c.bf16 %v2075_v18, %v2074_v4  ;;  %v3105_v21 = vpack.c.bf16 %v2113_v9, %v2112_v6  ;;  %v2076_v24 = vld [vmem:[%s2950_s13 + $0x290] sm:$0xff]  ;;  %v2077_v28 = vld [vmem:[%s2950_s13 + $0x298] sm:$0xff]  ;;  %v2114_v19 = vld [vmem:[%s2950_s13 + $0x60] sm:$0xff] }
  0x97   : > { %v2115_v23 = vld [vmem:[%s2950_s13 + $0x68] sm:$0xff]  ;;  %v3119_v29 = vpack.c.bf16 %v2077_v28, %v2076_v24  ;;  %v2078_v26 = vld [vmem:[%s2950_s13 + $0x2a0] sm:$0xff]  ;;  %v2116_v34 = vld [vmem:[%s2950_s13 + $0x70] sm:$0xff] }
  0x98   : > { %1729 = vmatpush.bf16.msra.mxu0 %v2356_v37  ;;  %1466 = vmatpush.bf16.msra.mxu2 %v2349_v8  ;;  %v3121_v31 = vpack.c.bf16 %v2115_v23, %v2114_v19  ;;  %v2079_v30 = vld [vmem:[%s2950_s13 + $0x2a8] sm:$0xff]  ;;  %v2117_v35 = vld [vmem:[%s2950_s13 + $0x78] sm:$0xff]  ;;  %v2080_v47 = vld [vmem:[%s2950_s13 + $0x2b0] sm:$0xff] }
  0x99   : > { %1598 = vmatpush.bf16.msra.mxu3 %v2352_v46  ;;  %v3135_v33 = vpack.c.bf16 %v2079_v30, %v2078_v26  ;;  %v3139_v38 = vpack.c.bf16 %v2117_v35, %v2116_v34  ;;  %v2081_v51 = vld [vmem:[%s2950_s13 + $0x2b8] sm:$0xff]  ;;  %v2119_v49 = vld [vmem:[%s2950_s13 + $0x88] sm:$0xff]  ;;  %v2156_v50 = vld [vmem:[%s2950_s13 + $0x1a0] sm:$0xff] }
  0x9a   : > { %1333 = vmatpush.bf16.msra.mxu1 %v2346_v52  ;;  %v2157_v61 = vld [vmem:[%s2950_s13 + $0x1a8] sm:$0xff]  ;;  %v3165_v55 = vpack.c.bf16 %v2081_v51, %v2080_v47 }
  0x9c   : > { %2044 = vmatmul.msk.bf16.gmra.mxu1 %vm703_vm3, %v3017_v45  ;;  %1730 = vmatpush.bf16.msra.mxu0 %v2355_v10 }
  0x9d   : > { %2046 = vmatmul.msk.bf16.gmra.mxu2 %vm703_vm3, %v3019_v48 }
  0x9e   : > { %2048 = vmatmul.msk.bf16.gmra.mxu3 %vm703_vm3, %v3021_v54 }
  0x9f   : > { %2042 = vmatmul.msk.bf16.gmra.mxu0 %vm703_vm3, %v679_v58 }
  0xac   : > { %2057 = vmatmul.msk.bf16.vlgmr.msrb.gmra.mxu1 %vm703_vm3, %v648_v7 }
  0xad   : > { %2094 = vmatmul.msk.bf16.vlgmr.msrb.gmra.mxu2 %vm703_vm3, %v880_v13 }
  0xae   : > { %2132 = vmatmul.msk.bf16.vlgmr.msrb.gmra.mxu3 %vm703_vm3, %v1013_v57 }
  0xaf   : > { %2170 = vmatmul.msk.bf16.vlgmr.msrb.gmra.mxu0 %vm703_vm3, %v679_v58  ;;  %v2118_v58 = vld [vmem:[%s2950_s13 + $0x80] sm:$0xff] }
  0xb0   : > { %v3169_v13 = vpack.c.bf16 %v2119_v49, %v2118_v58 }
  0xbc   : > { %2058 = vmatmul.msk.bf16.gmra.mxu1 %vm703_vm3, %v1013_v57  ;;  %v3171_v57 = vpack.c.bf16 %v2157_v61, %v2156_v50 }
  0xbd   : > { %2095 = vmatmul.msk.bf16.gmra.mxu2 %vm703_vm3, %v3044_v63 }
  0xbe   : > { %2133 = vmatmul.msk.bf16.gmra.mxu3 %vm703_vm3, %v3046_v27 }
  0xbf   : > { %2171 = vmatmul.msk.bf16.gmra.mxu0 %vm703_vm3, %v2966_v12 }
  0xcc   : > { %2059 = vmatmul.msk.bf16.gmra.mxu1 %vm703_vm3, %v3046_v27 }
  0xcd   : > { %2096 = vmatmul.msk.bf16.gmra.mxu2 %vm703_vm3, %v3059_v42 }
  0xce   : > { %2134 = vmatmul.msk.bf16.gmra.mxu3 %vm703_vm3, %v3061_v5 }
  0xcf   : > { %2172 = vmatmul.msk.bf16.gmra.mxu0 %vm703_vm3, %v3017_v45 }
  0xdc   : > { %2060 = vmatmul.msk.bf16.gmra.mxu1 %vm703_vm3, %v3061_v5 }
  0xdd   : > { %2097 = vmatmul.msk.bf16.gmra.mxu2 %vm703_vm3, %v3087_v15 }
  0xde   : > { %2135 = vmatmul.msk.bf16.gmra.mxu3 %vm703_vm3, %v3089_v2 }
  0xdf   : > { %2173 = vmatmul.msk.bf16.gmra.mxu0 %vm703_vm3, %v2968_v16 }
  0xec   : > { %2061 = vmatmul.msk.bf16.gmra.mxu1 %vm703_vm3, %v3089_v2 }
  0xed   : > { %2098 = vmatmul.msk.bf16.gmra.mxu2 %vm703_vm3, %v3103_v20 }
  0xee   : > { %2136 = vmatmul.msk.bf16.gmra.mxu3 %vm703_vm3, %v3105_v21 }
  0xef   : > { %2174 = vmatmul.msk.bf16.gmra.mxu0 %vm703_vm3, %v3019_v48 }
  0xfc   : > { %2062 = vmatmul.msk.bf16.gmra.mxu1 %vm703_vm3, %v3105_v21 }
  0xfd   : > { %2099 = vmatmul.msk.bf16.gmra.mxu2 %vm703_vm3, %v3119_v29 }
  0xfe   : > { %2137 = vmatmul.msk.bf16.gmra.mxu3 %vm703_vm3, %v3121_v31 }
  0xff   : > { %2175 = vmatmul.msk.bf16.gmra.mxu0 %vm703_vm3, %v2970_v25 }
 0x109   : > { %v3137_v37 = vpop.f32.mrf.mxu1 }
 0x10c   : > { %v737_v39 = vpop.f32.mrf.mxu0  ;;  %2063 = vmatmul.msk.bf16.gmra.mxu1 %vm703_vm3, %v3121_v31 }
 0x10d   : > { %2100 = vmatmul.msk.bf16.gmra.mxu2 %vm703_vm3, %v3135_v33 }
 0x10e   : > { %2138 = vmatmul.msk.bf16.gmra.mxu3 %vm703_vm3, %v3139_v38 }
 0x10f   : > { %2176 = vmatmul.msk.bf16.gmra.mxu0 %vm703_vm3, %v3021_v54 }
 0x110   : > { %v3149_v40 = vpop.f32.mrf.mxu2 }
 0x111   : > { %v3151_v44 = vpop.f32.mrf.mxu3  ;;  %v3153_v41 = vpop.f32.mrf.mxu1 }
 0x114   : > { %v739_v43 = vpop.f32.mrf.mxu0 }
 0x118   : > { %v3161_v1 = vpop.f32.mrf.mxu2 }
 0x119   : > { %v3163_v53 = vpop.f32.mrf.mxu3  ;;  %v3167_v7 = vpop.f32.mrf.mxu1 }
 0x11c   : > { %v742_v59 = vpop.f32.mrf.mxu0  ;;  %2064 = vmatmul.msk.bf16.gmra.mxu1 %vm703_vm3, %v3139_v38 }
 0x11d   : > { %2101 = vmatmul.msk.bf16.gmra.mxu2 %vm703_vm3, %v3165_v55 }
 0x11e   : > { %2139 = vmatmul.msk.bf16.gmra.mxu3 %vm703_vm3, %v3169_v13 }
 0x11f   : > { %2177 = vmatmul.msk.bf16.gmra.mxu0 %vm703_vm3, %v3171_v57 }
 0x120   : > { %v3181_v17 = vpop.f32.mrf.mxu2 }
 0x121   : > { %v3183_v22 = vpop.f32.mrf.mxu3  ;;  %v3185_v62 = vpop.f32.mrf.mxu1 }
 0x124   : > { %v744_v32 = vpop.f32.mrf.mxu0 }
 0x128   : > { %v3187_v0 = vpop.f32.mrf.mxu2 }
 0x129   : > { %v3189_v3 = vpop.f32.mrf.mxu3  ;;  %v822_v36 = vpop.f32.mrf.mxu1 }
 0x12a   : > { %v823_v8 = vadd.f32 %v822_v36, %v737_v39 }
 0x12c   : > { %v1203_v46 = vpop.f32.mrf.mxu0  ;;  %2208 = vmatmul.msk.bf16.vlgmr.msra.gmra.mxu1 %vm703_vm3, %v3044_v63 }
 0x12d   : > { %2246 = vmatmul.msk.bf16.vlgmr.msra.gmra.mxu2 %vm703_vm3, %v3046_v27 }
 0x12e   : > { %2284 = vmatmul.msk.bf16.vlgmr.msra.gmra.mxu3 %vm703_vm3, %v2966_v12 }
 0x12f   : > { %2322 = vmatmul.msk.bf16.vlgmr.msra.gmra.mxu0 %vm703_vm3, %v3059_v42 }
 0x130   : > { %v938_v52 = vpop.f32.mrf.mxu2 }
 0x131   : > { %v978_v10 = vadd.f32 %v938_v52, %v823_v8  ;;  %v1071_v56 = vpop.f32.mrf.mxu3  ;;  %v824_v60 = vpop.f32.mrf.mxu1 }
 0x132   : > { %v825_v14 = vadd.f32 %v824_v60, %v739_v43 }
 0x133   : > { %v1111_v11 = vadd.f32 %v1071_v56, %v978_v10 }
 0x134   : > { %v1205_v4 = vpop.f32.mrf.mxu0 }
 0x135   : > { %v3199_v18 = vadd.f32 %v1203_v46, %v1111_v11 }
 0x138   : > { %v940_v6 = vpop.f32.mrf.mxu2 }
 0x139   : > { %v979_v63 = vadd.f32 %v940_v6, %v825_v14  ;;  %v1073_v9 = vpop.f32.mrf.mxu3  ;;  %v827_v24 = vpop.f32.mrf.mxu1 }
 0x13a   : > { %v828_v28 = vadd.f32 %v827_v24, %v742_v59 }
 0x13b   : > { %v1112_v27 = vadd.f32 %v1073_v9, %v979_v63 }
 0x13c   : > { %v1208_v19 = vpop.f32.mrf.mxu0  ;;  %2209 = vmatmul.msk.bf16.gmra.mxu1 %vm703_vm3, %v3059_v42 }
 0x13d   : > { %2247 = vmatmul.msk.bf16.gmra.mxu2 %vm703_vm3, %v3061_v5  ;;  %v3205_v12 = vadd.f32 %v1205_v4, %v1112_v27 }
 0x13e   : > { %2285 = vmatmul.msk.bf16.gmra.mxu3 %vm703_vm3, %v3017_v45 }
 0x13f   : > { %2323 = vmatmul.msk.bf16.gmra.mxu0 %vm703_vm3, %v3087_v15 }
 0x140   : > { %v943_v23 = vpop.f32.mrf.mxu2 }
 0x141   : > { %v980_v26 = vadd.f32 %v943_v23, %v828_v28  ;;  %v1076_v30 = vpop.f32.mrf.mxu3  ;;  %v829_v34 = vpop.f32.mrf.mxu1 }
 0x142   : > { %v830_v39 = vadd.f32 %v829_v34, %v744_v32 }
 0x143   : > { %v1113_v35 = vadd.f32 %v1076_v30, %v980_v26 }
 0x144   : > { %v1210_v43 = vpop.f32.mrf.mxu0 }
 0x145   : > { %v3211_v47 = vadd.f32 %v1208_v19, %v1113_v35 }
 0x148   : > { %v945_v42 = vpop.f32.mrf.mxu2 }
 0x149   : > { %v981_v51 = vadd.f32 %v945_v42, %v830_v39  ;;  %v1078_v5 = vpop.f32.mrf.mxu3  ;;  %v832_v58 = vpop.f32.mrf.mxu1 }
 0x14a   : > { %v833_v50 = vadd.f32 %v832_v58, %v3137_v37 }
 0x14b   : > { %v1114_v49 = vadd.f32 %v1078_v5, %v981_v51 }
 0x14c   : > { %v1213_v45 = vpop.f32.mrf.mxu0  ;;  %2210 = vmatmul.msk.bf16.gmra.mxu1 %vm703_vm3, %v3087_v15 }
 0x14d   : > { %2248 = vmatmul.msk.bf16.gmra.mxu2 %vm703_vm3, %v3089_v2  ;;  %v3218_v61 = vadd.f32 %v1210_v43, %v1114_v49 }
 0x14e   : > { %2286 = vmatmul.msk.bf16.gmra.mxu3 %vm703_vm3, %v2968_v16 }
 0x14f   : > { %2324 = vmatmul.msk.bf16.gmra.mxu0 %vm703_vm3, %v3103_v20 }
 0x150   : > { %v948_v59 = vpop.f32.mrf.mxu2 }
 0x151   : > { %v982_v32 = vadd.f32 %v948_v59, %v833_v50  ;;  %v1081_v36 = vpop.f32.mrf.mxu3  ;;  %v834_v8 = vpop.f32.mrf.mxu1 }
 0x152   : > { %v835_v46 = vadd.f32 %v834_v8, %v3153_v41 }
 0x153   : > { %v1115_v37 = vadd.f32 %v1081_v36, %v982_v32 }
 0x154   : > { %v1215_v52 = vpop.f32.mrf.mxu0 }
 0x155   : > { %v3225_v15 = vadd.f32 %v1213_v45, %v1115_v37 }
 0x158   : > { %v950_v10 = vpop.f32.mrf.mxu2 }
 0x159   : > { %v983_v2 = vadd.f32 %v950_v10, %v835_v46  ;;  %v1083_v56 = vpop.f32.mrf.mxu3  ;;  %v837_v60 = vpop.f32.mrf.mxu1  ;;  %v2307_v10 = vld [vmem:[%s2950_s13 + $0x2c8] sm:$0xff] }
 0x15a   : > { %v838_v16 = vadd.f32 %v837_v60, %v3167_v7 }
 0x15b   : > { %v1116_v11 = vadd.f32 %v1083_v56, %v983_v2 }
 0x15c   : > { %v1218_v14 = vpop.f32.mrf.mxu0  ;;  %2211 = vmatmul.msk.bf16.gmra.mxu1 %vm703_vm3, %v3103_v20 }
 0x15d   : > { %2249 = vmatmul.msk.bf16.gmra.mxu2 %vm703_vm3, %v3105_v21  ;;  %v3232_v4 = vadd.f32 %v1215_v52, %v1116_v11  ;;  %v2306_v52 = vld [vmem:[%s2950_s13 + $0x2c0] sm:$0xff] }
 0x15e   : > { %2287 = vmatmul.msk.bf16.gmra.mxu3 %vm703_vm3, %v3019_v48  ;;  %v1680_v11 = vpack.c.bf16 %v2307_v10, %v2306_v52 }
 0x15f   : > { %2325 = vmatmul.msk.bf16.gmra.mxu0 %vm703_vm3, %v3119_v29 }
 0x160   : > { %v953_v41 = vpop.f32.mrf.mxu2 }
 0x161   : > { %v984_v6 = vadd.f32 %v953_v41, %v838_v16  ;;  %v1086_v63 = vpop.f32.mrf.mxu3  ;;  %v839_v9 = vpop.f32.mrf.mxu1 }
 0x162   : > { %v840_v24 = vadd.f32 %v839_v9, %v3185_v62 }
 0x163   : > { %v1117_v7 = vadd.f32 %v1086_v63, %v984_v6 }
 0x164   : > { %v1220_v27 = vpop.f32.mrf.mxu0 }
 0x165   : > { %v3239_v20 = vadd.f32 %v1218_v14, %v1117_v7 }
 0x168   : > { %v955_v28 = vpop.f32.mrf.mxu2 }
 0x169   : > { %v985_v21 = vadd.f32 %v955_v28, %v840_v24  ;;  %v1088_v19 = vpop.f32.mrf.mxu3  ;;  %v842_v23 = vpop.f32.mrf.mxu1  ;;  %v2270_v28 = vld [vmem:[%s2950_s13 + $0x1b0] sm:$0xff] }
 0x16a   : > { %v843_v62 = vadd.f32 %v842_v23, %v3149_v40  ;;  %v2309_v23 = vld [vmem:[%s2950_s13 + $0x2d8] sm:$0xff] }
 0x16b   : > { %v1118_v26 = vadd.f32 %v1088_v19, %v985_v21  ;;  %v2271_v19 = vld [vmem:[%s2950_s13 + $0x1b8] sm:$0xff] }
 0x16c   : > { %v1223_v30 = vpop.f32.mrf.mxu0  ;;  %2212 = vmatmul.msk.bf16.gmra.mxu1 %vm703_vm3, %v3119_v29 }
 0x16d   : > { %2250 = vmatmul.msk.bf16.gmra.mxu2 %vm703_vm3, %v3121_v31  ;;  %v3245_v48 = vadd.f32 %v1220_v27, %v1118_v26  ;;  %v2233_v27 = vld [vmem:[%s2950_s13 + $0x98] sm:$0xff] }
 0x16e   : > { %2288 = vmatmul.msk.bf16.gmra.mxu3 %vm703_vm3, %v2970_v25 }
 0x16f   : > { %2326 = vmatmul.msk.bf16.gmra.mxu0 %vm703_vm3, %v3135_v33 }
 0x170   : > { %v958_v34 = vpop.f32.mrf.mxu2 }
 0x171   : > { %v986_v35 = vadd.f32 %v958_v34, %v843_v62  ;;  %v1091_v39 = vpop.f32.mrf.mxu3  ;;  %v844_v43 = vpop.f32.mrf.mxu1 }
 0x172   : > { %v845_v31 = vadd.f32 %v844_v43, %v3161_v1 }
 0x173   : > { %v1119_v42 = vadd.f32 %v1091_v39, %v986_v35  ;;  %v1549_v35 = vpack.c.bf16 %v2271_v19, %v2270_v28 }
 0x174   : > { %v1225_v51 = vpop.f32.mrf.mxu0 }
 0x175   : > { %v3252_v29 = vadd.f32 %v1223_v30, %v1119_v42 }
 0x178   : > { %v960_v5 = vpop.f32.mrf.mxu2 }
 0x179   : > { %v987_v58 = vadd.f32 %v960_v5, %v845_v31  ;;  %v1093_v49 = vpop.f32.mrf.mxu3  ;;  %v847_v50 = vpop.f32.mrf.mxu1 }
 0x17a   : > { %v848_v1 = vadd.f32 %v847_v50, %v3181_v17 }
 0x17b   : > { %v1120_v25 = vadd.f32 %v1093_v49, %v987_v58 }
 0x17c   : > { %v1228_v45 = vpop.f32.mrf.mxu0  ;;  %2213 = vmatmul.msk.bf16.gmra.mxu1 %vm703_vm3, %v3135_v33 }
 0x17d   : > { %2251 = vmatmul.msk.bf16.gmra.mxu2 %vm703_vm3, %v3139_v38  ;;  %v3259_v40 = vadd.f32 %v1225_v51, %v1120_v25 }
 0x17e   : > { %2289 = vmatmul.msk.bf16.gmra.mxu3 %vm703_vm3, %v3021_v54 }
 0x17f   : > { %2327 = vmatmul.msk.bf16.gmra.mxu0 %vm703_vm3, %v3165_v55 }
 0x180   : > { %v963_v59 = vpop.f32.mrf.mxu2 }
 0x181   : > { %v988_v32 = vadd.f32 %v963_v59, %v848_v1  ;;  %v1096_v36 = vpop.f32.mrf.mxu3  ;;  %v849_v8 = vpop.f32.mrf.mxu1 }
 0x182   : > { %v850_v38 = vadd.f32 %v849_v8, %v3187_v0 }
 0x183   : > { %v1121_v37 = vadd.f32 %v1096_v36, %v988_v32 }
 0x184   : > { %v1230_v46 = vpop.f32.mrf.mxu0 }
 0x185   : > { %v3266_v33 = vadd.f32 %v1228_v45, %v1121_v37 }
 0x188   : > { %v965_v2 = vpop.f32.mrf.mxu2 }
 0x189   : > { %v989_v56 = vadd.f32 %v965_v2, %v850_v38  ;;  %v1098_v54 = vpop.f32.mrf.mxu3  ;;  %v852_v60 = vpop.f32.mrf.mxu1 }
 0x18a   : > { %v853_v14 = vadd.f32 %v852_v60, %v3151_v44  ;;  %v3306_v60 = vld [vmem:[%s3409_s2] ss:$0 sm:$0xff] }
 0x18b   : > { %v1122_v16 = vadd.f32 %v1098_v54, %v989_v56 }
 0x18c   : > { %v1233_v17 = vpop.f32.mrf.mxu0  ;;  %2214 = vmatmul.msk.bf16.gmra.mxu1 %vm703_vm3, %v3165_v55 }
 0x18d   : > { %2252 = vmatmul.msk.bf16.gmra.mxu2 %vm703_vm3, %v3169_v13  ;;  %v3275_v0 = vadd.f32 %v1230_v46, %v1122_v16  ;;  %v2232_v13 = vld [vmem:[%s2950_s13 + $0x90] sm:$0xff]  ;;  %v3311_v16 = vld [vmem:[%s3410_s3] ss:$0 sm:$0xff] }
 0x18e   : > { %2290 = vmatmul.msk.bf16.gmra.mxu3 %vm703_vm3, %v3171_v57  ;;  %v2308_v57 = vld [vmem:[%s2950_s13 + $0x2d0] sm:$0xff]  ;;  %v1417_v44 = vpack.c.bf16 %v2233_v27, %v2232_v13 }
 0x18f   : > { %2328 = vmatmul.msk.bf16.gmra.mxu0 %vm703_vm3, %v1680_v11  ;;  %v1681_v39 = vpack.c.bf16 %v2309_v23, %v2308_v57 }
 0x190   : > { %v968_v41 = vpop.f32.mrf.mxu2 }
 0x191   : > { %v990_v6 = vadd.f32 %v968_v41, %v853_v14  ;;  %v1101_v63 = vpop.f32.mrf.mxu3  ;;  %v854_v9 = vpop.f32.mrf.mxu1 }
 0x192   : > { %v855_v21 = vadd.f32 %v854_v9, %v3163_v53 }
 0x193   : > { %v1123_v55 = vadd.f32 %v1101_v63, %v990_v6 }
 0x194   : > { %v1235_v7 = vpop.f32.mrf.mxu0 }
 0x195   : > { %v3281_v24 = vadd.f32 %v1233_v17, %v1123_v55 }
 0x198   : > { %v970_v26 = vpop.f32.mrf.mxu2 }
 0x199   : > { %v991_v30 = vadd.f32 %v970_v26, %v855_v21  ;;  %v1103_v62 = vpop.f32.mrf.mxu3  ;;  %v857_v34 = vpop.f32.mrf.mxu1 }
 0x19a   : > { %v858_v53 = vadd.f32 %v857_v34, %v3183_v22 }
 0x19b   : > { %v1124_v43 = vadd.f32 %v1103_v62, %v991_v30 }
 0x19c   : > { %v1238_v42 = vpop.f32.mrf.mxu0  ;;  %2215 = vmatmul.msk.bf16.gmra.mxu1 %vm703_vm3, %v1680_v11 }
 0x19d   : > { %2253 = vmatmul.msk.bf16.gmra.mxu2 %vm703_vm3, %v1417_v44  ;;  %v3292_v51 = vadd.f32 %v1235_v7, %v1124_v43 }
 0x19e   : > { %2291 = vmatmul.msk.bf16.gmra.mxu3 %vm703_vm3, %v1549_v35 }
 0x19f   : > { %2329 = vmatmul.msk.bf16.gmra.mxu0 %vm703_vm3, %v1681_v39 }
 0x1a0   : > { %v973_v31 = vpop.f32.mrf.mxu2 }
 0x1a1   : > { %v992_v5 = vadd.f32 %v973_v31, %v858_v53  ;;  %v1106_v58 = vpop.f32.mrf.mxu3  ;;  %v859_v49 = vpop.f32.mrf.mxu1 }
 0x1a2   : > { %v860_v1 = vadd.f32 %v859_v49, %v3189_v3 }
 0x1a3   : > { %v1125_v50 = vadd.f32 %v1106_v58, %v992_v5 }
 0x1a4   : > { %v1240_v25 = vpop.f32.mrf.mxu0 }
 0x1a5   : > { %v3297_v45 = vadd.f32 %v1238_v42, %v1125_v50 }
 0x1a8   : > { %v975_v59 = vpop.f32.mrf.mxu2 }
 0x1a9   : > { %v993_v32 = vadd.f32 %v975_v59, %v860_v1  ;;  %v1108_v36 = vpop.f32.mrf.mxu3  ;;  %v1335_v8 = vpop.f32.mrf.mxu1 }
 0x1aa   : > { %v1375_v22 = vadd.f32 %v1335_v8, %v3199_v18 }
 0x1ab   : > { %v1126_v37 = vadd.f32 %v1108_v36, %v993_v32 }
 0x1ac   : > { %v1732_v46 = vpop.f32.mrf.mxu0 }
 0x1ad   : > { %v3300_v38 = vadd.f32 %v1240_v25, %v1126_v37 }
 0x1b0   : > { %v1468_v52 = vpop.f32.mrf.mxu2 }
 0x1b1   : > { %v1508_v10 = vadd.f32 %v1468_v52, %v1375_v22  ;;  %v1600_v2 = vpop.f32.mrf.mxu3  ;;  %v1337_v56 = vpop.f32.mrf.mxu1 }
 0x1b2   : > { %v1376_v17 = vadd.f32 %v1337_v56, %v3205_v12 }
 0x1b3   : > { %v1640_v54 = vadd.f32 %v1600_v2, %v1508_v10 }
 0x1b4   : > { %v1734_v3 = vpop.f32.mrf.mxu0 }
 0x1b5   : > { %v1772_v11 = vadd.f32 %v1732_v46, %v1640_v54 }
 0x1b7   : > { %v1792_v18 = vmul.f32 %v3306_v60, %v1772_v11 }
 0x1b8   : > { %v1470_v14 = vpop.f32.mrf.mxu2 }
 0x1b9   : > { %v1812_v41 = vadd.f32 %v3311_v16, %v1792_v18  ;;  %v1509_v6 = vadd.f32 %v1470_v14, %v1376_v17  ;;  %v1602_v63 = vpop.f32.mrf.mxu3  ;;  %v1340_v9 = vpop.f32.mrf.mxu1 }
 0x1ba   : > { %v1377_v19 = vadd.f32 %v1340_v9, %v3211_v47 }
 0x1bb   : > { %v1828_v55 = vmax.f32 %v1812_v41, 0.0  ;;  %v1641_v7 = vadd.f32 %v1602_v63, %v1509_v6 }
 0x1bc   : > { %v1737_v13 = vpop.f32.mrf.mxu0 }
 0x1bd   : > { %v1844_v27 = vpack.c.bf16 %v1828_v55, %v1828_v55  ;;  %v1773_v28 = vadd.f32 %v1734_v3, %v1641_v7 }
 0x1bf   : > { %1861 = vst.msk [vmem:[%s2592_s7] sm:$0xf] %vm1860_vm4, %v1844_v27  ;;  %v1793_v21 = vmul.f32 %v3306_v60, %v1773_v28 }
 0x1c0   : > { %v1473_v12 = vpop.f32.mrf.mxu2 }
 0x1c1   : > { %v1813_v57 = vadd.f32 %v3311_v16, %v1793_v21  ;;  %v1510_v23 = vadd.f32 %v1473_v12, %v1377_v19  ;;  %v1605_v26 = vpop.f32.mrf.mxu3  ;;  %v1342_v30 = vpop.f32.mrf.mxu1 }
 0x1c2   : > { %v1378_v42 = vadd.f32 %v1342_v30, %v3218_v61 }
 0x1c3   : > { %v1829_v62 = vmax.f32 %v1813_v57, 0.0  ;;  %v1642_v44 = vadd.f32 %v1605_v26, %v1510_v23 }
 0x1c4   : > { %v1739_v34 = vpop.f32.mrf.mxu0 }
 0x1c5   : > { %v1845_v35 = vpack.c.bf16 %v1829_v62, %v1829_v62  ;;  %v1774_v39 = vadd.f32 %v1737_v13, %v1642_v44 }
 0x1c7   : > { %1862 = vst.msk [vmem:[%s2592_s7 + $0x4] sm:$0xf] %vm1860_vm4, %v1845_v35  ;;  %v1794_v43 = vmul.f32 %v3306_v60, %v1774_v39 }
 0x1c8   : > { %v1475_v53 = vpop.f32.mrf.mxu2 }
 0x1c9   : > { %v1814_v47 = vadd.f32 %v3311_v16, %v1794_v43  ;;  %v1511_v31 = vadd.f32 %v1475_v53, %v1378_v42  ;;  %v1607_v5 = vpop.f32.mrf.mxu3  ;;  %v1345_v58 = vpop.f32.mrf.mxu1 }
 0x1ca   : > { %v1379_v36 = vadd.f32 %v1345_v58, %v3225_v15 }
 0x1cb   : > { %v1830_v49 = vmax.f32 %v1814_v47, 0.0  ;;  %v1643_v50 = vadd.f32 %v1607_v5, %v1511_v31 }
 0x1cc   : > { %v1742_v25 = vpop.f32.mrf.mxu0 }
 0x1cd   : > { %v1846_v1 = vpack.c.bf16 %v1830_v49, %v1830_v49  ;;  %v1775_v59 = vadd.f32 %v1739_v34, %v1643_v50 }
 0x1cf   : > { %1863 = vst.msk [vmem:[%s2592_s7 + $0x8] sm:$0xf] %vm1860_vm4, %v1846_v1  ;;  %v1795_v32 = vmul.f32 %v3306_v60, %v1775_v59 }
 0x1d0   : > { %v1478_v8 = vpop.f32.mrf.mxu2 }
 0x1d1   : > { %v1815_v61 = vadd.f32 %v3311_v16, %v1795_v32  ;;  %v1512_v37 = vadd.f32 %v1478_v8, %v1379_v36  ;;  %v1610_v46 = vpop.f32.mrf.mxu3  ;;  %v1347_v22 = vpop.f32.mrf.mxu1 }
 0x1d2   : > { %v1380_v11 = vadd.f32 %v1347_v22, %v3232_v4 }
 0x1d3   : > { %v1831_v52 = vmax.f32 %v1815_v61, 0.0  ;;  %v1644_v10 = vadd.f32 %v1610_v46, %v1512_v37 }
 0x1d4   : > { %v1744_v2 = vpop.f32.mrf.mxu0 }
 0x1d5   : > { %v1847_v56 = vpack.c.bf16 %v1831_v52, %v1831_v52  ;;  %v1776_v54 = vadd.f32 %v1742_v25, %v1644_v10 }
 0x1d7   : > { %1864 = vst.msk [vmem:[%s2592_s7 + $0xc] sm:$0xf] %vm1860_vm4, %v1847_v56  ;;  %v1796_v3 = vmul.f32 %v3306_v60, %v1776_v54 }
 0x1d8   : > { %v1480_v18 = vpop.f32.mrf.mxu2 }
 0x1d9   : > { %v1816_v15 = vadd.f32 %v3311_v16, %v1796_v3  ;;  %v1513_v17 = vadd.f32 %v1480_v18, %v1380_v11  ;;  %v1612_v14 = vpop.f32.mrf.mxu3  ;;  %v1350_v41 = vpop.f32.mrf.mxu1 }
 0x1da   : > { %v1381_v27 = vadd.f32 %v1350_v41, %v3239_v20 }
 0x1db   : > { %v1832_v6 = vmax.f32 %v1816_v15, 0.0  ;;  %v1645_v63 = vadd.f32 %v1612_v14, %v1513_v17 }
 0x1dc   : > { %v1747_v9 = vpop.f32.mrf.mxu0 }
 0x1dd   : > { %v1848_v55 = vpack.c.bf16 %v1832_v6, %v1832_v6  ;;  %v1777_v7 = vadd.f32 %v1744_v2, %v1645_v63 }
 0x1df   : > { %1865 = vst.msk [vmem:[%s2592_s7 + $0x10] sm:$0xf] %vm1860_vm4, %v1848_v55  ;;  %v1797_v13 = vmul.f32 %v3306_v60, %v1777_v7 }
 0x1e0   : > { %v1483_v28 = vpop.f32.mrf.mxu2 }
 0x1e1   : > { %v1817_v4 = vadd.f32 %v3311_v16, %v1797_v13  ;;  %v1514_v21 = vadd.f32 %v1483_v28, %v1381_v27  ;;  %v1615_v19 = vpop.f32.mrf.mxu3  ;;  %v1352_v12 = vpop.f32.mrf.mxu1 }
 0x1e2   : > { %v1382_v34 = vadd.f32 %v1352_v12, %v3245_v48 }
 0x1e3   : > { %v1833_v57 = vmax.f32 %v1817_v4, 0.0  ;;  %v1646_v23 = vadd.f32 %v1615_v19, %v1514_v21 }
 0x1e4   : > { %v1749_v26 = vpop.f32.mrf.mxu0 }
 0x1e5   : > { %v1849_v30 = vpack.c.bf16 %v1833_v57, %v1833_v57  ;;  %v1778_v62 = vadd.f32 %v1747_v9, %v1646_v23 }
 0x1e7   : > { %1866 = vst.msk [vmem:[%s2592_s7 + $0x14] sm:$0xf] %vm1860_vm4, %v1849_v30  ;;  %v1798_v44 = vmul.f32 %v3306_v60, %v1778_v62 }
 0x1e8   : > { %v1485_v35 = vpop.f32.mrf.mxu2 }
 0x1e9   : > { %v1818_v20 = vadd.f32 %v3311_v16, %v1798_v44  ;;  %v1515_v39 = vadd.f32 %v1485_v35, %v1382_v34  ;;  %v1617_v43 = vpop.f32.mrf.mxu3  ;;  %v1355_v42 = vpop.f32.mrf.mxu1 }
 0x1ea   : > { %v1383_v50 = vadd.f32 %v1355_v42, %v3252_v29 }
 0x1eb   : > { %v1834_v53 = vmax.f32 %v1818_v20, 0.0  ;;  %v1647_v47 = vadd.f32 %v1617_v43, %v1515_v39 }
 0x1ec   : > { %v1752_v31 = vpop.f32.mrf.mxu0 }
 0x1ed   : > { %v1850_v5 = vpack.c.bf16 %v1834_v53, %v1834_v53  ;;  %v1779_v58 = vadd.f32 %v1749_v26, %v1647_v47 }
 0x1ef   : > { %1867 = vst.msk [vmem:[%s2592_s7 + $0x18] sm:$0xf] %vm1860_vm4, %v1850_v5  ;;  %v1799_v49 = vmul.f32 %v3306_v60, %v1779_v58 }
 0x1f0   : > { %v1488_v25 = vpop.f32.mrf.mxu2 }
 0x1f1   : > { %v1819_v48 = vadd.f32 %v3311_v16, %v1799_v49  ;;  %v1516_v1 = vadd.f32 %v1488_v25, %v1383_v50  ;;  %v1620_v59 = vpop.f32.mrf.mxu3  ;;  %v1357_v32 = vpop.f32.mrf.mxu1 }
 0x1f2   : > { %v1384_v52 = vadd.f32 %v1357_v32, %v3259_v40 }
 0x1f3   : > { %v1835_v36 = vmax.f32 %v1819_v48, 0.0  ;;  %v1648_v8 = vadd.f32 %v1620_v59, %v1516_v1 }
 0x1f4   : > { %v1754_v61 = vpop.f32.mrf.mxu0 }
 0x1f5   : > { %v1851_v37 = vpack.c.bf16 %v1835_v36, %v1835_v36  ;;  %v1780_v46 = vadd.f32 %v1752_v31, %v1648_v8 }
 0x1f7   : > { %1868 = vst.msk [vmem:[%s2592_s7 + $0x1c] sm:$0xf] %vm1860_vm4, %v1851_v37  ;;  %v1800_v22 = vmul.f32 %v3306_v60, %v1780_v46 }
 0x1f8   : > { %v1490_v10 = vpop.f32.mrf.mxu2 }
 0x1f9   : > { %v1820_v29 = vadd.f32 %v3311_v16, %v1800_v22  ;;  %v1517_v2 = vadd.f32 %v1490_v10, %v1384_v52  ;;  %v1622_v56 = vpop.f32.mrf.mxu3  ;;  %v1360_v54 = vpop.f32.mrf.mxu1 }
 0x1fa   : > { %v1385_v41 = vadd.f32 %v1360_v54, %v3266_v33 }
 0x1fb   : > { %v1836_v3 = vmax.f32 %v1820_v29, 0.0  ;;  %v1649_v11 = vadd.f32 %v1622_v56, %v1517_v2 }
 0x1fc   : > { %v1757_v18 = vpop.f32.mrf.mxu0 }
 0x1fd   : > { %v1852_v15 = vpack.c.bf16 %v1836_v3, %v1836_v3  ;;  %v1781_v17 = vadd.f32 %v1754_v61, %v1649_v11 }
 0x1ff   : > { %1869 = vst.msk [vmem:[%s2592_s7 + $0x20] sm:$0xf] %vm1860_vm4, %v1852_v15  ;;  %v1801_v14 = vmul.f32 %v3306_v60, %v1781_v17 }
 0x200   : > { %v1493_v6 = vpop.f32.mrf.mxu2 }
 0x201   : > { %v1821_v40 = vadd.f32 %v3311_v16, %v1801_v14  ;;  %v1518_v63 = vadd.f32 %v1493_v6, %v1385_v41  ;;  %v1625_v9 = vpop.f32.mrf.mxu3  ;;  %v1362_v55 = vpop.f32.mrf.mxu1 }
 0x202   : > { %v1386_v19 = vadd.f32 %v1362_v55, %v3275_v0 }
 0x203   : > { %v1837_v7 = vmax.f32 %v1821_v40, 0.0  ;;  %v1650_v13 = vadd.f32 %v1625_v9, %v1518_v63 }
 0x204   : > { %v1759_v27 = vpop.f32.mrf.mxu0 }
 0x205   : > { %v1853_v28 = vpack.c.bf16 %v1837_v7, %v1837_v7  ;;  %v1782_v4 = vadd.f32 %v1757_v18, %v1650_v13 }
 0x207   : > { %1870 = vst.msk [vmem:[%s2592_s7 + $0x24] sm:$0xf] %vm1860_vm4, %v1853_v28  ;;  %v1802_v21 = vmul.f32 %v3306_v60, %v1782_v4 }
 0x208   : > { %v1495_v12 = vpop.f32.mrf.mxu2 }
 0x209   : > { %v1822_v33 = vadd.f32 %v3311_v16, %v1802_v21  ;;  %v1519_v57 = vadd.f32 %v1495_v12, %v1386_v19  ;;  %v1627_v23 = vpop.f32.mrf.mxu3  ;;  %v1365_v26 = vpop.f32.mrf.mxu1 }
 0x20a   : > { %v1387_v39 = vadd.f32 %v1365_v26, %v3281_v24 }
 0x20b   : > { %v1838_v30 = vmax.f32 %v1822_v33, 0.0  ;;  %v1651_v62 = vadd.f32 %v1627_v23, %v1519_v57 }
 0x20c   : > { %v1762_v35 = vpop.f32.mrf.mxu0 }
 0x20d   : > { %v1854_v44 = vpack.c.bf16 %v1838_v30, %v1838_v30  ;;  %v1783_v34 = vadd.f32 %v1759_v27, %v1651_v62 }
 0x20f   : > { %1871 = vst.msk [vmem:[%s2592_s7 + $0x28] sm:$0xf] %vm1860_vm4, %v1854_v44  ;;  %v1803_v20 = vmul.f32 %v3306_v60, %v1783_v34 }
 0x210   : > { %v1498_v43 = vpop.f32.mrf.mxu2 }
 0x211   : > { %v1823_v0 = vadd.f32 %v3311_v16, %v1803_v20  ;;  %v1520_v42 = vadd.f32 %v1498_v43, %v1387_v39  ;;  %v1630_v53 = vpop.f32.mrf.mxu3  ;;  %v1367_v47 = vpop.f32.mrf.mxu1 }
 0x212   : > { %v1388_v25 = vadd.f32 %v1367_v47, %v3292_v51 }
 0x213   : > { %v1839_v31 = vmax.f32 %v1823_v0, 0.0  ;;  %v1652_v5 = vadd.f32 %v1630_v53, %v1520_v42 }
 0x214   : > { %v1764_v48 = vpop.f32.mrf.mxu0 }
 0x215   : > { %v1855_v58 = vpack.c.bf16 %v1839_v31, %v1839_v31  ;;  %v1784_v49 = vadd.f32 %v1762_v35, %v1652_v5 }
 0x217   : > { %1872 = vst.msk [vmem:[%s2592_s7 + $0x2c] sm:$0xf] %vm1860_vm4, %v1855_v58  ;;  %v1804_v50 = vmul.f32 %v3306_v60, %v1784_v49 }
 0x218   : > { %v1500_v1 = vpop.f32.mrf.mxu2 }
 0x219   : > { %v1824_v24 = vadd.f32 %v3311_v16, %v1804_v50  ;;  %v1521_v59 = vadd.f32 %v1500_v1, %v1388_v25  ;;  %v1632_v32 = vpop.f32.mrf.mxu3  ;;  %v1370_v36 = vpop.f32.mrf.mxu1 }
 0x21a   : > { %v1389_v52 = vadd.f32 %v1370_v36, %v3297_v45 }
 0x21b   : > { %v1840_v8 = vmax.f32 %v1824_v24, 0.0  ;;  %v1653_v61 = vadd.f32 %v1632_v32, %v1521_v59 }
 0x21c   : > { %v1767_v56 = vpop.f32.mrf.mxu0 }
 0x21d   : > { %v1856_v37 = vpack.c.bf16 %v1840_v8, %v1840_v8  ;;  %v1785_v46 = vadd.f32 %v1764_v48, %v1653_v61 }
 0x21f   : > { %1873 = vst.msk [vmem:[%s2592_s7 + $0x30] sm:$0xf] %vm1860_vm4, %v1856_v37  ;;  %v1805_v22 = vmul.f32 %v3306_v60, %v1785_v46 }
 0x220   : > { %v1503_v10 = vpop.f32.mrf.mxu2 }
 0x221   : > { %v1825_v51 = vadd.f32 %v3311_v16, %v1805_v22  ;;  %v1522_v29 = vadd.f32 %v1503_v10, %v1389_v52  ;;  %v1635_v2 = vpop.f32.mrf.mxu3  ;;  %v1372_v11 = vpop.f32.mrf.mxu1 }
 0x222   : > { %v1390_v14 = vadd.f32 %v1372_v11, %v3300_v38 }
 0x223   : > { %v1841_v54 = vmax.f32 %v1825_v51, 0.0  ;;  %v1654_v3 = vadd.f32 %v1635_v2, %v1522_v29 }
 0x224   : > { %v1769_v55 = vpop.f32.mrf.mxu0 }
 0x225   : > { %v1857_v18 = vpack.c.bf16 %v1841_v54, %v1841_v54  ;;  %v1786_v15 = vadd.f32 %v1767_v56, %v1654_v3 }
 0x227   : > { %1874 = vst.msk [vmem:[%s2592_s7 + $0x34] sm:$0xf] %vm1860_vm4, %v1857_v18  ;;  %v1806_v17 = vmul.f32 %v3306_v60, %v1786_v15 }
 0x228   : > { %v1505_v45 = vpop.f32.mrf.mxu2 }
 0x229   : > { %v1826_v41 = vadd.f32 %v3311_v16, %v1806_v17  ;;  %v1523_v6 = vadd.f32 %v1505_v45, %v1390_v14  ;;  %v1637_v40 = vpop.f32.mrf.mxu3 }
 0x22b   : > { %v1842_v63 = vmax.f32 %v1826_v41, 0.0  ;;  %v1655_v9 = vadd.f32 %v1637_v40, %v1523_v6 }
 0x22d   : > { %v1858_v7 = vpack.c.bf16 %v1842_v63, %v1842_v63  ;;  %v1787_v13 = vadd.f32 %v1769_v55, %v1655_v9 }
 0x22f   : > { %1875 = vst.msk [vmem:[%s2592_s7 + $0x38] sm:$0xf] %vm1860_vm4, %v1858_v7  ;;  %v1807_v27 = vmul.f32 %v3306_v60, %v1787_v13 }
 0x231   : > { %v1827_v28 = vadd.f32 %v3311_v16, %v1807_v27 }
 0x233   : > { %v1843_v4 = vmax.f32 %v1827_v28, 0.0 }
 0x235   : > { %v1859_v21 = vpack.c.bf16 %v1843_v4, %v1843_v4 }
 0x237   : > { %1876 = vst.msk [vmem:[%s2592_s7 + $0x3c] sm:$0xf] %vm1860_vm4, %v1859_v21 }
 0x238 PF: > { %s14_s19 = sadd.s32 1, %s2523_s19   ;;  %s3412_s15 = smov %s2515_s17 }
 0x239   : > { %p11_p8 = scmp.ge.s32.totalorder %s14_s19, 6   ;;  %s3413_s16 = smov %s2519_s18 }
 0x23a   : > { %s3414_s17 = smov %s3417_s20  ;;  %s3415_s18 = smov %s3421_s21 }
 0x23b   :  { %13 = sbr.rel (!%p11_p8) target bundleno = 3 (0x3), region = 89 }

</bundles_post_ra>
